<compile_context>
chip_gen: v7x
topology: tpu7x:2x2x1
jax: 0.10.0
libtpu: 0.0.40
codegen_flags: <defaults>
</compile_context>

<pallas_src>
import jax
import jax.numpy as jnp
import numpy as np
from jax.experimental import pallas as pl
from jax.experimental.pallas import tpu as pltpu


def _round_up(x, m):
    return (x + m - 1) // m * m


def fold_bn(gamma, beta, mean, var, eps=1e-5):
    scale = gamma / jnp.sqrt(var + eps)
    bias = beta - mean * scale
    return scale, bias


# ----------------------------------------------------------------------------
# Fused Down2 kernel factory (all sizes are Python constants at trace time).
# ----------------------------------------------------------------------------
def _make_down2_kernel(Cin, Cout, H, W, NB):
    Wp = W + 4                                   # padded row width (pad=2 each side)
    Q = _round_up((H - 1) * Wp + W, 128)         # matmul lane width covering all valid outputs
    XW = _round_up(Q + 4 * Wp + 4, 128)          # padded flat width the dilated taps read
    # dilation-2 tap offsets in flat (padded-row) coordinates, tap t = 3*ky + kx
    tap_offs = [2 * ky * Wp + 2 * kx for ky in range(3) for kx in range(3)]
    pad_l = 2 * Wp + 2                           # constant shift: valid y1 -> padded layout
    pad_r = XW - Q - pad_l

    def conv_bn_relu(xs, w_b16, b_col):
        # im2col: the 9 shifted views stacked along the contraction axis -> one K=9*C
        # MXU matmul (bf16 operands, f32 accumulation).
        cols = jnp.concatenate([xs[:, off:off + Q] for off in tap_offs],
                               axis=0).astype(jnp.bfloat16)              # (9*C, Q)
        acc = jnp.dot(w_b16, cols, preferred_element_type=jnp.float32)   # (Cout, Q) f32
        return jnp.maximum(acc + b_col, 0.0)                             # folded-BN bias + ReLU

    def kernel(x1_ref, x2_ref, s_ref, p_ref, g_ref,
               w1_ref, w2_ref, b1_ref, b2_ref, o_ref):
        # x1_ref: (NB, Cin, H*W)       x2_ref: (NB, Cin, 4*H*W)   (lane-dense)
        # s_ref:  (H*W, XW)  bf16      p_ref:  (4*H*W, XW) bf16   g_ref: (Q, H*W) bf16
        # w1_ref: (Cout, 9*2Cin) bf16  w2_ref: (Cout, 9*Cout) bf16  (BN scale pre-folded)
        # b1/b2:  (Cout, 1) f32        o_ref:  (NB, Cout, H*W)
        w1 = w1_ref[...]
        w2 = w2_ref[...]
        b1 = b1_ref[...]
        b2 = b2_ref[...]
        smat = s_ref[...]
        pmat = p_ref[...]
        gmat = g_ref[...]

        # valid-output mask in padded-row flat coordinates (hoisted out of the NB loop;
        # JAX does not CSE broadcast_in_dim).
        q_pos = jax.lax.broadcasted_iota(jnp.int32, (1, Q), 1)
        valid = (q_pos % Wp < W) & (q_pos < H * Wp)

        for n in range(NB):                      # NB is a static Python constant (unrolled)
            # ---- MaxPool2d(2,2) on lane-dense flat x2: neighbour maxes via flat shifts ----
            a = x2_ref[n]                                                   # (Cin, 4HW)
            m1 = jnp.maximum(a, jnp.concatenate([a[:, 1:], a[:, :1]], axis=1))
            m2 = jnp.maximum(
                m1, jnp.concatenate([m1[:, 2 * W:], m1[:, :2 * W]], axis=1))
            # wrap pollution only at odd columns / last row -> never selected below.

            # ---- place x1 and the 2x-subsampled pool into the padded flat layout with two
            #      constant 0/1 scatter matmuls (halo zeros come out of the matmul for free)
            x1p = jnp.dot(x1_ref[n].astype(jnp.bfloat16), smat,
                          preferred_element_type=jnp.float32)               # (Cin, XW)
            plp = jnp.dot(m2.astype(jnp.bfloat16), pmat,
                          preferred_element_type=jnp.float32)               # (Cin, XW)
            xs1 = jnp.concatenate([x1p, plp], axis=0)                       # (2Cin, XW)

            # ---- conv1 (3x3, dilation=2, pad=2, no bias) + BN1 + ReLU --------------------
            y1 = conv_bn_relu(xs1, w1, b1)                                  # (Cout, Q)

            # ---- re-pad y1 for conv2: mask junk columns (they become conv2's halo) and
            #      shift by the constant pad offset with one lane concat ------------------
            y1m = jnp.where(valid, y1, 0.0)
            xs2 = jnp.concatenate(
                [jnp.zeros((Cout, pad_l), jnp.float32), y1m,
                 jnp.zeros((Cout, pad_r), jnp.float32)], axis=1)            # (Cout, XW)

            # ---- conv2 + BN2 + ReLU -----------------------------------------------------
            y2 = conv_bn_relu(xs2, w2, b2)                                  # (Cout, Q)

            # ---- gather valid columns with one constant 0/1 matmul; single wide store ----
            out = jnp.dot(y2.astype(jnp.bfloat16), gmat,
                          preferred_element_type=jnp.float32)               # (Cout, H*W)
            o_ref[n] = out.astype(o_ref.dtype)

    return kernel, Q, XW, Wp


# ----------------------------------------------------------------------------
# Down2 forward (NCHW in / NCHW out, like the PyTorch module).
# ----------------------------------------------------------------------------
def down2_forward(x1_nchw, x2_nchw, params, batch_block=None):
    N, Cin, H, W = x1_nchw.shape
    assert x2_nchw.shape == (N, Cin, 2 * H, 2 * W)
    Cout = params["w1_oihw"].shape[0]
    HW = H * W

    # Images per grid step (amortizes per-step overhead).  For large N on v7x keep
    # grid >= 4 * num_cores steps, i.e. cap NB at ~N // 8.
    if batch_block is None:
        batch_block = 4 if N % 4 == 0 else (2 if N % 2 == 0 else 1)
    NB = batch_block
    assert N % NB == 0

    kernel, Q, XW, Wp = _make_down2_kernel(Cin, Cout, H, W, NB)

    # Fold eval-mode BN: scale into the conv weights (exact, f32), bias kept separate.
    s1, b1 = fold_bn(*params["bn1"])
    s2, b2 = fold_bn(*params["bn2"])
    w1_col = jnp.transpose(params["w1_oihw"], (0, 2, 3, 1)).reshape(Cout, 9 * 2 * Cin)
    w2_col = jnp.transpose(params["w2_oihw"], (0, 2, 3, 1)).reshape(Cout, 9 * Cout)
    w1_b16 = (w1_col * s1[:, None]).astype(jnp.bfloat16)
    w2_b16 = (w2_col * s2[:, None]).astype(jnp.bfloat16)
    b1 = b1.reshape(Cout, 1).astype(jnp.float32)
    b2 = b2.reshape(Cout, 1).astype(jnp.float32)

    # Constant 0/1 scatter / gather matrices (trace-time numpy; grid-invariant inputs, so
    # they are DMA'd to VMEM once and reused by every grid step).
    hh, ww = np.meshgrid(np.arange(H), np.arange(W), indexing="ij")
    src_compact = (hh * W + ww).ravel()               # h*W + w
    src_pool = (2 * hh * (2 * W) + 2 * ww).ravel()    # (2h)*(2W) + 2w in flat x2
    dst_pad = ((hh + 2) * Wp + 2 + ww).ravel()        # (h+2)*Wp + 2 + w (padded layout)
    src_pad = (hh * Wp + ww).ravel()                  # h*Wp + w (conv output layout)
    S = np.zeros((HW, XW), np.float32); S[src_compact, dst_pad] = 1.0
    P = np.zeros((4 * HW, XW), np.float32); P[src_pool, dst_pad] = 1.0
    G = np.zeros((Q, HW), np.float32); G[src_pad, src_compact] = 1.0
    S = jnp.asarray(S, jnp.bfloat16)
    P = jnp.asarray(P, jnp.bfloat16)
    G = jnp.asarray(G, jnp.bfloat16)

    # Lane-dense flat views (free reshapes, no HBM transposes).
    x1f = x1_nchw.reshape(N, Cin, HW)
    x2f = x2_nchw.reshape(N, Cin, 4 * HW)

    out_flat = pl.pallas_call(
        kernel,
        out_shape=jax.ShapeDtypeStruct((N, Cout, HW), x1_nchw.dtype),
        grid=(N // NB,),
        in_specs=[
            pl.BlockSpec((NB, Cin, HW), lambda n: (n, 0, 0)),
            pl.BlockSpec((NB, Cin, 4 * HW), lambda n: (n, 0, 0)),
            pl.BlockSpec((HW, XW), lambda n: (0, 0)),
            pl.BlockSpec((4 * HW, XW), lambda n: (0, 0)),
            pl.BlockSpec((Q, HW), lambda n: (0, 0)),
            pl.BlockSpec((Cout, 9 * 2 * Cin), lambda n: (0, 0)),
            pl.BlockSpec((Cout, 9 * Cout), lambda n: (0, 0)),
            pl.BlockSpec((Cout, 1), lambda n: (0, 0)),
            pl.BlockSpec((Cout, 1), lambda n: (0, 0)),
        ],
        out_specs=pl.BlockSpec((NB, Cout, HW), lambda n: (n, 0, 0)),
        compiler_params=pltpu.CompilerParams(
            dimension_semantics=("parallel",)),
        # Per-step VMEM is only a few MB at these sizes; set vmem_limit_bytes explicitly
        # when scaling NB / H / W (v5e scoped default is only 16 MiB).
    )(x1f, x2f, S, P, G, w1_b16, w2_b16, b1, b2)

    return out_flat.reshape(N, Cout, H, W)   # free reshape back to NCHW


# ----------------------------------------------------------------------------
# Pure-JAX reference for verification (mirrors PyTorch semantics, full f32).
# ----------------------------------------------------------------------------
def reference_forward(x1, x2, params):  # NCHW
    N, C, H2, W2 = x2.shape
    x2p = x2.reshape(N, C, H2 // 2, 2, W2 // 2, 2).max(axis=(3, 5))
    x3 = jnp.concatenate([x1, x2p], axis=1)

    def conv(x, w_oihw):
        return jax.lax.conv_general_dilated(
            x, w_oihw, window_strides=(1, 1), padding=((2, 2), (2, 2)),
            rhs_dilation=(2, 2), dimension_numbers=("NCHW", "OIHW", "NCHW"),
            precision=jax.lax.Precision.HIGHEST)

    def bn_relu(x, bn):
        gamma, beta, mean, var = bn
        s = gamma / jnp.sqrt(var + 1e-5)
        b = beta - mean * s
        return jnp.maximum(x * s[None, :, None, None] + b[None, :, None, None], 0.0)

    y = bn_relu(conv(x3, params["w1_oihw"]), params["bn1"])
    y = bn_relu(conv(y, params["w2_oihw"]), params["bn2"])
    return y


if __name__ == "__main__":
    key = jax.random.PRNGKey(0)
    ks = jax.random.split(key, 12)

    N, Cin, Cout = 2, 4, 8
    H, W = 16, 16  # x1 spatial; x2 is 2x that and gets max-pooled down

    x1 = jax.random.normal(ks[0], (N, Cin, H, W), jnp.float32)
    x2 = jax.random.normal(ks[1], (N, Cin, 2 * H, 2 * W), jnp.float32)

    # Conv weights (PyTorch OIHW shapes)
    w1_oihw = jax.random.normal(ks[2], (Cout, 2 * Cin, 3, 3), jnp.float32) * 0.2
    w2_oihw = jax.random.normal(ks[3], (Cout, Cout, 3, 3), jnp.float32) * 0.2

    # BatchNorm params (gamma, beta, running_mean, running_var)
    bn1 = (jax.random.uniform(ks[4], (Cout,), jnp.float32, 0.5, 1.5),
           jax.random.normal(ks[5], (Cout,), jnp.float32) * 0.1,
           jax.random.normal(ks[6], (Cout,), jnp.float32) * 0.1,
           jax.random.uniform(ks[7], (Cout,), jnp.float32, 0.5, 1.5))
    bn2 = (jax.random.uniform(ks[8], (Cout,), jnp.float32, 0.5, 1.5),
           jax.random.normal(ks[9], (Cout,), jnp.float32) * 0.1,
           jax.random.normal(ks[10], (Cout,), jnp.float32) * 0.1,
           jax.random.uniform(ks[11], (Cout,), jnp.float32, 0.5, 1.5))

    params = {"w1_oihw": w1_oihw, "w2_oihw": w2_oihw, "bn1": bn1, "bn2": bn2}

    out = jax.jit(down2_forward)(x1, x2, params)
    out = jax.block_until_ready(out)
    assert out.shape == (N, Cout, H, W), out.shape

    ref = jax.block_until_ready(reference_forward(x1, x2, params))
    # Tolerance note: the kernel runs both dilated convs with bf16 MXU operands
    # (per the performance review, f32 accumulation), so agreement with the f32
    # reference is bf16-level (~1e-2 relative); structural bugs would be O(1).
    np.testing.assert_allclose(np.asarray(out), np.asarray(ref), rtol=2e-2, atol=5e-2)

    print("KERNEL_OK")
</pallas_src>

<mosaic_0001>
module attributes {stable_mosaic.version = 11 : i64} {
  func.func @kernel(%arg0: i32, %arg1: memref<2x4x256xf32, #tpu.memory_space<vmem>>, %arg2: memref<2x4x1024xf32, #tpu.memory_space<vmem>>, %arg3: memref<256x512xbf16, #tpu.memory_space<vmem>>, %arg4: memref<1024x512xbf16, #tpu.memory_space<vmem>>, %arg5: memref<384x256xbf16, #tpu.memory_space<vmem>>, %arg6: memref<8x72xbf16, #tpu.memory_space<vmem>>, %arg7: memref<8x72xbf16, #tpu.memory_space<vmem>>, %arg8: memref<8x1xf32, #tpu.memory_space<vmem>>, %arg9: memref<8x1xf32, #tpu.memory_space<vmem>>, %arg10: memref<2x8x256xf32, #tpu.memory_space<vmem>>) attributes {dimension_semantics = [#tpu.dimension_semantics<parallel>], iteration_bounds = array<i64: 1>, scalar_prefetch = 0 : i64, scratch_operands = 0 : i64, tpu.core_type = #tpu.core_type<tc>, window_params = [{transform_indices = @transform_0, window_bounds = array<i64: 2, 4, 256>}, {transform_indices = @transform_1, window_bounds = array<i64: 2, 4, 1024>}, {pipeline_mode = #tpu.pipeline_mode<synchronous>, transform_indices = @transform_2, window_bounds = array<i64: 256, 512>}, {pipeline_mode = #tpu.pipeline_mode<synchronous>, transform_indices = @transform_3, window_bounds = array<i64: 1024, 512>}, {pipeline_mode = #tpu.pipeline_mode<synchronous>, transform_indices = @transform_4, window_bounds = array<i64: 384, 256>}, {pipeline_mode = #tpu.pipeline_mode<synchronous>, transform_indices = @transform_5, window_bounds = array<i64: 8, 72>}, {pipeline_mode = #tpu.pipeline_mode<synchronous>, transform_indices = @transform_6, window_bounds = array<i64: 8, 72>}, {pipeline_mode = #tpu.pipeline_mode<synchronous>, transform_indices = @transform_7, window_bounds = array<i64: 8, 1>}, {pipeline_mode = #tpu.pipeline_mode<synchronous>, transform_indices = @transform_8, window_bounds = array<i64: 8, 1>}, {transform_indices = @transform_9, window_bounds = array<i64: 2, 8, 256>}]} {
    %c0 = arith.constant 0 : index
    %c0_0 = arith.constant 0 : index
    %0 = vector.load %arg6[%c0, %c0_0] : memref<8x72xbf16, #tpu.memory_space<vmem>>, vector<8x72xbf16>
    %c0_1 = arith.constant 0 : index
    %c0_2 = arith.constant 0 : index
    %1 = vector.load %arg7[%c0_1, %c0_2] : memref<8x72xbf16, #tpu.memory_space<vmem>>, vector<8x72xbf16>
    %c0_3 = arith.constant 0 : index
    %c0_4 = arith.constant 0 : index
    %2 = vector.load %arg8[%c0_3, %c0_4] : memref<8x1xf32, #tpu.memory_space<vmem>>, vector<8x1xf32>
    %c0_5 = arith.constant 0 : index
    %c0_6 = arith.constant 0 : index
    %3 = vector.load %arg9[%c0_5, %c0_6] : memref<8x1xf32, #tpu.memory_space<vmem>>, vector<8x1xf32>
    %c0_7 = arith.constant 0 : index
    %c0_8 = arith.constant 0 : index
    %4 = vector.load %arg3[%c0_7, %c0_8] : memref<256x512xbf16, #tpu.memory_space<vmem>>, vector<256x512xbf16>
    %c0_9 = arith.constant 0 : index
    %c0_10 = arith.constant 0 : index
    %5 = vector.load %arg4[%c0_9, %c0_10] : memref<1024x512xbf16, #tpu.memory_space<vmem>>, vector<1024x512xbf16>
    %c0_11 = arith.constant 0 : index
    %c0_12 = arith.constant 0 : index
    %6 = vector.load %arg5[%c0_11, %c0_12] : memref<384x256xbf16, #tpu.memory_space<vmem>>, vector<384x256xbf16>
    %7 = tpu.iota {dimensions = array<i32: 1>} : vector<1x384xi32>
    %c20_i32 = arith.constant 20 : i32
    %c0_i32 = arith.constant 0 : i32
    %8 = arith.cmpi eq, %c20_i32, %c0_i32 : i32
    %c1_i32 = arith.constant 1 : i32
    %9 = arith.select %8, %c1_i32, %c20_i32 : i32
    %10 = vector.broadcast %9 : i32 to vector<1x384xi32>
    %11 = arith.remsi %7, %10 : vector<1x384xi32>
    %c0_i32_13 = arith.constant 0 : i32
    %12 = vector.broadcast %c0_i32_13 : i32 to vector<1x384xi32>
    %13 = arith.cmpi ne, %11, %12 : vector<1x384xi32>
    %c0_i32_14 = arith.constant 0 : i32
    %14 = vector.broadcast %c0_i32_14 : i32 to vector<1x384xi32>
    %15 = arith.cmpi slt, %11, %14 : vector<1x384xi32>
    %c0_i32_15 = arith.constant 0 : i32
    %16 = arith.cmpi slt, %9, %c0_i32_15 : i32
    %17 = vector.broadcast %16 : i1 to vector<1x384xi1>
    %18 = vector.broadcast %17 : vector<1x384xi1> to vector<1x384xi1>
    %19 = arith.xori %15, %18 : vector<1x384xi1>
    %20 = arith.andi %19, %13 : vector<1x384xi1>
    %21 = vector.broadcast %9 : i32 to vector<1x384xi32>
    %22 = arith.addi %11, %21 : vector<1x384xi32>
    %23 = arith.select %20, %22, %11 : vector<1x384xi1>, vector<1x384xi32>
    %c16_i32 = arith.constant 16 : i32
    %24 = vector.broadcast %c16_i32 : i32 to vector<1x384xi32>
    %25 = arith.cmpi slt, %23, %24 : vector<1x384xi32>
    %c320_i32 = arith.constant 320 : i32
    %26 = vector.broadcast %c320_i32 : i32 to vector<1x384xi32>
    %27 = arith.cmpi slt, %7, %26 : vector<1x384xi32>
    %28 = arith.andi %25, %27 : vector<1x384xi1>
    %c0_16 = arith.constant 0 : index
    %c0_17 = arith.constant 0 : index
    %c0_18 = arith.constant 0 : index
    %29 = vector.load %arg2[%c0_16, %c0_17, %c0_18] : memref<2x4x1024xf32, #tpu.memory_space<vmem>>, vector<1x4x1024xf32>
    %30 = vector.shape_cast %29 : vector<1x4x1024xf32> to vector<4x1024xf32>
    %31 = vector.extract_strided_slice %30 {offsets = [0, 1], sizes = [4, 1023], strides = [1, 1]} : vector<4x1024xf32> to vector<4x1023xf32>
    %32 = vector.extract_strided_slice %30 {offsets = [0, 0], sizes = [4, 1], strides = [1, 1]} : vector<4x1024xf32> to vector<4x1xf32>
    %33 = tpu.concatenate %31, %32 in 1 : vector<4x1023xf32>, vector<4x1xf32> -> vector<4x1024xf32>
    %34 = arith.maximumf %30, %33 : vector<4x1024xf32>
    %35 = vector.extract_strided_slice %34 {offsets = [0, 32], sizes = [4, 992], strides = [1, 1]} : vector<4x1024xf32> to vector<4x992xf32>
    %36 = vector.extract_strided_slice %34 {offsets = [0, 0], sizes = [4, 32], strides = [1, 1]} : vector<4x1024xf32> to vector<4x32xf32>
    %37 = tpu.concatenate %35, %36 in 1 : vector<4x992xf32>, vector<4x32xf32> -> vector<4x1024xf32>
    %38 = arith.maximumf %34, %37 : vector<4x1024xf32>
    %c0_19 = arith.constant 0 : index
    %c0_20 = arith.constant 0 : index
    %c0_21 = arith.constant 0 : index
    %39 = vector.load %arg1[%c0_19, %c0_20, %c0_21] : memref<2x4x256xf32, #tpu.memory_space<vmem>>, vector<1x4x256xf32>
    %40 = vector.shape_cast %39 : vector<1x4x256xf32> to vector<4x256xf32>
    %41 = arith.truncf %40 : vector<4x256xf32> to vector<4x256xbf16>
    %cst = arith.constant dense<0.000000e+00> : vector<4x512xf32>
    %42 = tpu.matmul %41, %4, %cst {dimension_numbers = #tpu.dot_dimension_numbers<[1], [0], [0], [1], [0, 0, 1, 1], [], []>} : vector<4x256xbf16>, vector<256x512xbf16>, vector<4x512xf32> -> vector<4x512xf32>
    %43 = arith.truncf %38 : vector<4x1024xf32> to vector<4x1024xbf16>
    %cst_22 = arith.constant dense<0.000000e+00> : vector<4x512xf32>
    %44 = tpu.matmul %43, %5, %cst_22 {dimension_numbers = #tpu.dot_dimension_numbers<[1], [0], [0], [1], [0, 0, 1, 1], [], []>} : vector<4x1024xbf16>, vector<1024x512xbf16>, vector<4x512xf32> -> vector<4x512xf32>
    %45 = tpu.concatenate %42, %44 in 0 : vector<4x512xf32>, vector<4x512xf32> -> vector<8x512xf32>
    %46 = vector.extract_strided_slice %45 {offsets = [0, 0], sizes = [8, 384], strides = [1, 1]} : vector<8x512xf32> to vector<8x384xf32>
    %47 = vector.extract_strided_slice %45 {offsets = [0, 2], sizes = [8, 384], strides = [1, 1]} : vector<8x512xf32> to vector<8x384xf32>
    %48 = vector.extract_strided_slice %45 {offsets = [0, 4], sizes = [8, 384], strides = [1, 1]} : vector<8x512xf32> to vector<8x384xf32>
    %49 = vector.extract_strided_slice %45 {offsets = [0, 40], sizes = [8, 384], strides = [1, 1]} : vector<8x512xf32> to vector<8x384xf32>
    %50 = vector.extract_strided_slice %45 {offsets = [0, 42], sizes = [8, 384], strides = [1, 1]} : vector<8x512xf32> to vector<8x384xf32>
    %51 = vector.extract_strided_slice %45 {offsets = [0, 44], sizes = [8, 384], strides = [1, 1]} : vector<8x512xf32> to vector<8x384xf32>
    %52 = vector.extract_strided_slice %45 {offsets = [0, 80], sizes = [8, 384], strides = [1, 1]} : vector<8x512xf32> to vector<8x384xf32>
    %53 = vector.extract_strided_slice %45 {offsets = [0, 82], sizes = [8, 384], strides = [1, 1]} : vector<8x512xf32> to vector<8x384xf32>
    %54 = vector.extract_strided_slice %45 {offsets = [0, 84], sizes = [8, 384], strides = [1, 1]} : vector<8x512xf32> to vector<8x384xf32>
    %55 = tpu.concatenate %46, %47, %48, %49, %50, %51, %52, %53, %54 in 0 : vector<8x384xf32>, vector<8x384xf32>, vector<8x384xf32>, vector<8x384xf32>, vector<8x384xf32>, vector<8x384xf32>, vector<8x384xf32>, vector<8x384xf32>, vector<8x384xf32> -> vector<72x384xf32>
    %56 = arith.truncf %55 : vector<72x384xf32> to vector<72x384xbf16>
    %cst_23 = arith.constant dense<0.000000e+00> : vector<8x384xf32>
    %57 = tpu.matmul %0, %56, %cst_23 {dimension_numbers = #tpu.dot_dimension_numbers<[1], [0], [0], [1], [0, 0, 1, 1], [], []>} : vector<8x72xbf16>, vector<72x384xbf16>, vector<8x384xf32> -> vector<8x384xf32>
    %58 = vector.broadcast %2 : vector<8x1xf32> to vector<8x384xf32>
    %59 = arith.addf %57, %58 : vector<8x384xf32>
    %cst_24 = arith.constant 0.000000e+00 : f32
    %60 = vector.broadcast %cst_24 : f32 to vector<8x384xf32>
    %61 = arith.maximumf %59, %60 : vector<8x384xf32>
    %cst_25 = arith.constant 0.000000e+00 : f32
    %62 = vector.shape_cast %28 : vector<1x384xi1> to vector<1x384xi1>
    %63 = vector.broadcast %62 : vector<1x384xi1> to vector<8x384xi1>
    %64 = vector.broadcast %cst_25 : f32 to vector<8x384xf32>
    %65 = arith.select %63, %61, %64 : vector<8x384xi1>, vector<8x384xf32>
    %cst_26 = arith.constant 0.000000e+00 : f32
    %66 = vector.broadcast %cst_26 : f32 to vector<8x42xf32>
    %cst_27 = arith.constant 0.000000e+00 : f32
    %67 = vector.broadcast %cst_27 : f32 to vector<8x86xf32>
    %68 = tpu.concatenate %66, %65, %67 in 1 : vector<8x42xf32>, vector<8x384xf32>, vector<8x86xf32> -> vector<8x512xf32>
    %69 = vector.extract_strided_slice %68 {offsets = [0, 0], sizes = [8, 384], strides = [1, 1]} : vector<8x512xf32> to vector<8x384xf32>
    %70 = vector.extract_strided_slice %68 {offsets = [0, 2], sizes = [8, 384], strides = [1, 1]} : vector<8x512xf32> to vector<8x384xf32>
    %71 = vector.extract_strided_slice %68 {offsets = [0, 4], sizes = [8, 384], strides = [1, 1]} : vector<8x512xf32> to vector<8x384xf32>
    %72 = vector.extract_strided_slice %68 {offsets = [0, 40], sizes = [8, 384], strides = [1, 1]} : vector<8x512xf32> to vector<8x384xf32>
    %73 = vector.extract_strided_slice %68 {offsets = [0, 42], sizes = [8, 384], strides = [1, 1]} : vector<8x512xf32> to vector<8x384xf32>
    %74 = vector.extract_strided_slice %68 {offsets = [0, 44], sizes = [8, 384], strides = [1, 1]} : vector<8x512xf32> to vector<8x384xf32>
    %75 = vector.extract_strided_slice %68 {offsets = [0, 80], sizes = [8, 384], strides = [1, 1]} : vector<8x512xf32> to vector<8x384xf32>
    %76 = vector.extract_strided_slice %68 {offsets = [0, 82], sizes = [8, 384], strides = [1, 1]} : vector<8x512xf32> to vector<8x384xf32>
    %77 = vector.extract_strided_slice %68 {offsets = [0, 84], sizes = [8, 384], strides = [1, 1]} : vector<8x512xf32> to vector<8x384xf32>
    %78 = tpu.concatenate %69, %70, %71, %72, %73, %74, %75, %76, %77 in 0 : vector<8x384xf32>, vector<8x384xf32>, vector<8x384xf32>, vector<8x384xf32>, vector<8x384xf32>, vector<8x384xf32>, vector<8x384xf32>, vector<8x384xf32>, vector<8x384xf32> -> vector<72x384xf32>
    %79 = arith.truncf %78 : vector<72x384xf32> to vector<72x384xbf16>
    %cst_28 = arith.constant dense<0.000000e+00> : vector<8x384xf32>
    %80 = tpu.matmul %1, %79, %cst_28 {dimension_numbers = #tpu.dot_dimension_numbers<[1], [0], [0], [1], [0, 0, 1, 1], [], []>} : vector<8x72xbf16>, vector<72x384xbf16>, vector<8x384xf32> -> vector<8x384xf32>
    %81 = vector.broadcast %3 : vector<8x1xf32> to vector<8x384xf32>
    %82 = arith.addf %80, %81 : vector<8x384xf32>
    %cst_29 = arith.constant 0.000000e+00 : f32
    %83 = vector.broadcast %cst_29 : f32 to vector<8x384xf32>
    %84 = arith.maximumf %82, %83 : vector<8x384xf32>
    %85 = arith.truncf %84 : vector<8x384xf32> to vector<8x384xbf16>
    %cst_30 = arith.constant dense<0.000000e+00> : vector<8x256xf32>
    %86 = tpu.matmul %85, %6, %cst_30 {dimension_numbers = #tpu.dot_dimension_numbers<[1], [0], [0], [1], [0, 0, 1, 1], [], []>} : vector<8x384xbf16>, vector<384x256xbf16>, vector<8x256xf32> -> vector<8x256xf32>
    %c0_31 = arith.constant 0 : index
    %c0_32 = arith.constant 0 : index
    %c0_33 = arith.constant 0 : index
    %87 = vector.load %arg10[%c0_31, %c0_32, %c0_33] : memref<2x8x256xf32, #tpu.memory_space<vmem>>, vector<1x8x256xf32>
    %88 = vector.shape_cast %87 : vector<1x8x256xf32> to vector<8x256xf32>
    %89 = vector.shape_cast %86 : vector<8x256xf32> to vector<1x8x256xf32>
    tpu.vector_store %arg10[%c0_31, %c0_32, %c0_33], %89 {strides = array<i32>} : memref<2x8x256xf32, #tpu.memory_space<vmem>>, vector<1x8x256xf32>,
    %c1 = arith.constant 1 : index
    %c0_34 = arith.constant 0 : index
    %c0_35 = arith.constant 0 : index
    %90 = vector.load %arg2[%c1, %c0_34, %c0_35] : memref<2x4x1024xf32, #tpu.memory_space<vmem>>, vector<1x4x1024xf32>
    %91 = vector.shape_cast %90 : vector<1x4x1024xf32> to vector<4x1024xf32>
    %92 = vector.extract_strided_slice %91 {offsets = [0, 1], sizes = [4, 1023], strides = [1, 1]} : vector<4x1024xf32> to vector<4x1023xf32>
    %93 = vector.extract_strided_slice %91 {offsets = [0, 0], sizes = [4, 1], strides = [1, 1]} : vector<4x1024xf32> to vector<4x1xf32>
    %94 = tpu.concatenate %92, %93 in 1 : vector<4x1023xf32>, vector<4x1xf32> -> vector<4x1024xf32>
    %95 = arith.maximumf %91, %94 : vector<4x1024xf32>
    %96 = vector.extract_strided_slice %95 {offsets = [0, 32], sizes = [4, 992], strides = [1, 1]} : vector<4x1024xf32> to vector<4x992xf32>
    %97 = vector.extract_strided_slice %95 {offsets = [0, 0], sizes = [4, 32], strides = [1, 1]} : vector<4x1024xf32> to vector<4x32xf32>
    %98 = tpu.concatenate %96, %97 in 1 : vector<4x992xf32>, vector<4x32xf32> -> vector<4x1024xf32>
    %99 = arith.maximumf %95, %98 : vector<4x1024xf32>
    %c1_36 = arith.constant 1 : index
    %c0_37 = arith.constant 0 : index
    %c0_38 = arith.constant 0 : index
    %100 = vector.load %arg1[%c1_36, %c0_37, %c0_38] : memref<2x4x256xf32, #tpu.memory_space<vmem>>, vector<1x4x256xf32>
    %101 = vector.shape_cast %100 : vector<1x4x256xf32> to vector<4x256xf32>
    %102 = arith.truncf %101 : vector<4x256xf32> to vector<4x256xbf16>
    %cst_39 = arith.constant dense<0.000000e+00> : vector<4x512xf32>
    %103 = tpu.matmul %102, %4, %cst_39 {dimension_numbers = #tpu.dot_dimension_numbers<[1], [0], [0], [1], [0, 0, 1, 1], [], []>} : vector<4x256xbf16>, vector<256x512xbf16>, vector<4x512xf32> -> vector<4x512xf32>
    %104 = arith.truncf %99 : vector<4x1024xf32> to vector<4x1024xbf16>
    %cst_40 = arith.constant dense<0.000000e+00> : vector<4x512xf32>
    %105 = tpu.matmul %104, %5, %cst_40 {dimension_numbers = #tpu.dot_dimension_numbers<[1], [0], [0], [1], [0, 0, 1, 1], [], []>} : vector<4x1024xbf16>, vector<1024x512xbf16>, vector<4x512xf32> -> vector<4x512xf32>
    %106 = tpu.concatenate %103, %105 in 0 : vector<4x512xf32>, vector<4x512xf32> -> vector<8x512xf32>
    %107 = vector.extract_strided_slice %106 {offsets = [0, 0], sizes = [8, 384], strides = [1, 1]} : vector<8x512xf32> to vector<8x384xf32>
    %108 = vector.extract_strided_slice %106 {offsets = [0, 2], sizes = [8, 384], strides = [1, 1]} : vector<8x512xf32> to vector<8x384xf32>
    %109 = vector.extract_strided_slice %106 {offsets = [0, 4], sizes = [8, 384], strides = [1, 1]} : vector<8x512xf32> to vector<8x384xf32>
    %110 = vector.extract_strided_slice %106 {offsets = [0, 40], sizes = [8, 384], strides = [1, 1]} : vector<8x512xf32> to vector<8x384xf32>
    %111 = vector.extract_strided_slice %106 {offsets = [0, 42], sizes = [8, 384], strides = [1, 1]} : vector<8x512xf32> to vector<8x384xf32>
    %112 = vector.extract_strided_slice %106 {offsets = [0, 44], sizes = [8, 384], strides = [1, 1]} : vector<8x512xf32> to vector<8x384xf32>
    %113 = vector.extract_strided_slice %106 {offsets = [0, 80], sizes = [8, 384], strides = [1, 1]} : vector<8x512xf32> to vector<8x384xf32>
    %114 = vector.extract_strided_slice %106 {offsets = [0, 82], sizes = [8, 384], strides = [1, 1]} : vector<8x512xf32> to vector<8x384xf32>
    %115 = vector.extract_strided_slice %106 {offsets = [0, 84], sizes = [8, 384], strides = [1, 1]} : vector<8x512xf32> to vector<8x384xf32>
    %116 = tpu.concatenate %107, %108, %109, %110, %111, %112, %113, %114, %115 in 0 : vector<8x384xf32>, vector<8x384xf32>, vector<8x384xf32>, vector<8x384xf32>, vector<8x384xf32>, vector<8x384xf32>, vector<8x384xf32>, vector<8x384xf32>, vector<8x384xf32> -> vector<72x384xf32>
    %117 = arith.truncf %116 : vector<72x384xf32> to vector<72x384xbf16>
    %cst_41 = arith.constant dense<0.000000e+00> : vector<8x384xf32>
    %118 = tpu.matmul %0, %117, %cst_41 {dimension_numbers = #tpu.dot_dimension_numbers<[1], [0], [0], [1], [0, 0, 1, 1], [], []>} : vector<8x72xbf16>, vector<72x384xbf16>, vector<8x384xf32> -> vector<8x384xf32>
    %119 = vector.broadcast %2 : vector<8x1xf32> to vector<8x384xf32>
    %120 = arith.addf %118, %119 : vector<8x384xf32>
    %cst_42 = arith.constant 0.000000e+00 : f32
    %121 = vector.broadcast %cst_42 : f32 to vector<8x384xf32>
    %122 = arith.maximumf %120, %121 : vector<8x384xf32>
    %cst_43 = arith.constant 0.000000e+00 : f32
    %123 = vector.shape_cast %28 : vector<1x384xi1> to vector<1x384xi1>
    %124 = vector.broadcast %123 : vector<1x384xi1> to vector<8x384xi1>
    %125 = vector.broadcast %cst_43 : f32 to vector<8x384xf32>
    %126 = arith.select %124, %122, %125 : vector<8x384xi1>, vector<8x384xf32>
    %cst_44 = arith.constant 0.000000e+00 : f32
    %127 = vector.broadcast %cst_44 : f32 to vector<8x42xf32>
    %cst_45 = arith.constant 0.000000e+00 : f32
    %128 = vector.broadcast %cst_45 : f32 to vector<8x86xf32>
    %129 = tpu.concatenate %127, %126, %128 in 1 : vector<8x42xf32>, vector<8x384xf32>, vector<8x86xf32> -> vector<8x512xf32>
    %130 = vector.extract_strided_slice %129 {offsets = [0, 0], sizes = [8, 384], strides = [1, 1]} : vector<8x512xf32> to vector<8x384xf32>
    %131 = vector.extract_strided_slice %129 {offsets = [0, 2], sizes = [8, 384], strides = [1, 1]} : vector<8x512xf32> to vector<8x384xf32>
    %132 = vector.extract_strided_slice %129 {offsets = [0, 4], sizes = [8, 384], strides = [1, 1]} : vector<8x512xf32> to vector<8x384xf32>
    %133 = vector.extract_strided_slice %129 {offsets = [0, 40], sizes = [8, 384], strides = [1, 1]} : vector<8x512xf32> to vector<8x384xf32>
    %134 = vector.extract_strided_slice %129 {offsets = [0, 42], sizes = [8, 384], strides = [1, 1]} : vector<8x512xf32> to vector<8x384xf32>
    %135 = vector.extract_strided_slice %129 {offsets = [0, 44], sizes = [8, 384], strides = [1, 1]} : vector<8x512xf32> to vector<8x384xf32>
    %136 = vector.extract_strided_slice %129 {offsets = [0, 80], sizes = [8, 384], strides = [1, 1]} : vector<8x512xf32> to vector<8x384xf32>
    %137 = vector.extract_strided_slice %129 {offsets = [0, 82], sizes = [8, 384], strides = [1, 1]} : vector<8x512xf32> to vector<8x384xf32>
    %138 = vector.extract_strided_slice %129 {offsets = [0, 84], sizes = [8, 384], strides = [1, 1]} : vector<8x512xf32> to vector<8x384xf32>
    %139 = tpu.concatenate %130, %131, %132, %133, %134, %135, %136, %137, %138 in 0 : vector<8x384xf32>, vector<8x384xf32>, vector<8x384xf32>, vector<8x384xf32>, vector<8x384xf32>, vector<8x384xf32>, vector<8x384xf32>, vector<8x384xf32>, vector<8x384xf32> -> vector<72x384xf32>
    %140 = arith.truncf %139 : vector<72x384xf32> to vector<72x384xbf16>
    %cst_46 = arith.constant dense<0.000000e+00> : vector<8x384xf32>
    %141 = tpu.matmul %1, %140, %cst_46 {dimension_numbers = #tpu.dot_dimension_numbers<[1], [0], [0], [1], [0, 0, 1, 1], [], []>} : vector<8x72xbf16>, vector<72x384xbf16>, vector<8x384xf32> -> vector<8x384xf32>
    %142 = vector.broadcast %3 : vector<8x1xf32> to vector<8x384xf32>
    %143 = arith.addf %141, %142 : vector<8x384xf32>
    %cst_47 = arith.constant 0.000000e+00 : f32
    %144 = vector.broadcast %cst_47 : f32 to vector<8x384xf32>
    %145 = arith.maximumf %143, %144 : vector<8x384xf32>
    %146 = arith.truncf %145 : vector<8x384xf32> to vector<8x384xbf16>
    %cst_48 = arith.constant dense<0.000000e+00> : vector<8x256xf32>
    %147 = tpu.matmul %146, %6, %cst_48 {dimension_numbers = #tpu.dot_dimension_numbers<[1], [0], [0], [1], [0, 0, 1, 1], [], []>} : vector<8x384xbf16>, vector<384x256xbf16>, vector<8x256xf32> -> vector<8x256xf32>
    %c1_49 = arith.constant 1 : index
    %c0_50 = arith.constant 0 : index
    %c0_51 = arith.constant 0 : index
    %148 = vector.load %arg10[%c1_49, %c0_50, %c0_51] : memref<2x8x256xf32, #tpu.memory_space<vmem>>, vector<1x8x256xf32>
    %149 = vector.shape_cast %148 : vector<1x8x256xf32> to vector<8x256xf32>
    %150 = vector.shape_cast %147 : vector<8x256xf32> to vector<1x8x256xf32>
    tpu.vector_store %arg10[%c1_49, %c0_50, %c0_51], %150 {strides = array<i32>} : memref<2x8x256xf32, #tpu.memory_space<vmem>>, vector<1x8x256xf32>,
    return
  }
  func.func @transform_0(%arg0: i32) -> (i32, i32, i32) {
    %c0_i32 = arith.constant 0 : i32
    %c0_i32_0 = arith.constant 0 : i32
    %c0_i32_1 = arith.constant 0 : i32
    return %arg0, %c0_i32, %c0_i32_0 : i32, i32, i32
  }
  func.func @transform_1(%arg0: i32) -> (i32, i32, i32) {
    %c0_i32 = arith.constant 0 : i32
    %c0_i32_0 = arith.constant 0 : i32
    %c0_i32_1 = arith.constant 0 : i32
    return %arg0, %c0_i32, %c0_i32_0 : i32, i32, i32
  }
  func.func @transform_2(%arg0: i32) -> (i32, i32) {
    %c0_i32 = arith.constant 0 : i32
    %c0_i32_0 = arith.constant 0 : i32
    %c0_i32_1 = arith.constant 0 : i32
    return %c0_i32, %c0_i32_0 : i32, i32
  }
  func.func @transform_3(%arg0: i32) -> (i32, i32) {
    %c0_i32 = arith.constant 0 : i32
    %c0_i32_0 = arith.constant 0 : i32
    %c0_i32_1 = arith.constant 0 : i32
    return %c0_i32, %c0_i32_0 : i32, i32
  }
  func.func @transform_4(%arg0: i32) -> (i32, i32) {
    %c0_i32 = arith.constant 0 : i32
    %c0_i32_0 = arith.constant 0 : i32
    %c0_i32_1 = arith.constant 0 : i32
    return %c0_i32, %c0_i32_0 : i32, i32
  }
  func.func @transform_5(%arg0: i32) -> (i32, i32) {
    %c0_i32 = arith.constant 0 : i32
    %c0_i32_0 = arith.constant 0 : i32
    %c0_i32_1 = arith.constant 0 : i32
    return %c0_i32, %c0_i32_0 : i32, i32
  }
  func.func @transform_6(%arg0: i32) -> (i32, i32) {
    %c0_i32 = arith.constant 0 : i32
    %c0_i32_0 = arith.constant 0 : i32
    %c0_i32_1 = arith.constant 0 : i32
    return %c0_i32, %c0_i32_0 : i32, i32
  }
  func.func @transform_7(%arg0: i32) -> (i32, i32) {
    %c0_i32 = arith.constant 0 : i32
    %c0_i32_0 = arith.constant 0 : i32
    %c0_i32_1 = arith.constant 0 : i32
    return %c0_i32, %c0_i32_0 : i32, i32
  }
  func.func @transform_8(%arg0: i32) -> (i32, i32) {
    %c0_i32 = arith.constant 0 : i32
    %c0_i32_0 = arith.constant 0 : i32
    %c0_i32_1 = arith.constant 0 : i32
    return %c0_i32, %c0_i32_0 : i32, i32
  }
  func.func @transform_9(%arg0: i32) -> (i32, i32, i32) {
    %c0_i32 = arith.constant 0 : i32
    %c0_i32_0 = arith.constant 0 : i32
    %c0_i32_1 = arith.constant 0 : i32
    return %arg0, %c0_i32, %c0_i32_0 : i32, i32, i32
  }
}

</mosaic_0001>

<bundles_post_ra>
// kernel: down2_forward.1
= control target key start
LH: loop header
LB: loop body
LE: loop exit
PB: predicated region body
PF: predicated region fallthrough
CT: control target
= control target key end

     0   :  { %s6244_s13 = smov 127   ;;  %vm9313_vm0 = vcmask 1039360   ;;  %s6245_s11 = smov 96   ;;  %vm9312_vm1 = vcmask 785408   ;;  %vm9315_vm2 = vcmask 1043456   ;;  %vm9310_vm3 = vmmov 0   ;;  %s9300_s1 = inlined_call_operand.vmem [shape: f32[2,4,1024], index: 1, kind: input, shape index: {}]   ;;  %s9301_s2 = inlined_call_operand.vmem [shape: bf16[256,512], index: 2, kind: input, shape index: {}]   ;;  %s9302_s0 = inlined_call_operand.vmem [shape: f32[2,4,256], index: 0, kind: input, shape index: {}]   ;;  %s9303_s3 = inlined_call_operand.vmem [shape: bf16[1024,512], index: 3, kind: input, shape index: {}]   ;;  %s9304_s7 = inlined_call_operand.vmem [shape: f32[8,1], index: 7, kind: input, shape index: {}]   ;;  %s9305_s5 = inlined_call_operand.vmem [shape: bf16[8,72], index: 5, kind: input, shape index: {}]   ;;  %s9306_s8 = inlined_call_operand.vmem [shape: f32[8,1], index: 8, kind: input, shape index: {}]   ;;  %s9307_s6 = inlined_call_operand.vmem [shape: bf16[8,72], index: 6, kind: input, shape index: {}]   ;;  %s9308_s4 = inlined_call_operand.vmem [shape: bf16[384,256], index: 4, kind: input, shape index: {}]   ;;  %s9309_s9 = inlined_call_operand.vmem [shape: f32[2,8,256], index: 9, kind: output, shape index: {}]  }
   0x1   :  { %v467_v0 = vld [vmem:[%s9300_s1 + $0x8] sm:$0xff]  ;;  %v6315_v1 = vld [vmem:[%s9300_s1] sm:$0xff]  ;;  %v468_v9 = vld [vmem:[%s9300_s1 + $0x10] sm:$0xff]  ;;  %s6246_s25 = smov 124   ;;  %s6247_s26 = smov 126   ;;  %vm2631_vm4 = vcmask 1031168  }
   0x2   :  { %482 = vrot.lane.b32.xlu1 %v467_v0, %s6244_s13  ;;  %478 = vrot.lane.b32.xlu0 %v6315_v1, %s6244_s13  ;;  %v475_v2 = vcombine.high %v467_v0, %v467_v0  ;;  %v474_v3 = vcombine.high %v6315_v1, %v6315_v1  ;;  %v5312_v4 = vld [vmem:[%s9301_s2 + $0x4] ss:$16 sps:$4 sm:$0xff]   ;;  %v5314_v5 = vld [vmem:[%s9301_s2 + $0xc] ss:$16 sps:$4 sm:$0xff]   ;;  %s6248_s27 = smov 86   ;;  %s6249_s28 = smov 88  }
   0x3   :  { %v5316_v6 = vld [vmem:[%s9301_s2] ss:$16 sps:$4 sm:$0xff]   ;;  %v5317_v7 = vld [vmem:[%s9301_s2 + $0x8] ss:$16 sps:$4 sm:$0xff]   ;;  %892 = vmatprep.subr.bf16.mxu0 %v5312_v4  ;;  %v5318_v8 = vld [vmem:[%s9301_s2 + $0x24] ss:$16 sps:$4 sm:$0xff]   ;;  %933 = vmatprep.subr.bf16.mxu1 %v5314_v5 }
   0x4   :  { %893 = vmatpush1.bf16.msra.mxu0 %v5316_v6  ;;  %v5320_v10 = vld [vmem:[%s9301_s2 + $0x2c] ss:$16 sps:$4 sm:$0xff]   ;;  %v5322_v11 = vld [vmem:[%s9301_s2 + $0x20] ss:$16 sps:$4 sm:$0xff]   ;;  %934 = vmatpush1.bf16.msra.mxu1 %v5317_v7  ;;  %v5323_v12 = vld [vmem:[%s9301_s2 + $0x28] ss:$16 sps:$4 sm:$0xff]  }
   0x5   :  { %894 = vmatprep.subr.bf16.mxu0 %v5318_v8  ;;  %935 = vmatprep.subr.bf16.mxu1 %v5320_v10  ;;  %v5325_v13 = vld [vmem:[%s9301_s2 + $0x44] ss:$16 sps:$4 sm:$0xff]   ;;  %v5327_v14 = vld [vmem:[%s9301_s2 + $0x4c] ss:$16 sps:$4 sm:$0xff]   ;;  %v5329_v15 = vld [vmem:[%s9301_s2 + $0x40] ss:$16 sps:$4 sm:$0xff]  }
   0x6   :  { %484 = vrot.lane.b32.xlu1 %v475_v2, %s6244_s13  ;;  %480 = vrot.lane.b32.xlu0 %v474_v3, %s6244_s13  ;;  %v5330_v16 = vld [vmem:[%s9301_s2 + $0x48] ss:$16 sps:$4 sm:$0xff]   ;;  %v5331_v17 = vld [vmem:[%s9301_s2 + $0x64] ss:$16 sps:$4 sm:$0xff]   ;;  %s6250_s29 = smov 48   ;;  %s6251_s30 = smov 84  }
   0x7   :  { %v5333_v18 = vld [vmem:[%s9301_s2 + $0x6c] ss:$16 sps:$4 sm:$0xff]   ;;  %v5335_v19 = vld [vmem:[%s9301_s2 + $0x60] ss:$16 sps:$4 sm:$0xff]   ;;  %v5336_v20 = vld [vmem:[%s9301_s2 + $0x68] ss:$16 sps:$4 sm:$0xff]  }
   0x8   :  { %895 = vmatpush1.bf16.msra.mxu0 %v5322_v11  ;;  %936 = vmatpush1.bf16.msra.mxu1 %v5323_v12  ;;  %v5338_v21 = vld [vmem:[%s9301_s2 + $0x84] ss:$16 sps:$4 sm:$0xff]   ;;  %v5340_v22 = vld [vmem:[%s9301_s2 + $0x8c] ss:$16 sps:$4 sm:$0xff]   ;;  %v5342_v23 = vld [vmem:[%s9301_s2 + $0x80] ss:$16 sps:$4 sm:$0xff]  }
   0x9   :  { %896 = vmatprep.subr.bf16.mxu0 %v5325_v13  ;;  %937 = vmatprep.subr.bf16.mxu1 %v5327_v14  ;;  %v5343_v24 = vld [vmem:[%s9301_s2 + $0x88] ss:$16 sps:$4 sm:$0xff]   ;;  %v5344_v25 = vld [vmem:[%s9301_s2 + $0xa4] ss:$16 sps:$4 sm:$0xff]   ;;  %v5346_v26 = vld [vmem:[%s9301_s2 + $0xac] ss:$16 sps:$4 sm:$0xff]  }
   0xa   :  { %486 = vrot.lane.b32.xlu0 %v468_v9, %s6244_s13  ;;  %v5348_v27 = vld [vmem:[%s9301_s2 + $0xa0] ss:$16 sps:$4 sm:$0xff]   ;;  %v5349_v28 = vld [vmem:[%s9301_s2 + $0xa8] ss:$16 sps:$4 sm:$0xff]   ;;  %v5350_v29 = vld [vmem:[%s9301_s2 + $0xc4] ss:$16 sps:$4 sm:$0xff]  }
   0xb   :  { %v5352_v30 = vld [vmem:[%s9301_s2 + $0xcc] ss:$16 sps:$4 sm:$0xff]   ;;  %v5354_v31 = vld [vmem:[%s9301_s2 + $0xc0] ss:$16 sps:$4 sm:$0xff]   ;;  %v5355_v32 = vld [vmem:[%s9301_s2 + $0xc8] ss:$16 sps:$4 sm:$0xff]  }
   0xc   :  { %897 = vmatpush1.bf16.msra.mxu0 %v5329_v15  ;;  %938 = vmatpush1.bf16.msra.mxu1 %v5330_v16  ;;  %v5356_v33 = vld [vmem:[%s9301_s2 + $0xe4] ss:$16 sps:$4 sm:$0xff]   ;;  %v5358_v34 = vld [vmem:[%s9301_s2 + $0xec] ss:$16 sps:$4 sm:$0xff]   ;;  %v5360_v35 = vld [vmem:[%s9301_s2 + $0xe0] ss:$16 sps:$4 sm:$0xff]  }
   0xd   :  { %898 = vmatprep.subr.bf16.mxu0 %v5331_v17  ;;  %939 = vmatprep.subr.bf16.mxu1 %v5333_v18  ;;  %v5361_v36 = vld [vmem:[%s9301_s2 + $0xe8] ss:$16 sps:$4 sm:$0xff]   ;;  %v5362_v37 = vld [vmem:[%s9301_s2 + $0x104] ss:$16 sps:$4 sm:$0xff]   ;;  %v5364_v38 = vld [vmem:[%s9301_s2 + $0x10c] ss:$16 sps:$4 sm:$0xff]  }
   0xe   :  { %v5366_v39 = vld [vmem:[%s9301_s2 + $0x100] ss:$16 sps:$4 sm:$0xff]   ;;  %v5367_v40 = vld [vmem:[%s9301_s2 + $0x108] ss:$16 sps:$4 sm:$0xff]   ;;  %v5368_v41 = vld [vmem:[%s9301_s2 + $0x124] ss:$16 sps:$4 sm:$0xff]  }
   0xf   :  { %v5370_v42 = vld [vmem:[%s9301_s2 + $0x12c] ss:$16 sps:$4 sm:$0xff]   ;;  %v5372_v43 = vld [vmem:[%s9301_s2 + $0x120] ss:$16 sps:$4 sm:$0xff]   ;;  %v5373_v44 = vld [vmem:[%s9301_s2 + $0x128] ss:$16 sps:$4 sm:$0xff]  }
  0x10   :  { %899 = vmatpush1.bf16.msra.mxu0 %v5335_v19  ;;  %940 = vmatpush1.bf16.msra.mxu1 %v5336_v20  ;;  %v5374_v45 = vld [vmem:[%s9301_s2 + $0x144] ss:$16 sps:$4 sm:$0xff]   ;;  %v5376_v46 = vld [vmem:[%s9301_s2 + $0x14c] ss:$16 sps:$4 sm:$0xff]   ;;  %v5378_v47 = vld [vmem:[%s9301_s2 + $0x140] ss:$16 sps:$4 sm:$0xff]  }
  0x11   :  { %900 = vmatprep.subr.bf16.mxu0 %v5338_v21  ;;  %941 = vmatprep.subr.bf16.mxu1 %v5340_v22  ;;  %v5379_v48 = vld [vmem:[%s9301_s2 + $0x148] ss:$16 sps:$4 sm:$0xff]   ;;  %v5380_v49 = vld [vmem:[%s9301_s2 + $0x164] ss:$16 sps:$4 sm:$0xff]   ;;  %v5382_v50 = vld [vmem:[%s9301_s2 + $0x16c] ss:$16 sps:$4 sm:$0xff]  }
  0x12   :  { %v566_v51 = vld [vmem:[%s9302_s0] sm:$0xff]  ;;  %v5385_v54 = vld [vmem:[%s9301_s2 + $0x168] ss:$16 sps:$4 sm:$0xff]   ;;  %v5388_v57 = vld [vmem:[%s9301_s2 + $0x18c] ss:$16 sps:$4 sm:$0xff]   ;;  %s6252_s10 = smov 46  }
  0x13   :  { %v568_v52 = vcombine.high %v566_v51, %v566_v51  ;;  %v5384_v53 = vld [vmem:[%s9301_s2 + $0x160] ss:$16 sps:$4 sm:$0xff]   ;;  %v5386_v55 = vld [vmem:[%s9301_s2 + $0x184] ss:$16 sps:$4 sm:$0xff]   ;;  %v5391_v59 = vld [vmem:[%s9301_s2 + $0x188] ss:$16 sps:$4 sm:$0xff]   ;;  %v570_v11 = vpack.c.bf16 %v566_v51, %v566_v51 }
  0x14   :  { %901 = vmatpush1.bf16.msra.mxu0 %v5342_v23  ;;  %942 = vmatpush1.bf16.msra.mxu1 %v5343_v24  ;;  %v5390_v58 = vld [vmem:[%s9301_s2 + $0x180] ss:$16 sps:$4 sm:$0xff]   ;;  %v5392_v60 = vld [vmem:[%s9301_s2 + $0x1a4] ss:$16 sps:$4 sm:$0xff]   ;;  %v5394_v61 = vld [vmem:[%s9301_s2 + $0x1ac] ss:$16 sps:$4 sm:$0xff]  }
  0x15   :  { %902 = vmatprep.subr.bf16.mxu0 %v5344_v25  ;;  %943 = vmatprep.subr.bf16.mxu1 %v5346_v26  ;;  %v571_v56 = vpack.c.bf16 %v568_v52, %v568_v52  ;;  %v5396_v62 = vld [vmem:[%s9301_s2 + $0x1a0] ss:$16 sps:$4 sm:$0xff]   ;;  %v5397_v63 = vld [vmem:[%s9301_s2 + $0x1a8] ss:$16 sps:$4 sm:$0xff]   ;;  %v5398_v0 = vld [vmem:[%s9301_s2 + $0x1c4] ss:$16 sps:$4 sm:$0xff]  }
  0x16   :  { %v5400_v2 = vld [vmem:[%s9301_s2 + $0x1cc] ss:$16 sps:$4 sm:$0xff]   ;;  %v5402_v3 = vld [vmem:[%s9301_s2 + $0x1c0] ss:$16 sps:$4 sm:$0xff]   ;;  %v5403_v4 = vld [vmem:[%s9301_s2 + $0x1c8] ss:$16 sps:$4 sm:$0xff]  }
  0x17   :  { %924 = vmatprep.mubr.bf16.mxu0 %v571_v56  ;;  %965 = vmatprep.mubr.bf16.mxu1 %v571_v56  ;;  %v5404_v5 = vld [vmem:[%s9301_s2 + $0x1e4] ss:$16 sps:$4 sm:$0xff]   ;;  %v5406_v6 = vld [vmem:[%s9301_s2 + $0x1ec] ss:$16 sps:$4 sm:$0xff]   ;;  %v5408_v7 = vld [vmem:[%s9301_s2 + $0x1e0] ss:$16 sps:$4 sm:$0xff]  }
  0x18   :  { %903 = vmatpush1.bf16.msra.mxu0 %v5348_v27  ;;  %944 = vmatpush1.bf16.msra.mxu1 %v5349_v28  ;;  %v5409_v8 = vld [vmem:[%s9301_s2 + $0x1e8] ss:$16 sps:$4 sm:$0xff]   ;;  %v5413_v9 = vld [vmem:[%s9303_s3 + $0x4] ss:$16 sps:$4 sm:$0xff]   ;;  %v5416_v10 = vld [vmem:[%s9303_s3 + $0xc] ss:$16 sps:$4 sm:$0xff]  }
  0x19   :  { %904 = vmatprep.subr.bf16.mxu0 %v5350_v29  ;;  %945 = vmatprep.subr.bf16.mxu1 %v5352_v30  ;;  %v5411_v12 = vld [vmem:[%s9303_s3] ss:$16 sps:$4 sm:$0xff]   ;;  %v5414_v13 = vld [vmem:[%s9303_s3 + $0x8] ss:$16 sps:$4 sm:$0xff]   ;;  %v5419_v14 = vld [vmem:[%s9303_s3 + $0x24] ss:$16 sps:$4 sm:$0xff]  }
  0x1a   :  { %v5422_v15 = vld [vmem:[%s9303_s3 + $0x2c] ss:$16 sps:$4 sm:$0xff]   ;;  %v5417_v16 = vld [vmem:[%s9303_s3 + $0x20] ss:$16 sps:$4 sm:$0xff]   ;;  %v5420_v17 = vld [vmem:[%s9303_s3 + $0x28] ss:$16 sps:$4 sm:$0xff]  }
  0x1b   :  { %v5425_v18 = vld [vmem:[%s9303_s3 + $0x44] ss:$16 sps:$4 sm:$0xff]   ;;  %v5428_v19 = vld [vmem:[%s9303_s3 + $0x4c] ss:$16 sps:$4 sm:$0xff]   ;;  %v5423_v20 = vld [vmem:[%s9303_s3 + $0x40] ss:$16 sps:$4 sm:$0xff]  }
  0x1c   :  { %905 = vmatpush1.bf16.msra.mxu0 %v5354_v31  ;;  %946 = vmatpush1.bf16.msra.mxu1 %v5355_v32  ;;  %v5426_v21 = vld [vmem:[%s9303_s3 + $0x48] ss:$16 sps:$4 sm:$0xff]   ;;  %v5431_v22 = vld [vmem:[%s9303_s3 + $0x64] ss:$16 sps:$4 sm:$0xff]   ;;  %v5434_v23 = vld [vmem:[%s9303_s3 + $0x6c] ss:$16 sps:$4 sm:$0xff]  }
  0x1d   :  { %906 = vmatprep.subr.bf16.mxu0 %v5356_v33  ;;  %947 = vmatprep.subr.bf16.mxu1 %v5358_v34  ;;  %v5429_v24 = vld [vmem:[%s9303_s3 + $0x60] ss:$16 sps:$4 sm:$0xff]   ;;  %v5432_v25 = vld [vmem:[%s9303_s3 + $0x68] ss:$16 sps:$4 sm:$0xff]   ;;  %v5437_v26 = vld [vmem:[%s9303_s3 + $0x84] ss:$16 sps:$4 sm:$0xff]  }
  0x1e   :  { %v5440_v27 = vld [vmem:[%s9303_s3 + $0x8c] ss:$16 sps:$4 sm:$0xff]   ;;  %v5435_v28 = vld [vmem:[%s9303_s3 + $0x80] ss:$16 sps:$4 sm:$0xff]   ;;  %v5438_v29 = vld [vmem:[%s9303_s3 + $0x88] ss:$16 sps:$4 sm:$0xff]  }
  0x1f   :  { %v5443_v30 = vld [vmem:[%s9303_s3 + $0xa4] ss:$16 sps:$4 sm:$0xff]   ;;  %v5446_v31 = vld [vmem:[%s9303_s3 + $0xac] ss:$16 sps:$4 sm:$0xff]   ;;  %v5441_v32 = vld [vmem:[%s9303_s3 + $0xa0] ss:$16 sps:$4 sm:$0xff]  }
  0x20   :  { %907 = vmatpush1.bf16.msra.mxu0 %v5360_v35  ;;  %948 = vmatpush1.bf16.msra.mxu1 %v5361_v36  ;;  %v5444_v33 = vld [vmem:[%s9303_s3 + $0xa8] ss:$16 sps:$4 sm:$0xff]   ;;  %v5449_v34 = vld [vmem:[%s9303_s3 + $0xc4] ss:$16 sps:$4 sm:$0xff]   ;;  %v5452_v35 = vld [vmem:[%s9303_s3 + $0xcc] ss:$16 sps:$4 sm:$0xff]  }
  0x21   :  { %908 = vmatprep.subr.bf16.mxu0 %v5362_v37  ;;  %949 = vmatprep.subr.bf16.mxu1 %v5364_v38  ;;  %v5447_v36 = vld [vmem:[%s9303_s3 + $0xc0] ss:$16 sps:$4 sm:$0xff]   ;;  %v5450_v37 = vld [vmem:[%s9303_s3 + $0xc8] ss:$16 sps:$4 sm:$0xff]   ;;  %v5455_v38 = vld [vmem:[%s9303_s3 + $0xe4] ss:$16 sps:$4 sm:$0xff]  }
  0x22   :  { %v5476_v51 = vld [vmem:[%s9303_s3 + $0x14c] ss:$16 sps:$4 sm:$0xff]   ;;  %v5471_v52 = vld [vmem:[%s9303_s3 + $0x140] ss:$16 sps:$4 sm:$0xff]   ;;  %s6255_s12 = smov 44   ;;  %vm2661_vm5 = vcmask 719872  }
  0x23   :  { %v5477_v56 = vld [vmem:[%s9303_s3 + $0x160] ss:$16 sps:$4 sm:$0xff]   ;;  %vm2646_vm6 = vcmask 1014784   ;;  %vm2691_vm7 = vcmask 687104   ;;  %vm2676_vm8 = vcmask 703488   ;;  %vm2721_vm9 = vcmask 375808  }
  0x24   :  { %909 = vmatpush1.bf16.msra.mxu0 %v5366_v39  ;;  %950 = vmatpush1.bf16.msra.mxu1 %v5367_v40  ;;  %v5458_v39 = vld [vmem:[%s9303_s3 + $0xec] ss:$16 sps:$4 sm:$0xff]   ;;  %v5453_v40 = vld [vmem:[%s9303_s3 + $0xe0] ss:$16 sps:$4 sm:$0xff]   ;;  %vm2706_vm10 = vcmask 392192   ;;  %vm2736_vm11 = vcmask 359424  }
  0x25   :  { %910 = vmatprep.subr.bf16.mxu0 %v5368_v41  ;;  %951 = vmatprep.subr.bf16.mxu1 %v5370_v42  ;;  %v5456_v41 = vld [vmem:[%s9303_s3 + $0xe8] ss:$16 sps:$4 sm:$0xff]   ;;  %v5461_v42 = vld [vmem:[%s9303_s3 + $0x104] ss:$16 sps:$4 sm:$0xff]   ;;  %vm9314_vm12 = vcmask 588800   ;;  %s6257_s17 = smov 42  }
  0x28   :  { %911 = vmatpush1.bf16.msra.mxu0 %v5372_v43  ;;  %952 = vmatpush1.bf16.msra.mxu1 %v5373_v44  ;;  %v5464_v43 = vld [vmem:[%s9303_s3 + $0x10c] ss:$16 sps:$4 sm:$0xff]   ;;  %v5459_v44 = vld [vmem:[%s9303_s3 + $0x100] ss:$16 sps:$4 sm:$0xff]  }
  0x29   :  { %912 = vmatprep.subr.bf16.mxu0 %v5374_v45  ;;  %953 = vmatprep.subr.bf16.mxu1 %v5376_v46  ;;  %v5462_v45 = vld [vmem:[%s9303_s3 + $0x108] ss:$16 sps:$4 sm:$0xff]   ;;  %v5467_v46 = vld [vmem:[%s9303_s3 + $0x124] ss:$16 sps:$4 sm:$0xff]  }
  0x2c   :  { %913 = vmatpush1.bf16.msra.mxu0 %v5378_v47  ;;  %954 = vmatpush1.bf16.msra.mxu1 %v5379_v48  ;;  %v5470_v47 = vld [vmem:[%s9303_s3 + $0x12c] ss:$16 sps:$4 sm:$0xff]   ;;  %v5465_v48 = vld [vmem:[%s9303_s3 + $0x120] ss:$16 sps:$4 sm:$0xff]  }
  0x2d   :  { %914 = vmatprep.subr.bf16.mxu0 %v5380_v49  ;;  %955 = vmatprep.subr.bf16.mxu1 %v5382_v50  ;;  %v5468_v49 = vld [vmem:[%s9303_s3 + $0x128] ss:$16 sps:$4 sm:$0xff]   ;;  %v5473_v50 = vld [vmem:[%s9303_s3 + $0x144] ss:$16 sps:$4 sm:$0xff]  }
  0x30   :  { %915 = vmatpush1.bf16.msra.mxu0 %v5384_v53  ;;  %956 = vmatpush1.bf16.msra.mxu1 %v5385_v54  ;;  %v5474_v53 = vld [vmem:[%s9303_s3 + $0x148] ss:$16 sps:$4 sm:$0xff]   ;;  %v5479_v54 = vld [vmem:[%s9303_s3 + $0x164] ss:$16 sps:$4 sm:$0xff]  }
  0x31   :  { %916 = vmatprep.subr.bf16.mxu0 %v5386_v55  ;;  %957 = vmatprep.subr.bf16.mxu1 %v5388_v57  ;;  %v5482_v55 = vld [vmem:[%s9303_s3 + $0x16c] ss:$16 sps:$4 sm:$0xff]   ;;  %v5480_v57 = vld [vmem:[%s9303_s3 + $0x168] ss:$16 sps:$4 sm:$0xff]  }
  0x34   :  { %917 = vmatpush1.bf16.msra.mxu0 %v5390_v58  ;;  %958 = vmatpush1.bf16.msra.mxu1 %v5391_v59  ;;  %v5485_v58 = vld [vmem:[%s9303_s3 + $0x184] ss:$16 sps:$4 sm:$0xff]   ;;  %v5483_v59 = vld [vmem:[%s9303_s3 + $0x180] ss:$16 sps:$4 sm:$0xff]  }
  0x35   :  { %918 = vmatprep.subr.bf16.mxu0 %v5392_v60  ;;  %959 = vmatprep.subr.bf16.mxu1 %v5394_v61  ;;  %v5488_v60 = vld [vmem:[%s9303_s3 + $0x18c] ss:$16 sps:$4 sm:$0xff]   ;;  %v5486_v61 = vld [vmem:[%s9303_s3 + $0x188] ss:$16 sps:$4 sm:$0xff]  }
  0x38   :  { %919 = vmatpush1.bf16.msra.mxu0 %v5396_v62  ;;  %960 = vmatpush1.bf16.msra.mxu1 %v5397_v63  ;;  %v5491_v62 = vld [vmem:[%s9303_s3 + $0x1a4] ss:$16 sps:$4 sm:$0xff]  }
  0x39   :  { %920 = vmatprep.subr.bf16.mxu0 %v5398_v0  ;;  %961 = vmatprep.subr.bf16.mxu1 %v5400_v2  ;;  %v5489_v2 = vld [vmem:[%s9303_s3 + $0x1a0] ss:$16 sps:$4 sm:$0xff]  }
  0x3c   :  { %921 = vmatpush1.bf16.msra.mxu0 %v5402_v3  ;;  %962 = vmatpush1.bf16.msra.mxu1 %v5403_v4  ;;  %v5494_v3 = vld [vmem:[%s9303_s3 + $0x1ac] ss:$16 sps:$4 sm:$0xff]   ;;  %v5492_v4 = vld [vmem:[%s9303_s3 + $0x1a8] ss:$16 sps:$4 sm:$0xff]  }
  0x3d   :  { %922 = vmatprep.subr.bf16.mxu0 %v5404_v5  ;;  %963 = vmatprep.subr.bf16.mxu1 %v5406_v6  ;;  %v5497_v5 = vld [vmem:[%s9303_s3 + $0x1c4] ss:$16 sps:$4 sm:$0xff]  }
  0x40   :  { %923 = vmatpush1.bf16.msra.mxu0 %v5408_v7  ;;  %964 = vmatpush1.bf16.msra.mxu1 %v5409_v8 }
  0x41   :  { %2274 = vmatprep.subr.bf16.mxu0 %v5413_v9  ;;  %2438 = vmatprep.subr.bf16.mxu1 %v5416_v10  ;;  %v5500_v9 = vld [vmem:[%s9303_s3 + $0x1cc] ss:$16 sps:$4 sm:$0xff]  }
  0x43   :  { %925 = vmatmul.mubr.bf16.vlgmr.msra.gmra.mrb[0].mxu0 %v570_v11  ;;  %966 = vmatmul.mubr.bf16.vlgmr.msra.gmra.mrb[0].mxu1 %v570_v11 }
  0x44   :  { %2275 = vmatpush1.bf16.msra.mxu0 %v5411_v12  ;;  %2439 = vmatpush1.bf16.msra.mxu1 %v5414_v13  ;;  %v5495_v12 = vld [vmem:[%s9303_s3 + $0x1c0] ss:$16 sps:$4 sm:$0xff]   ;;  %v5498_v13 = vld [vmem:[%s9303_s3 + $0x1c8] ss:$16 sps:$4 sm:$0xff]  }
  0x45   :  { %2276 = vmatprep.subr.bf16.mxu0 %v5419_v14  ;;  %2440 = vmatprep.subr.bf16.mxu1 %v5422_v15  ;;  %v5503_v14 = vld [vmem:[%s9303_s3 + $0x1e4] ss:$16 sps:$4 sm:$0xff]   ;;  %v5506_v15 = vld [vmem:[%s9303_s3 + $0x1ec] ss:$16 sps:$4 sm:$0xff]  }
  0x48   :  { %2277 = vmatpush1.bf16.msra.mxu0 %v5417_v16  ;;  %2441 = vmatpush1.bf16.msra.mxu1 %v5420_v17 }
  0x49   :  { %2278 = vmatprep.subr.bf16.mxu0 %v5425_v18  ;;  %2442 = vmatprep.subr.bf16.mxu1 %v5428_v19 }
  0x4c   :  { %2279 = vmatpush1.bf16.msra.mxu0 %v5423_v20  ;;  %2443 = vmatpush1.bf16.msra.mxu1 %v5426_v21  ;;  %v5501_v20 = vld [vmem:[%s9303_s3 + $0x1e0] ss:$16 sps:$4 sm:$0xff]  }
  0x4d   :  { %2280 = vmatprep.subr.bf16.mxu0 %v5431_v22  ;;  %2444 = vmatprep.subr.bf16.mxu1 %v5434_v23  ;;  %v5872_v23 = vld [vmem:[%s9300_s1 + $0x8] sm:$0xff] }
  0x50   :  { %2281 = vmatpush1.bf16.msra.mxu0 %v5429_v24  ;;  %2445 = vmatpush1.bf16.msra.mxu1 %v5432_v25  ;;  %v5873_v25 = vld [vmem:[%s9300_s1 + $0x10] sm:$0xff] }
  0x51   :  { %2282 = vmatprep.subr.bf16.mxu0 %v5437_v26  ;;  %2446 = vmatprep.subr.bf16.mxu1 %v5440_v27  ;;  %v476_v26 = vcombine.high %v5873_v25, %v5873_v25  ;;  %v469_v27 = vld [vmem:[%s9300_s1 + $0x18] sm:$0xff] }
  0x54   :  { %2283 = vmatpush1.bf16.msra.mxu0 %v5435_v28  ;;  %2447 = vmatpush1.bf16.msra.mxu1 %v5438_v29  ;;  %v5509_v29 = vld [vmem:[%s9303_s3 + $0x204] ss:$16 sps:$4 sm:$0xff]  }
  0x55   :  { %2284 = vmatprep.subr.bf16.mxu0 %v5443_v30  ;;  %2448 = vmatprep.subr.bf16.mxu1 %v5446_v31  ;;  %v5512_v30 = vld [vmem:[%s9303_s3 + $0x20c] ss:$16 sps:$4 sm:$0xff]   ;;  %v477_v31 = vcombine.high %v469_v27, %v469_v27 }
  0x58   :  { %2285 = vmatpush1.bf16.msra.mxu0 %v5441_v32  ;;  %2449 = vmatpush1.bf16.msra.mxu1 %v5444_v33 }
  0x59   :  { %2286 = vmatprep.subr.bf16.mxu0 %v5449_v34  ;;  %2450 = vmatprep.subr.bf16.mxu1 %v5452_v35 }
  0x5c   :  { %2287 = vmatpush1.bf16.msra.mxu0 %v5447_v36  ;;  %2451 = vmatpush1.bf16.msra.mxu1 %v5450_v37 }
  0x5d   :  { %2288 = vmatprep.subr.bf16.mxu0 %v5455_v38  ;;  %2452 = vmatprep.subr.bf16.mxu1 %v5458_v39 }
  0x60   :  { %2289 = vmatpush1.bf16.msra.mxu0 %v5453_v40  ;;  %2453 = vmatpush1.bf16.msra.mxu1 %v5456_v41 }
  0x61   :  { %2290 = vmatprep.subr.bf16.mxu0 %v5461_v42  ;;  %2454 = vmatprep.subr.bf16.mxu1 %v5464_v43 }
  0x64   :  { %2291 = vmatpush1.bf16.msra.mxu0 %v5459_v44  ;;  %2455 = vmatpush1.bf16.msra.mxu1 %v5462_v45 }
  0x65   :  { %2292 = vmatprep.subr.bf16.mxu0 %v5467_v46  ;;  %2456 = vmatprep.subr.bf16.mxu1 %v5470_v47 }
  0x68   :  { %2293 = vmatpush1.bf16.msra.mxu0 %v5465_v48  ;;  %2457 = vmatpush1.bf16.msra.mxu1 %v5468_v49  ;;  %v5507_v48 = vld [vmem:[%s9303_s3 + $0x200] ss:$16 sps:$4 sm:$0xff]  }
  0x69   :  { %2294 = vmatprep.subr.bf16.mxu0 %v5473_v50  ;;  %2458 = vmatprep.subr.bf16.mxu1 %v5476_v51  ;;  %v5510_v50 = vld [vmem:[%s9303_s3 + $0x208] ss:$16 sps:$4 sm:$0xff]   ;;  %v5515_v51 = vld [vmem:[%s9303_s3 + $0x224] ss:$16 sps:$4 sm:$0xff]  }
  0x6c   :  { %2295 = vmatpush1.bf16.msra.mxu0 %v5471_v52  ;;  %2459 = vmatpush1.bf16.msra.mxu1 %v5474_v53  ;;  %v5518_v53 = vld [vmem:[%s9303_s3 + $0x22c] ss:$16 sps:$4 sm:$0xff]  }
  0x6d   :  { %2296 = vmatprep.subr.bf16.mxu0 %v5479_v54  ;;  %2460 = vmatprep.subr.bf16.mxu1 %v5482_v55 }
  0x70   :  { %2297 = vmatpush1.bf16.msra.mxu0 %v5477_v56  ;;  %2461 = vmatpush1.bf16.msra.mxu1 %v5480_v57 }
  0x71   :  { %2298 = vmatprep.subr.bf16.mxu0 %v5485_v58  ;;  %2462 = vmatprep.subr.bf16.mxu1 %v5488_v60  ;;  %v5513_v58 = vld [vmem:[%s9303_s3 + $0x220] ss:$16 sps:$4 sm:$0xff]   ;;  %v5521_v60 = vld [vmem:[%s9303_s3 + $0x244] ss:$16 sps:$4 sm:$0xff]  }
  0x74   :  { %v483_v63 = vpop.permute.xlu1 %482  ;;  %v6682_v0 = vpop.permute.xlu0 %478  ;;  %2299 = vmatpush1.bf16.msra.mxu0 %v5483_v59  ;;  %2463 = vmatpush1.bf16.msra.mxu1 %v5486_v61  ;;  %v5516_v59 = vld [vmem:[%s9303_s3 + $0x228] ss:$16 sps:$4 sm:$0xff]  }
  0x75   :  { %2300 = vmatprep.subr.bf16.mxu0 %v5491_v62  ;;  %2464 = vmatprep.subr.bf16.mxu1 %v5494_v3  ;;  %v5524_v62 = vld [vmem:[%s9303_s3 + $0x24c] ss:$16 sps:$4 sm:$0xff]   ;;  %v5527_v3 = vld [vmem:[%s9303_s3 + $0x264] ss:$16 sps:$4 sm:$0xff]  }
  0x78   :  { %v481_v6 = vpop.permute.xlu0 %480  ;;  %v485_v10 = vpop.permute.xlu1 %484  ;;  %2301 = vmatpush1.bf16.msra.mxu0 %v5489_v2  ;;  %2465 = vmatpush1.bf16.msra.mxu1 %v5492_v4  ;;  %v5522_v2 = vld [vmem:[%s9303_s3 + $0x248] ss:$16 sps:$4 sm:$0xff]   ;;  %v5530_v4 = vld [vmem:[%s9303_s3 + $0x26c] ss:$16 sps:$4 sm:$0xff]  }
  0x79   :  { %v495_v7 = vsel %vm9313_vm0, %v6682_v0, %v481_v6  ;;  %v496_v8 = vsel %vm9313_vm0, %v481_v6, %v483_v63  ;;  %2302 = vmatprep.subr.bf16.mxu0 %v5497_v5  ;;  %v497_v18 = vsel %vm9313_vm0, %v483_v63, %v485_v10  ;;  %2466 = vmatprep.subr.bf16.mxu1 %v5500_v9  ;;  %v5525_v5 = vld [vmem:[%s9303_s3 + $0x260] ss:$16 sps:$4 sm:$0xff]   ;;  %v5528_v6 = vld [vmem:[%s9303_s3 + $0x268] ss:$16 sps:$4 sm:$0xff]  }
  0x7a   :  { %v506_v11 = vcombine.low %v495_v7, %v496_v8  ;;  %v5533_v7 = vld [vmem:[%s9303_s3 + $0x284] ss:$16 sps:$4 sm:$0xff]   ;;  %v5536_v8 = vld [vmem:[%s9303_s3 + $0x28c] ss:$16 sps:$4 sm:$0xff]   ;;  %v5531_v9 = vld [vmem:[%s9303_s3 + $0x280] ss:$16 sps:$4 sm:$0xff]  }
  0x7c   :  { %v487_v16 = vpop.permute.xlu0 %486  ;;  %v514_v17 = vmax.f32 %v6315_v1, %v506_v11  ;;  %v5504_v1 = vld [vmem:[%s9303_s3 + $0x1e8] ss:$16 sps:$4 sm:$0xff]   ;;  %2303 = vmatpush1.bf16.msra.mxu0 %v5495_v12  ;;  %2467 = vmatpush1.bf16.msra.mxu1 %v5498_v13  ;;  %v5539_v11 = vld [vmem:[%s9303_s3 + $0x2a4] ss:$16 sps:$4 sm:$0xff]   ;;  %v5542_v12 = vld [vmem:[%s9303_s3 + $0x2ac] ss:$16 sps:$4 sm:$0xff]  }
  0x7d   :  { %v498_v19 = vsel %vm9313_vm0, %v485_v10, %v487_v16  ;;  %2304 = vmatprep.subr.bf16.mxu0 %v5503_v14  ;;  %2468 = vmatprep.subr.bf16.mxu1 %v5506_v15  ;;  %v5534_v10 = vld [vmem:[%s9303_s3 + $0x288] ss:$16 sps:$4 sm:$0xff]   ;;  %v5537_v13 = vld [vmem:[%s9303_s3 + $0x2a0] ss:$16 sps:$4 sm:$0xff]   ;;  %v5545_v15 = vld [vmem:[%s9303_s3 + $0x2c4] ss:$16 sps:$4 sm:$0xff]  }
  0x7e   :  { %v507_v21 = vcombine.low %v497_v18, %v498_v19  ;;  %526 = vrot.lane.b32.xlu1 %v514_v17, %s6245_s11  ;;  %v522_v22 = vcombine.high %v514_v17, %v514_v17  ;;  %v5540_v14 = vld [vmem:[%s9303_s3 + $0x2a8] ss:$16 sps:$4 sm:$0xff]   ;;  %v5551_v19 = vld [vmem:[%s9303_s3 + $0x2e4] ss:$16 sps:$4 sm:$0xff]  }
  0x7f   :  { %v5546_v18 = vld [vmem:[%s9303_s3 + $0x2c8] ss:$16 sps:$4 sm:$0xff]  }
  0x80   :  { %528 = vrot.lane.b32.xlu0 %v522_v22, %s6245_s11  ;;  %v6728_v24 = vmax.f32 %v5872_v23, %v507_v21  ;;  %2305 = vmatpush1.bf16.msra.mxu0 %v5501_v20  ;;  %v5554_v20 = vld [vmem:[%s9303_s3 + $0x2ec] ss:$16 sps:$4 sm:$0xff]   ;;  %v5549_v21 = vld [vmem:[%s9303_s3 + $0x2e0] ss:$16 sps:$4 sm:$0xff]   ;;  %v5552_v22 = vld [vmem:[%s9303_s3 + $0x2e8] ss:$16 sps:$4 sm:$0xff]  }
  0x81   :  { %2469 = vmatpush1.bf16.msra.mxu1 %v5504_v1  ;;  %2315 = vmatprep.subr.bf16.mxu0 %v5509_v29  ;;  %v5557_v1 = vld [vmem:[%s9303_s3 + $0x304] ss:$16 sps:$4 sm:$0xff]   ;;  %v5560_v23 = vld [vmem:[%s9303_s3 + $0x30c] ss:$16 sps:$4 sm:$0xff]   ;;  %v5561_v29 = vld [vmem:[%s9303_s3 + $0x320] ss:$16 sps:$4 sm:$0xff]  }
  0x82   :  { %530 = vrot.lane.b32.xlu1 %v6728_v24, %s6245_s11  ;;  %v523_v28 = vcombine.high %v6728_v24, %v6728_v24  ;;  %2479 = vmatprep.subr.bf16.mxu1 %v5512_v30  ;;  %v5564_v30 = vld [vmem:[%s9303_s3 + $0x328] ss:$16 sps:$4 sm:$0xff]  }
  0x84   :  { %488 = vrot.lane.b32.xlu0 %v476_v26, %s6244_s13  ;;  %v5558_v26 = vld [vmem:[%s9303_s3 + $0x308] ss:$16 sps:$4 sm:$0xff]  }
  0x86   :  { %490 = vrot.lane.b32.xlu1 %v469_v27, %s6244_s13 }
  0x88   :  { %532 = vrot.lane.b32.xlu0 %v523_v28, %s6245_s11  ;;  %v5566_v28 = vld [vmem:[%s9303_s3 + $0x32c] ss:$16 sps:$4 sm:$0xff]  }
  0x8c   :  { %492 = vrot.lane.b32.xlu0 %v477_v31, %s6244_s13  ;;  %v5569_v31 = vld [vmem:[%s9303_s3 + $0x344] ss:$16 sps:$4 sm:$0xff]  }
  0xf0   :  { %v6750_v32 = vpop.permute.xlu1 %526 }
  0xf2   :  { %v529_v33 = vpop.permute.xlu0 %528 }
  0xf3   :  { %v543_v35 = vsel %vm9312_vm1, %v6750_v32, %v529_v33 }
  0xf4   :  { %v6752_v34 = vpop.permute.xlu1 %530 }
  0xf5   :  { %v544_v36 = vsel %vm9312_vm1, %v529_v33, %v6752_v34  ;;  %v5572_v33 = vld [vmem:[%s9303_s3 + $0x34c] ss:$16 sps:$4 sm:$0xff]  }
  0xf6   :  { %v554_v37 = vcombine.low %v543_v35, %v544_v36  ;;  %v489_v38 = vpop.permute.xlu0 %488  ;;  %v5567_v35 = vld [vmem:[%s9303_s3 + $0x340] ss:$16 sps:$4 sm:$0xff]   ;;  %v5570_v36 = vld [vmem:[%s9303_s3 + $0x348] ss:$16 sps:$4 sm:$0xff]  }
  0xf7   :  { %v499_v41 = vsel %vm9313_vm0, %v487_v16, %v489_v38  ;;  %v5548_v16 = vld [vmem:[%s9303_s3 + $0x2cc] ss:$16 sps:$4 sm:$0xff]  }
  0xf8   :  { %v491_v39 = vpop.permute.xlu1 %490  ;;  %v562_v40 = vmax.f32 %v514_v17, %v554_v37  ;;  %v5543_v17 = vld [vmem:[%s9303_s3 + $0x2c0] ss:$16 sps:$4 sm:$0xff]   ;;  %v5575_v37 = vld [vmem:[%s9303_s3 + $0x364] ss:$16 sps:$4 sm:$0xff]  }
  0xf9   :  { %v500_v42 = vsel %vm9313_vm0, %v489_v38, %v491_v39  ;;  %v5578_v38 = vld [vmem:[%s9303_s3 + $0x36c] ss:$16 sps:$4 sm:$0xff]  }
  0xfa   :  { %v508_v43 = vcombine.low %v499_v41, %v500_v42  ;;  %v6760_v44 = vpop.permute.xlu0 %532  ;;  %v978_v45 = vcombine.high %v562_v40, %v562_v40  ;;  %v986_v49 = vpack.c.bf16 %v562_v40, %v562_v40  ;;  %v5576_v40 = vld [vmem:[%s9303_s3 + $0x368] ss:$16 sps:$4 sm:$0xff]   ;;  %v5581_v41 = vld [vmem:[%s9303_s3 + $0x384] ss:$16 sps:$4 sm:$0xff]   ;;  %v5584_v42 = vld [vmem:[%s9303_s3 + $0x38c] ss:$16 sps:$4 sm:$0xff]  }
  0xfc   :  { %v6762_v46 = vmax.f32 %v5873_v25, %v508_v43  ;;  %v987_v47 = vpack.c.bf16 %v978_v45, %v978_v45  ;;  %v5555_v25 = vld [vmem:[%s9303_s3 + $0x300] ss:$16 sps:$4 sm:$0xff]   ;;  %v5582_v45 = vld [vmem:[%s9303_s3 + $0x388] ss:$16 sps:$4 sm:$0xff]  }
  0xfd   :  { %v5579_v43 = vld [vmem:[%s9303_s3 + $0x380] ss:$16 sps:$4 sm:$0xff]  }
  0xfe   :  { %534 = vrot.lane.b32.xlu1 %v6762_v46, %s6245_s11  ;;  %v493_v52 = vpop.permute.xlu0 %492  ;;  %2306 = vmatprep.mubr.bf16.mxu0 %v987_v47  ;;  %v524_v57 = vcombine.high %v6762_v46, %v6762_v46 }
  0xff   :  { %v501_v54 = vsel %vm9313_vm0, %v491_v39, %v493_v52  ;;  %v504_v55 = vsel %vm9313_vm0, %v493_v52, %v6682_v0  ;;  %2470 = vmatprep.mubr.bf16.mxu1 %v987_v47  ;;  %2307 = vmatmul.mubr.bf16.vlgmr.msra.gmra.mrb[4].mxu0 %v986_v49  ;;  %v5519_v0 = vld [vmem:[%s9303_s3 + $0x240] ss:$16 sps:$4 sm:$0xff]   ;;  %v5587_v47 = vld [vmem:[%s9303_s3 + $0x3a4] ss:$16 sps:$4 sm:$0xff]   ;;  %v5596_v52 = vld [vmem:[%s9303_s3 + $0x3cc] ss:$16 sps:$4 sm:$0xff]  }
 0x100   :  { %v509_v56 = vcombine.low %v501_v54, %v504_v55  ;;  %2471 = vmatmul.mubr.bf16.vlgmr.msra.gmra.mrb[4].mxu1 %v986_v49  ;;  %2316 = vmatpush1.bf16.msra.mxu0 %v5507_v48  ;;  %v5573_v39 = vld [vmem:[%s9303_s3 + $0x360] ss:$16 sps:$4 sm:$0xff]   ;;  %v5590_v48 = vld [vmem:[%s9303_s3 + $0x3ac] ss:$16 sps:$4 sm:$0xff]   ;;  %v5594_v54 = vld [vmem:[%s9303_s3 + $0x3c8] ss:$16 sps:$4 sm:$0xff]  }
 0x101   :  { %2480 = vmatpush1.bf16.msra.mxu1 %v5510_v50  ;;  %2317 = vmatprep.subr.bf16.mxu0 %v5515_v51  ;;  %v5585_v49 = vld [vmem:[%s9303_s3 + $0x3a0] ss:$16 sps:$4 sm:$0xff]   ;;  %v5588_v50 = vld [vmem:[%s9303_s3 + $0x3a8] ss:$16 sps:$4 sm:$0xff]   ;;  %v5593_v51 = vld [vmem:[%s9303_s3 + $0x3c4] ss:$16 sps:$4 sm:$0xff]  }
 0x102   :  { %536 = vrot.lane.b32.xlu1 %v524_v57, %s6245_s11  ;;  %v6793_v61 = vmax.f32 %v469_v27, %v509_v56  ;;  %2481 = vmatprep.subr.bf16.mxu1 %v5518_v53  ;;  %v5563_v27 = vld [vmem:[%s9303_s3 + $0x324] ss:$16 sps:$4 sm:$0xff]   ;;  %v5591_v53 = vld [vmem:[%s9303_s3 + $0x3c0] ss:$16 sps:$4 sm:$0xff]   ;;  %v5602_v56 = vld [vmem:[%s9303_s3 + $0x3ec] ss:$16 sps:$4 sm:$0xff]  }
 0x103   :  { %v5599_v55 = vld [vmem:[%s9303_s3 + $0x3e4] ss:$16 sps:$4 sm:$0xff]   ;;  %v5597_v57 = vld [vmem:[%s9303_s3 + $0x3e0] ss:$16 sps:$4 sm:$0xff]  }
 0x104   :  { %538 = vrot.lane.b32.xlu0 %v6793_v61, %s6245_s11  ;;  %v525_v63 = vcombine.high %v6793_v61, %v6793_v61  ;;  %2318 = vmatpush1.bf16.msra.mxu0 %v5513_v58  ;;  %v5600_v58 = vld [vmem:[%s9303_s3 + $0x3e8] ss:$16 sps:$4 sm:$0xff]  }
 0x105   :  { %2482 = vmatpush1.bf16.msra.mxu1 %v5516_v59  ;;  %2319 = vmatprep.subr.bf16.mxu0 %v5521_v60  ;;  %v5605_v59 = vld [vmem:[%s9303_s3 + $0x404] ss:$16 sps:$4 sm:$0xff]   ;;  %v5608_v60 = vld [vmem:[%s9303_s3 + $0x40c] ss:$16 sps:$4 sm:$0xff]  }
 0x106   :  { %540 = vrot.lane.b32.xlu1 %v525_v63, %s6245_s11  ;;  %2483 = vmatprep.subr.bf16.mxu1 %v5524_v62 }
 0x108   :  { %2320 = vmatpush1.bf16.msra.mxu0 %v5519_v0 }
 0x109   :  { %2484 = vmatpush1.bf16.msra.mxu1 %v5522_v2  ;;  %2321 = vmatprep.subr.bf16.mxu0 %v5527_v3 }
 0x10a   :  { %2485 = vmatprep.subr.bf16.mxu1 %v5530_v4 }
 0x10c   :  { %2322 = vmatpush1.bf16.msra.mxu0 %v5525_v5 }
 0x10d   :  { %2486 = vmatpush1.bf16.msra.mxu1 %v5528_v6  ;;  %2323 = vmatprep.subr.bf16.mxu0 %v5533_v7 }
 0x10e   :  { %2487 = vmatprep.subr.bf16.mxu1 %v5536_v8  ;;  %v545_v8 = vsel %vm9312_vm1, %v6752_v34, %v6760_v44  ;;  %v5603_v34 = vld [vmem:[%s9303_s3 + $0x400] ss:$16 sps:$4 sm:$0xff]  }
 0x110   :  { %2324 = vmatpush1.bf16.msra.mxu0 %v5531_v9 }
 0x111   :  { %2488 = vmatpush1.bf16.msra.mxu1 %v5534_v10  ;;  %2325 = vmatprep.subr.bf16.mxu0 %v5539_v11 }
 0x112   :  { %2489 = vmatprep.subr.bf16.mxu1 %v5542_v12 }
 0x114   :  { %2326 = vmatpush1.bf16.msra.mxu0 %v5537_v13 }
 0x115   :  { %2490 = vmatpush1.bf16.msra.mxu1 %v5540_v14  ;;  %2327 = vmatprep.subr.bf16.mxu0 %v5545_v15 }
 0x116   :  { %2491 = vmatprep.subr.bf16.mxu1 %v5548_v16  ;;  %v6971_v62 = vpop.f32.mrb[0].mxu0  ;;  %v6975_v3 = vpop.f32.mrb[0].mxu1 }
 0x117   :  { %v6973_v63 = vpop.f32.mrb[1].mxu0  ;;  %v6977_v4 = vpop.f32.mrb[1].mxu1 }
 0x118   :  { %2328 = vmatpush1.bf16.msra.mxu0 %v5543_v17  ;;  %v930_v0 = vpop.f32.mrb[2].mxu0  ;;  %v971_v5 = vpop.f32.mrb[2].mxu1 }
 0x119   :  { %2492 = vmatpush1.bf16.msra.mxu1 %v5546_v18  ;;  %2329 = vmatprep.subr.bf16.mxu0 %v5551_v19  ;;  %v931_v2 = vpop.f32.mrb[3].mxu0  ;;  %v972_v6 = vpop.f32.mrb[3].mxu1  ;;  %v5665_v0 = vld [vmem:[%s9303_s3 + $0x544] ss:$16 sps:$4 sm:$0xff]   ;;  %v5663_v5 = vld [vmem:[%s9303_s3 + $0x540] ss:$16 sps:$4 sm:$0xff]  }
 0x11a   :  { %2493 = vmatprep.subr.bf16.mxu1 %v5554_v20  ;;  %v5614_v20 = vld [vmem:[%s9303_s3 + $0x42c] ss:$16 sps:$4 sm:$0xff]   ;;  %v5666_v6 = vld [vmem:[%s9303_s3 + $0x548] ss:$16 sps:$4 sm:$0xff]  }
 0x11b   :  { %v5668_v2 = vld [vmem:[%s9303_s3 + $0x54c] ss:$16 sps:$4 sm:$0xff]  }
 0x11c   :  { %2330 = vmatpush1.bf16.msra.mxu0 %v5549_v21 }
 0x11d   :  { %2494 = vmatpush1.bf16.msra.mxu1 %v5552_v22  ;;  %2331 = vmatprep.subr.bf16.mxu0 %v5557_v1  ;;  %v5609_v22 = vld [vmem:[%s9303_s3 + $0x420] ss:$16 sps:$4 sm:$0xff]   ;;  %v5612_v1 = vld [vmem:[%s9303_s3 + $0x428] ss:$16 sps:$4 sm:$0xff]  }
 0x11e   :  { %2495 = vmatprep.subr.bf16.mxu1 %v5560_v23 }
 0x120   :  { %2332 = vmatpush1.bf16.msra.mxu0 %v5555_v25 }
 0x121   :  { %2496 = vmatpush1.bf16.msra.mxu1 %v5558_v26  ;;  %2333 = vmatprep.subr.bf16.mxu0 %v5563_v27  ;;  %v5620_v26 = vld [vmem:[%s9303_s3 + $0x44c] ss:$16 sps:$4 sm:$0xff]   ;;  %v5615_v27 = vld [vmem:[%s9303_s3 + $0x440] ss:$16 sps:$4 sm:$0xff]  }
 0x122   :  { %2497 = vmatprep.subr.bf16.mxu1 %v5566_v28  ;;  %v5618_v28 = vld [vmem:[%s9303_s3 + $0x448] ss:$16 sps:$4 sm:$0xff]  }
 0x124   :  { %2334 = vmatpush1.bf16.msra.mxu0 %v5561_v29  ;;  %v5623_v29 = vld [vmem:[%s9303_s3 + $0x464] ss:$16 sps:$4 sm:$0xff]  }
 0x125   :  { %2498 = vmatpush1.bf16.msra.mxu1 %v5564_v30  ;;  %2335 = vmatprep.subr.bf16.mxu0 %v5569_v31  ;;  %v5626_v30 = vld [vmem:[%s9303_s3 + $0x46c] ss:$16 sps:$4 sm:$0xff]   ;;  %v5621_v31 = vld [vmem:[%s9303_s3 + $0x460] ss:$16 sps:$4 sm:$0xff]  }
 0x126   :  { %2499 = vmatprep.subr.bf16.mxu1 %v5572_v33  ;;  %v5624_v33 = vld [vmem:[%s9303_s3 + $0x468] ss:$16 sps:$4 sm:$0xff]  }
 0x128   :  { %2336 = vmatpush1.bf16.msra.mxu0 %v5567_v35  ;;  %v5629_v35 = vld [vmem:[%s9303_s3 + $0x484] ss:$16 sps:$4 sm:$0xff]  }
 0x129   :  { %2500 = vmatpush1.bf16.msra.mxu1 %v5570_v36  ;;  %2337 = vmatprep.subr.bf16.mxu0 %v5575_v37  ;;  %v5632_v36 = vld [vmem:[%s9303_s3 + $0x48c] ss:$16 sps:$4 sm:$0xff]   ;;  %v5627_v37 = vld [vmem:[%s9303_s3 + $0x480] ss:$16 sps:$4 sm:$0xff]  }
 0x12a   :  { %2501 = vmatprep.subr.bf16.mxu1 %v5578_v38  ;;  %v5630_v38 = vld [vmem:[%s9303_s3 + $0x488] ss:$16 sps:$4 sm:$0xff]  }
 0x12c   :  { %2338 = vmatpush1.bf16.msra.mxu0 %v5573_v39  ;;  %v5635_v39 = vld [vmem:[%s9303_s3 + $0x4a4] ss:$16 sps:$4 sm:$0xff]  }
 0x12d   :  { %2502 = vmatpush1.bf16.msra.mxu1 %v5576_v40  ;;  %2339 = vmatprep.subr.bf16.mxu0 %v5581_v41  ;;  %v5638_v40 = vld [vmem:[%s9303_s3 + $0x4ac] ss:$16 sps:$4 sm:$0xff]   ;;  %v5633_v41 = vld [vmem:[%s9303_s3 + $0x4a0] ss:$16 sps:$4 sm:$0xff]  }
 0x12e   :  { %2503 = vmatprep.subr.bf16.mxu1 %v5584_v42  ;;  %v5636_v42 = vld [vmem:[%s9303_s3 + $0x4a8] ss:$16 sps:$4 sm:$0xff]  }
 0x130   :  { %2340 = vmatpush1.bf16.msra.mxu0 %v5579_v43  ;;  %v5641_v43 = vld [vmem:[%s9303_s3 + $0x4c4] ss:$16 sps:$4 sm:$0xff]  }
 0x131   :  { %2504 = vmatpush1.bf16.msra.mxu1 %v5582_v45  ;;  %2341 = vmatprep.subr.bf16.mxu0 %v5587_v47  ;;  %v5644_v45 = vld [vmem:[%s9303_s3 + $0x4cc] ss:$16 sps:$4 sm:$0xff]   ;;  %v5639_v47 = vld [vmem:[%s9303_s3 + $0x4c0] ss:$16 sps:$4 sm:$0xff]  }
 0x132   :  { %2505 = vmatprep.subr.bf16.mxu1 %v5590_v48  ;;  %v5642_v48 = vld [vmem:[%s9303_s3 + $0x4c8] ss:$16 sps:$4 sm:$0xff]  }
 0x134   :  { %2342 = vmatpush1.bf16.msra.mxu0 %v5585_v49  ;;  %v5647_v49 = vld [vmem:[%s9303_s3 + $0x4e4] ss:$16 sps:$4 sm:$0xff]  }
 0x135   :  { %2506 = vmatpush1.bf16.msra.mxu1 %v5588_v50  ;;  %2343 = vmatprep.subr.bf16.mxu0 %v5593_v51  ;;  %v5650_v50 = vld [vmem:[%s9303_s3 + $0x4ec] ss:$16 sps:$4 sm:$0xff]   ;;  %v5645_v51 = vld [vmem:[%s9303_s3 + $0x4e0] ss:$16 sps:$4 sm:$0xff]  }
 0x136   :  { %2507 = vmatprep.subr.bf16.mxu1 %v5596_v52  ;;  %v5648_v52 = vld [vmem:[%s9303_s3 + $0x4e8] ss:$16 sps:$4 sm:$0xff]  }
 0x138   :  { %2344 = vmatpush1.bf16.msra.mxu0 %v5591_v53  ;;  %v5653_v53 = vld [vmem:[%s9303_s3 + $0x504] ss:$16 sps:$4 sm:$0xff]  }
 0x139   :  { %2508 = vmatpush1.bf16.msra.mxu1 %v5594_v54  ;;  %2345 = vmatprep.subr.bf16.mxu0 %v5599_v55  ;;  %v5656_v54 = vld [vmem:[%s9303_s3 + $0x50c] ss:$16 sps:$4 sm:$0xff]   ;;  %v5651_v55 = vld [vmem:[%s9303_s3 + $0x500] ss:$16 sps:$4 sm:$0xff]  }
 0x13a   :  { %2509 = vmatprep.subr.bf16.mxu1 %v5602_v56  ;;  %v5654_v56 = vld [vmem:[%s9303_s3 + $0x508] ss:$16 sps:$4 sm:$0xff]  }
 0x13c   :  { %2346 = vmatpush1.bf16.msra.mxu0 %v5597_v57  ;;  %v5659_v57 = vld [vmem:[%s9303_s3 + $0x524] ss:$16 sps:$4 sm:$0xff]  }
 0x13d   :  { %2510 = vmatpush1.bf16.msra.mxu1 %v5600_v58  ;;  %2356 = vmatprep.subr.bf16.mxu0 %v5605_v59  ;;  %v5662_v58 = vld [vmem:[%s9303_s3 + $0x52c] ss:$16 sps:$4 sm:$0xff]   ;;  %v5657_v59 = vld [vmem:[%s9303_s3 + $0x520] ss:$16 sps:$4 sm:$0xff]  }
 0x13e   :  { %2520 = vmatprep.subr.bf16.mxu1 %v5608_v60  ;;  %v5660_v60 = vld [vmem:[%s9303_s3 + $0x528] ss:$16 sps:$4 sm:$0xff]  }
 0x170   :  { %v535_v7 = vpop.permute.xlu1 %534 }
 0x171   :  { %v546_v9 = vsel %vm9312_vm1, %v6760_v44, %v535_v7  ;;  %v5606_v44 = vld [vmem:[%s9303_s3 + $0x408] ss:$16 sps:$4 sm:$0xff]  }
 0x172   :  { %v555_v10 = vcombine.low %v545_v8, %v546_v9  ;;  %v5674_v8 = vld [vmem:[%s9303_s3 + $0x56c] ss:$16 sps:$4 sm:$0xff]   ;;  %v5669_v9 = vld [vmem:[%s9303_s3 + $0x560] ss:$16 sps:$4 sm:$0xff]  }
 0x174   :  { %v537_v11 = vpop.permute.xlu1 %536  ;;  %v563_v12 = vmax.f32 %v6728_v24, %v555_v10  ;;  %v5611_v24 = vld [vmem:[%s9303_s3 + $0x424] ss:$16 sps:$4 sm:$0xff]   ;;  %v5672_v10 = vld [vmem:[%s9303_s3 + $0x568] ss:$16 sps:$4 sm:$0xff]  }
 0x175   :  { %v547_v15 = vsel %vm9312_vm1, %v535_v7, %v537_v11  ;;  %v5671_v7 = vld [vmem:[%s9303_s3 + $0x564] ss:$16 sps:$4 sm:$0xff]  }
 0x176   :  { %v6985_v13 = vpop.permute.xlu0 %538  ;;  %v979_v14 = vcombine.high %v563_v12, %v563_v12  ;;  %v988_v19 = vpack.c.bf16 %v563_v12, %v563_v12  ;;  %v5680_v12 = vld [vmem:[%s9303_s3 + $0x58c] ss:$16 sps:$4 sm:$0xff]  }
 0x177   :  { %v548_v16 = vsel %vm9312_vm1, %v537_v11, %v6985_v13  ;;  %v5677_v11 = vld [vmem:[%s9303_s3 + $0x584] ss:$16 sps:$4 sm:$0xff]  }
 0x178   :  { %v556_v17 = vcombine.low %v547_v15, %v548_v16  ;;  %v989_v18 = vpack.c.bf16 %v979_v14, %v979_v14  ;;  %v541_v14 = vpop.permute.xlu1 %540  ;;  %v5675_v15 = vld [vmem:[%s9303_s3 + $0x580] ss:$16 sps:$4 sm:$0xff]   ;;  %v5678_v16 = vld [vmem:[%s9303_s3 + $0x588] ss:$16 sps:$4 sm:$0xff]  }
 0x17a   :  { %2347 = vmatprep.mubr.bf16.mxu0 %v989_v18  ;;  %2511 = vmatprep.mubr.bf16.mxu1 %v989_v18  ;;  %v7003_v21 = vmax.f32 %v6762_v46, %v556_v17  ;;  %v5617_v46 = vld [vmem:[%s9303_s3 + $0x444] ss:$16 sps:$4 sm:$0xff]   ;;  %v5686_v18 = vld [vmem:[%s9303_s3 + $0x5ac] ss:$16 sps:$4 sm:$0xff]  }
 0x17b   :  { %2348 = vmatmul.mubr.bf16.vlgmr.msra.gmra.mrb[4].mxu0 %v988_v19  ;;  %2512 = vmatmul.mubr.bf16.vlgmr.msra.gmra.mrb[4].mxu1 %v988_v19  ;;  %v5683_v17 = vld [vmem:[%s9303_s3 + $0x5a4] ss:$16 sps:$4 sm:$0xff]   ;;  %v5681_v19 = vld [vmem:[%s9303_s3 + $0x5a0] ss:$16 sps:$4 sm:$0xff]  }
 0x17c   :  { %2357 = vmatpush1.bf16.msra.mxu0 %v5603_v34  ;;  %2521 = vmatpush1.bf16.msra.mxu1 %v5606_v44  ;;  %v980_v23 = vcombine.high %v7003_v21, %v7003_v21  ;;  %v549_v34 = vsel %vm9312_vm1, %v6985_v13, %v541_v14  ;;  %v552_v44 = vsel %vm9312_vm1, %v541_v14, %v6750_v32  ;;  %v5692_v32 = vld [vmem:[%s9303_s3 + $0x5cc] ss:$16 sps:$4 sm:$0xff]   ;;  %v5753_v14 = vld [vmem:[%s9303_s3 + $0x720] ss:$16 sps:$4 sm:$0xff]  }
 0x17d   :  { %2358 = vmatprep.subr.bf16.mxu0 %v5611_v24  ;;  %2522 = vmatprep.subr.bf16.mxu1 %v5614_v20  ;;  %v5684_v24 = vld [vmem:[%s9303_s3 + $0x5a8] ss:$16 sps:$4 sm:$0xff]   ;;  %v5689_v20 = vld [vmem:[%s9303_s3 + $0x5c4] ss:$16 sps:$4 sm:$0xff]   ;;  %v557_v13 = vcombine.low %v549_v34, %v552_v44 }
 0x17e   :  { %v991_v25 = vpack.c.bf16 %v980_v23, %v980_v23  ;;  %v5695_v23 = vld [vmem:[%s9303_s3 + $0x5e4] ss:$16 sps:$4 sm:$0xff]   ;;  %v5762_v34 = vld [vmem:[%s9303_s3 + $0x748] ss:$16 sps:$4 sm:$0xff]  }
 0x17f   :  { %v5767_v44 = vld [vmem:[%s9303_s3 + $0x764] ss:$16 sps:$4 sm:$0xff]  }
 0x180   :  { %2359 = vmatpush1.bf16.msra.mxu0 %v5609_v22  ;;  %2523 = vmatpush1.bf16.msra.mxu1 %v5612_v1  ;;  %v5687_v22 = vld [vmem:[%s9303_s3 + $0x5c0] ss:$16 sps:$4 sm:$0xff]   ;;  %v5690_v1 = vld [vmem:[%s9303_s3 + $0x5c8] ss:$16 sps:$4 sm:$0xff]  }
 0x181   :  { %2388 = vmatprep.mubr.bf16.mxu0 %v991_v25  ;;  %2552 = vmatprep.mubr.bf16.mxu1 %v991_v25  ;;  %v5698_v25 = vld [vmem:[%s9303_s3 + $0x5ec] ss:$16 sps:$4 sm:$0xff]  }
 0x182   :  { %2360 = vmatprep.subr.bf16.mxu0 %v5617_v46  ;;  %2524 = vmatprep.subr.bf16.mxu1 %v5620_v26  ;;  %v7180_v46 = vmax.f32 %v6793_v61, %v557_v13  ;;  %v5693_v26 = vld [vmem:[%s9303_s3 + $0x5e0] ss:$16 sps:$4 sm:$0xff]   ;;  %v5704_v61 = vld [vmem:[%s9303_s3 + $0x60c] ss:$16 sps:$4 sm:$0xff]  }
 0x183   :  { %v5776_v13 = vld [vmem:[%s9303_s3 + $0x78c] ss:$16 sps:$4 sm:$0xff]  }
 0x184   :  { %2361 = vmatpush1.bf16.msra.mxu0 %v5615_v27  ;;  %2525 = vmatpush1.bf16.msra.mxu1 %v5618_v28  ;;  %v5696_v27 = vld [vmem:[%s9303_s3 + $0x5e8] ss:$16 sps:$4 sm:$0xff]   ;;  %v5701_v28 = vld [vmem:[%s9303_s3 + $0x604] ss:$16 sps:$4 sm:$0xff]  }
 0x185   :  { %2362 = vmatprep.subr.bf16.mxu0 %v5623_v29  ;;  %2526 = vmatprep.subr.bf16.mxu1 %v5626_v30  ;;  %v981_v29 = vcombine.high %v7180_v46, %v7180_v46  ;;  %v5699_v30 = vld [vmem:[%s9303_s3 + $0x600] ss:$16 sps:$4 sm:$0xff]  }
 0x188   :  { %2363 = vmatpush1.bf16.msra.mxu0 %v5621_v31  ;;  %2527 = vmatpush1.bf16.msra.mxu1 %v5624_v33  ;;  %v990_v31 = vpack.c.bf16 %v7003_v21, %v7003_v21  ;;  %v5702_v33 = vld [vmem:[%s9303_s3 + $0x608] ss:$16 sps:$4 sm:$0xff]   ;;  %v5705_v21 = vld [vmem:[%s9303_s3 + $0x620] ss:$16 sps:$4 sm:$0xff]  }
 0x189   :  { %2364 = vmatprep.subr.bf16.mxu0 %v5629_v35  ;;  %2528 = vmatprep.subr.bf16.mxu1 %v5632_v36  ;;  %v993_v35 = vpack.c.bf16 %v981_v29, %v981_v29  ;;  %v5707_v36 = vld [vmem:[%s9303_s3 + $0x624] ss:$16 sps:$4 sm:$0xff]   ;;  %v5783_v29 = vld [vmem:[%s9303_s3 + $0x7c0] ss:$16 sps:$4 sm:$0xff]  }
 0x18c   :  { %2365 = vmatpush1.bf16.msra.mxu0 %v5627_v37  ;;  %2529 = vmatpush1.bf16.msra.mxu1 %v5630_v38  ;;  %v5710_v37 = vld [vmem:[%s9303_s3 + $0x62c] ss:$16 sps:$4 sm:$0xff]   ;;  %v5708_v38 = vld [vmem:[%s9303_s3 + $0x628] ss:$16 sps:$4 sm:$0xff]  }
 0x18d   :  { %2366 = vmatprep.subr.bf16.mxu0 %v5635_v39  ;;  %2530 = vmatprep.subr.bf16.mxu1 %v5638_v40  ;;  %v5713_v39 = vld [vmem:[%s9303_s3 + $0x644] ss:$16 sps:$4 sm:$0xff]   ;;  %v5716_v40 = vld [vmem:[%s9303_s3 + $0x64c] ss:$16 sps:$4 sm:$0xff]  }
 0x190   :  { %2367 = vmatpush1.bf16.msra.mxu0 %v5633_v41  ;;  %2531 = vmatpush1.bf16.msra.mxu1 %v5636_v42  ;;  %v5711_v41 = vld [vmem:[%s9303_s3 + $0x640] ss:$16 sps:$4 sm:$0xff]   ;;  %v5714_v42 = vld [vmem:[%s9303_s3 + $0x648] ss:$16 sps:$4 sm:$0xff]  }
 0x191   :  { %2368 = vmatprep.subr.bf16.mxu0 %v5641_v43  ;;  %2532 = vmatprep.subr.bf16.mxu1 %v5644_v45  ;;  %v5719_v43 = vld [vmem:[%s9303_s3 + $0x664] ss:$16 sps:$4 sm:$0xff]   ;;  %v5722_v45 = vld [vmem:[%s9303_s3 + $0x66c] ss:$16 sps:$4 sm:$0xff]  }
 0x194   :  { %2369 = vmatpush1.bf16.msra.mxu0 %v5639_v47  ;;  %2533 = vmatpush1.bf16.msra.mxu1 %v5642_v48  ;;  %v5717_v47 = vld [vmem:[%s9303_s3 + $0x660] ss:$16 sps:$4 sm:$0xff]   ;;  %v5720_v48 = vld [vmem:[%s9303_s3 + $0x668] ss:$16 sps:$4 sm:$0xff]  }
 0x195   :  { %2370 = vmatprep.subr.bf16.mxu0 %v5647_v49  ;;  %2534 = vmatprep.subr.bf16.mxu1 %v5650_v50  ;;  %v5725_v49 = vld [vmem:[%s9303_s3 + $0x684] ss:$16 sps:$4 sm:$0xff]   ;;  %v5728_v50 = vld [vmem:[%s9303_s3 + $0x68c] ss:$16 sps:$4 sm:$0xff]  }
 0x198   :  { %2371 = vmatpush1.bf16.msra.mxu0 %v5645_v51  ;;  %2535 = vmatpush1.bf16.msra.mxu1 %v5648_v52  ;;  %v5723_v51 = vld [vmem:[%s9303_s3 + $0x680] ss:$16 sps:$4 sm:$0xff]   ;;  %v5726_v52 = vld [vmem:[%s9303_s3 + $0x688] ss:$16 sps:$4 sm:$0xff]  }
 0x199   :  { %2372 = vmatprep.subr.bf16.mxu0 %v5653_v53  ;;  %2536 = vmatprep.subr.bf16.mxu1 %v5656_v54  ;;  %v5731_v53 = vld [vmem:[%s9303_s3 + $0x6a4] ss:$16 sps:$4 sm:$0xff]   ;;  %v5734_v54 = vld [vmem:[%s9303_s3 + $0x6ac] ss:$16 sps:$4 sm:$0xff]  }
 0x19c   :  { %2373 = vmatpush1.bf16.msra.mxu0 %v5651_v55  ;;  %2537 = vmatpush1.bf16.msra.mxu1 %v5654_v56  ;;  %v5729_v55 = vld [vmem:[%s9303_s3 + $0x6a0] ss:$16 sps:$4 sm:$0xff]   ;;  %v5732_v56 = vld [vmem:[%s9303_s3 + $0x6a8] ss:$16 sps:$4 sm:$0xff]  }
 0x19d   :  { %2374 = vmatprep.subr.bf16.mxu0 %v5659_v57  ;;  %2538 = vmatprep.subr.bf16.mxu1 %v5662_v58  ;;  %v5737_v57 = vld [vmem:[%s9303_s3 + $0x6c4] ss:$16 sps:$4 sm:$0xff]   ;;  %v5740_v58 = vld [vmem:[%s9303_s3 + $0x6cc] ss:$16 sps:$4 sm:$0xff]  }
 0x1a0   :  { %2375 = vmatpush1.bf16.msra.mxu0 %v5657_v59  ;;  %2539 = vmatpush1.bf16.msra.mxu1 %v5660_v60  ;;  %v5735_v59 = vld [vmem:[%s9303_s3 + $0x6c0] ss:$16 sps:$4 sm:$0xff]   ;;  %v5738_v60 = vld [vmem:[%s9303_s3 + $0x6c8] ss:$16 sps:$4 sm:$0xff]  }
 0x1a1   :  { %2376 = vmatprep.subr.bf16.mxu0 %v5665_v0  ;;  %2540 = vmatprep.subr.bf16.mxu1 %v5668_v2  ;;  %v5743_v0 = vld [vmem:[%s9303_s3 + $0x6e4] ss:$16 sps:$4 sm:$0xff]   ;;  %v5746_v2 = vld [vmem:[%s9303_s3 + $0x6ec] ss:$16 sps:$4 sm:$0xff]  }
 0x1a4   :  { %2377 = vmatpush1.bf16.msra.mxu0 %v5663_v5  ;;  %2541 = vmatpush1.bf16.msra.mxu1 %v5666_v6  ;;  %v5741_v5 = vld [vmem:[%s9303_s3 + $0x6e0] ss:$16 sps:$4 sm:$0xff]   ;;  %v5744_v6 = vld [vmem:[%s9303_s3 + $0x6e8] ss:$16 sps:$4 sm:$0xff]  }
 0x1a5   :  { %2378 = vmatprep.subr.bf16.mxu0 %v5671_v7  ;;  %2542 = vmatprep.subr.bf16.mxu1 %v5674_v8  ;;  %v5749_v7 = vld [vmem:[%s9303_s3 + $0x704] ss:$16 sps:$4 sm:$0xff]   ;;  %v5752_v8 = vld [vmem:[%s9303_s3 + $0x70c] ss:$16 sps:$4 sm:$0xff]  }
 0x1a8   :  { %2379 = vmatpush1.bf16.msra.mxu0 %v5669_v9  ;;  %2543 = vmatpush1.bf16.msra.mxu1 %v5672_v10  ;;  %v5747_v9 = vld [vmem:[%s9303_s3 + $0x700] ss:$16 sps:$4 sm:$0xff]   ;;  %v5750_v10 = vld [vmem:[%s9303_s3 + $0x708] ss:$16 sps:$4 sm:$0xff]  }
 0x1a9   :  { %2380 = vmatprep.subr.bf16.mxu0 %v5677_v11  ;;  %2544 = vmatprep.subr.bf16.mxu1 %v5680_v12  ;;  %v5755_v11 = vld [vmem:[%s9303_s3 + $0x724] ss:$16 sps:$4 sm:$0xff]   ;;  %v5758_v12 = vld [vmem:[%s9303_s3 + $0x72c] ss:$16 sps:$4 sm:$0xff]  }
 0x1ac   :  { %2381 = vmatpush1.bf16.msra.mxu0 %v5675_v15  ;;  %2545 = vmatpush1.bf16.msra.mxu1 %v5678_v16  ;;  %v5756_v15 = vld [vmem:[%s9303_s3 + $0x728] ss:$16 sps:$4 sm:$0xff]   ;;  %v5761_v16 = vld [vmem:[%s9303_s3 + $0x744] ss:$16 sps:$4 sm:$0xff]  }
 0x1ad   :  { %2382 = vmatprep.subr.bf16.mxu0 %v5683_v17  ;;  %2546 = vmatprep.subr.bf16.mxu1 %v5686_v18  ;;  %v5764_v17 = vld [vmem:[%s9303_s3 + $0x74c] ss:$16 sps:$4 sm:$0xff]   ;;  %v5759_v18 = vld [vmem:[%s9303_s3 + $0x740] ss:$16 sps:$4 sm:$0xff]  }
 0x1b0   :  { %2383 = vmatpush1.bf16.msra.mxu0 %v5681_v19  ;;  %2547 = vmatpush1.bf16.msra.mxu1 %v5684_v24  ;;  %v5770_v19 = vld [vmem:[%s9303_s3 + $0x76c] ss:$16 sps:$4 sm:$0xff]   ;;  %v5765_v24 = vld [vmem:[%s9303_s3 + $0x760] ss:$16 sps:$4 sm:$0xff]  }
 0x1b1   :  { %2384 = vmatprep.subr.bf16.mxu0 %v5689_v20  ;;  %2548 = vmatprep.subr.bf16.mxu1 %v5692_v32  ;;  %v5768_v20 = vld [vmem:[%s9303_s3 + $0x768] ss:$16 sps:$4 sm:$0xff]   ;;  %v5773_v32 = vld [vmem:[%s9303_s3 + $0x784] ss:$16 sps:$4 sm:$0xff]  }
 0x1b4   :  { %2385 = vmatpush1.bf16.msra.mxu0 %v5687_v22  ;;  %2549 = vmatpush1.bf16.msra.mxu1 %v5690_v1  ;;  %v5771_v22 = vld [vmem:[%s9303_s3 + $0x780] ss:$16 sps:$4 sm:$0xff]   ;;  %v5774_v1 = vld [vmem:[%s9303_s3 + $0x788] ss:$16 sps:$4 sm:$0xff]  }
 0x1b5   :  { %2386 = vmatprep.subr.bf16.mxu0 %v5695_v23  ;;  %2550 = vmatprep.subr.bf16.mxu1 %v5698_v25  ;;  %v5779_v23 = vld [vmem:[%s9303_s3 + $0x7a4] ss:$16 sps:$4 sm:$0xff]   ;;  %v5782_v25 = vld [vmem:[%s9303_s3 + $0x7ac] ss:$16 sps:$4 sm:$0xff]  }
 0x1b8   :  { %2387 = vmatpush1.bf16.msra.mxu0 %v5693_v26  ;;  %2551 = vmatpush1.bf16.msra.mxu1 %v5696_v27  ;;  %v5777_v26 = vld [vmem:[%s9303_s3 + $0x7a0] ss:$16 sps:$4 sm:$0xff]   ;;  %v5780_v27 = vld [vmem:[%s9303_s3 + $0x7a8] ss:$16 sps:$4 sm:$0xff]  }
 0x1b9   :  { %2397 = vmatprep.subr.bf16.mxu0 %v5701_v28  ;;  %2561 = vmatprep.subr.bf16.mxu1 %v5704_v61  ;;  %v5785_v28 = vld [vmem:[%s9303_s3 + $0x7c4] ss:$16 sps:$4 sm:$0xff]   ;;  %v5788_v61 = vld [vmem:[%s9303_s3 + $0x7cc] ss:$16 sps:$4 sm:$0xff]  }
 0x1bb   :  { %2389 = vmatmul.mubr.bf16.vlgmr.msra.gmra.mrb[4].mxu0 %v990_v31  ;;  %2553 = vmatmul.mubr.bf16.vlgmr.msra.gmra.mrb[4].mxu1 %v990_v31  ;;  %v5791_v31 = vld [vmem:[%s9303_s3 + $0x7e4] ss:$16 sps:$4 sm:$0xff]  }
 0x1bc   :  { %2398 = vmatpush1.bf16.msra.mxu0 %v5699_v30  ;;  %2429 = vmatprep.mubr.bf16.mxu0 %v993_v35  ;;  %v5786_v30 = vld [vmem:[%s9303_s3 + $0x7c8] ss:$16 sps:$4 sm:$0xff]  }
 0x1bd   :  { %2562 = vmatpush1.bf16.msra.mxu1 %v5702_v33  ;;  %2593 = vmatprep.mubr.bf16.mxu1 %v993_v35  ;;  %v5794_v33 = vld [vmem:[%s9303_s3 + $0x7ec] ss:$16 sps:$4 sm:$0xff]   ;;  %v5789_v35 = vld [vmem:[%s9303_s3 + $0x7e0] ss:$16 sps:$4 sm:$0xff]  }
 0x1be   :  { %2399 = vmatprep.subr.bf16.mxu0 %v5707_v36  ;;  %2563 = vmatprep.subr.bf16.mxu1 %v5710_v37  ;;  %v5792_v36 = vld [vmem:[%s9303_s3 + $0x7e8] ss:$16 sps:$4 sm:$0xff]   ;;  %v992_v37 = vpack.c.bf16 %v7180_v46, %v7180_v46 }
 0x1c0   :  { %2400 = vmatpush1.bf16.msra.mxu0 %v5705_v21 }
 0x1c1   :  { %2564 = vmatpush1.bf16.msra.mxu1 %v5708_v38  ;;  %2401 = vmatprep.subr.bf16.mxu0 %v5713_v39 }
 0x1c2   :  { %2565 = vmatprep.subr.bf16.mxu1 %v5716_v40 }
 0x1c4   :  { %2402 = vmatpush1.bf16.msra.mxu0 %v5711_v41 }
 0x1c5   :  { %2566 = vmatpush1.bf16.msra.mxu1 %v5714_v42  ;;  %2403 = vmatprep.subr.bf16.mxu0 %v5719_v43 }
 0x1c6   :  { %2567 = vmatprep.subr.bf16.mxu1 %v5722_v45 }
 0x1c8   :  { %2404 = vmatpush1.bf16.msra.mxu0 %v5717_v47 }
 0x1c9   :  { %2568 = vmatpush1.bf16.msra.mxu1 %v5720_v48  ;;  %2405 = vmatprep.subr.bf16.mxu0 %v5725_v49 }
 0x1ca   :  { %2569 = vmatprep.subr.bf16.mxu1 %v5728_v50 }
 0x1cc   :  { %2406 = vmatpush1.bf16.msra.mxu0 %v5723_v51 }
 0x1cd   :  { %2570 = vmatpush1.bf16.msra.mxu1 %v5726_v52  ;;  %2407 = vmatprep.subr.bf16.mxu0 %v5731_v53  ;;  %v6254_v53 = vmov 0.0  }
 0x1ce   :  { %2571 = vmatprep.subr.bf16.mxu1 %v5734_v54  ;;  %v35_v54 = vld [vmem:[%s9304_s7] sm:$0xff] }
 0x1d0   :  { %2408 = vmatpush1.bf16.msra.mxu0 %v5729_v55 }
 0x1d1   :  { %2572 = vmatpush1.bf16.msra.mxu1 %v5732_v56  ;;  %2409 = vmatprep.subr.bf16.mxu0 %v5737_v57 }
 0x1d2   :  { %2573 = vmatprep.subr.bf16.mxu1 %v5740_v58 }
 0x1d4   :  { %2410 = vmatpush1.bf16.msra.mxu0 %v5735_v59 }
 0x1d5   :  { %2574 = vmatpush1.bf16.msra.mxu1 %v5738_v60  ;;  %2411 = vmatprep.subr.bf16.mxu0 %v5743_v0 }
 0x1d6   :  { %2575 = vmatprep.subr.bf16.mxu1 %v5746_v2 }
 0x1d8   :  { %2412 = vmatpush1.bf16.msra.mxu0 %v5741_v5 }
 0x1d9   :  { %2576 = vmatpush1.bf16.msra.mxu1 %v5744_v6  ;;  %2413 = vmatprep.subr.bf16.mxu0 %v5749_v7 }
 0x1da   :  { %2577 = vmatprep.subr.bf16.mxu1 %v5752_v8 }
 0x1dc   :  { %2414 = vmatpush1.bf16.msra.mxu0 %v5747_v9 }
 0x1dd   :  { %2578 = vmatpush1.bf16.msra.mxu1 %v5750_v10  ;;  %2415 = vmatprep.subr.bf16.mxu0 %v5755_v11 }
 0x1de   :  { %2579 = vmatprep.subr.bf16.mxu1 %v5758_v12 }
 0x1e0   :  { %2416 = vmatpush1.bf16.msra.mxu0 %v5753_v14 }
 0x1e1   :  { %2580 = vmatpush1.bf16.msra.mxu1 %v5756_v15  ;;  %2417 = vmatprep.subr.bf16.mxu0 %v5761_v16 }
 0x1e2   :  { %2581 = vmatprep.subr.bf16.mxu1 %v5764_v17 }
 0x1e4   :  { %2418 = vmatpush1.bf16.msra.mxu0 %v5759_v18 }
 0x1e5   :  { %2582 = vmatpush1.bf16.msra.mxu1 %v5762_v34  ;;  %2419 = vmatprep.subr.bf16.mxu0 %v5767_v44 }
 0x1e6   :  { %2583 = vmatprep.subr.bf16.mxu1 %v5770_v19 }
 0x1e8   :  { %2420 = vmatpush1.bf16.msra.mxu0 %v5765_v24 }
 0x1e9   :  { %2584 = vmatpush1.bf16.msra.mxu1 %v5768_v20  ;;  %2421 = vmatprep.subr.bf16.mxu0 %v5773_v32 }
 0x1ea   :  { %2585 = vmatprep.subr.bf16.mxu1 %v5776_v13 }
 0x1ec   :  { %2422 = vmatpush1.bf16.msra.mxu0 %v5771_v22 }
 0x1ed   :  { %2586 = vmatpush1.bf16.msra.mxu1 %v5774_v1  ;;  %2423 = vmatprep.subr.bf16.mxu0 %v5779_v23 }
 0x1ee   :  { %2587 = vmatprep.subr.bf16.mxu1 %v5782_v25 }
 0x1f0   :  { %2424 = vmatpush1.bf16.msra.mxu0 %v5777_v26 }
 0x1f1   :  { %2588 = vmatpush1.bf16.msra.mxu1 %v5780_v27  ;;  %2425 = vmatprep.subr.bf16.mxu0 %v5785_v28 }
 0x1f2   :  { %2589 = vmatprep.subr.bf16.mxu1 %v5788_v61 }
 0x1f4   :  { %2426 = vmatpush1.bf16.msra.mxu0 %v5783_v29 }
 0x1f5   :  { %2590 = vmatpush1.bf16.msra.mxu1 %v5786_v30  ;;  %2427 = vmatprep.subr.bf16.mxu0 %v5791_v31 }
 0x1f6   :  { %2591 = vmatprep.subr.bf16.mxu1 %v5794_v33 }
 0x1f8   :  { %2428 = vmatpush1.bf16.msra.mxu0 %v5789_v35 }
 0x1f9   :  { %2592 = vmatpush1.bf16.msra.mxu1 %v5792_v36 }
 0x1fa   :  { %4987 = vmatprep.subr.bf16.mxu1 %v6254_v53 }
 0x1fb   :  { %2430 = vmatmul.mubr.bf16.vlgmr.msra.gmra.mrb[4].mxu0 %v992_v37 }
 0x1fc   :  { %2594 = vmatmul.mubr.bf16.vlgmr.msra.gmra.mrb[4].mxu1 %v992_v37 }
 0x1fd   :  { %4997 = vmatprep.mubr.msk.bf16.mxu1 %vm9310_vm3, %v6254_v53 }
 0x2ce   :  { %v2431_v21 = vpop.f32.mrb[4].mxu0 }
 0x2cf   :  { %v2606_v38 = vrot.slane %v2431_v21, 4  ;;  %v2595_v39 = vpop.f32.mrb[4].mxu1  ;;  %v2433_v40 = vpop.f32.mrb[5].mxu0 }
 0x2d0   :  { %v2608_v41 = vrot.slane %v2595_v39, 4  ;;  %v2607_v42 = vrot.slane %v2433_v40, 4  ;;  %v2597_v43 = vpop.f32.mrb[5].mxu1  ;;  %v2435_v45 = vpop.f32.mrb[6].mxu0 }
 0x2d1   :  { %v7388_v47 = vsel %vm9315_vm2, %v6971_v62, %v2606_v38  ;;  %v2609_v48 = vrot.slane %v2597_v43, 4  ;;  %v2599_v49 = vpop.f32.mrb[6].mxu1  ;;  %v2436_v50 = vpop.f32.mrb[7].mxu0 }
 0x2d2   :  { %v7392_v46 = vsel %vm9315_vm2, %v6975_v3, %v2608_v41  ;;  %v7396_v51 = vsel %vm9315_vm2, %v6973_v63, %v2607_v42  ;;  %v2600_v52 = vpop.f32.mrb[7].mxu1  ;;  %2638 = vrot.lane.b32.xlu0 %v7388_v47, %s6246_s25  ;;  %2623 = vrot.lane.b32.xlu1 %v7388_v47, %s6247_s26  ;;  %v6253_v3 = vmov 0  }
 0x2d3   :  { %v2618_v62 = vsel %vm9315_vm2, %v6977_v4, %v2609_v48  ;;  %v5104_v63 = vpack.i.bf16 %v7392_v46, %v7396_v51  ;;  %2808 = vmatprep.mubr.bf16.mxu0 %v6253_v3  ;;  %5144 = vset.pattern.permute.xlu0 %v6253_v3  ;;  %v5139_v4 = vpack.i.bf16 %v7396_v51, %v7388_v47 }
 0x2d6   :  { %2668 = vrot.lane.b32.xlu0 %v7388_v47, %s6248_s27  ;;  %2653 = vrot.lane.b32.xlu1 %v7388_v47, %s6249_s28 }
 0x2da   :  { %2698 = vrot.lane.b32.xlu0 %v7388_v47, %s6250_s29  ;;  %2683 = vrot.lane.b32.xlu1 %v7388_v47, %s6251_s30 }
 0x2de   :  { %2713 = vrot.lane.b32.xlu1 %v7388_v47, %s6252_s10  ;;  %5105 = vrot.lane.b32.xlu0 %v5104_v63, %s6247_s26 }
 0x2e2   :  { %5115 = vrot.lane.b32.xlu1 %v5104_v63, %s6249_s28  ;;  %5110 = vrot.lane.b32.xlu0 %v5104_v63, %s6246_s25 }
 0x2e6   :  { %5125 = vrot.lane.b32.xlu1 %v5104_v63, %s6251_s30  ;;  %5120 = vrot.lane.b32.xlu0 %v5104_v63, %s6248_s27 }
 0x2ea   :  { %5135 = vrot.lane.b32.xlu1 %v5104_v63, %s6252_s10  ;;  %5130 = vrot.lane.b32.xlu0 %v5104_v63, %s6250_s29 }
 0x2ee   :  { %2732 = vrot.lane.b32.xlu1 %v7392_v46, %s6255_s12  ;;  %5140 = vrot.lane.b32.xlu0 %v5139_v4, %s6255_s12 }
 0x2f2   :  { %2644 = vrot.lane.b32.xlu1 %v2618_v62, %s6246_s25  ;;  %2629 = vrot.lane.b32.xlu0 %v2618_v62, %s6247_s26 }
 0x2f6   :  { %2674 = vrot.lane.b32.xlu1 %v2618_v62, %s6248_s27  ;;  %2659 = vrot.lane.b32.xlu0 %v2618_v62, %s6249_s28 }
 0x2fa   :  { %2704 = vrot.lane.b32.xlu1 %v2618_v62, %s6250_s29  ;;  %2689 = vrot.lane.b32.xlu0 %v2618_v62, %s6251_s30 }
 0x2fe   :  { %2734 = vrot.lane.b32.xlu1 %v2618_v62, %s6255_s12  ;;  %2719 = vrot.lane.b32.xlu0 %v2618_v62, %s6252_s10 }
 0x302   :  { %2760 = vperm.xlu0 %5144, %v35_v54  }
 0x344   :  { %v2639_v55 = vpop.permute.xlu0 %2638  ;;  %v2624_v56 = vpop.permute.xlu1 %2623 }
 0x348   :  { %v2669_v57 = vpop.permute.xlu0 %2668  ;;  %v2654_v58 = vpop.permute.xlu1 %2653 }
 0x34c   :  { %v2699_v59 = vpop.permute.xlu0 %2698  ;;  %v2684_v60 = vpop.permute.xlu1 %2683 }
 0x350   :  { %v2714_v0 = vpop.permute.xlu1 %2713  ;;  %v7444_v2 = vpop.permute.xlu0 %5105 }
 0x351   :  { %v5108_v5 = vunpack.i.h.bf16 %v7444_v2  ;;  %v5107_v6 = vunpack.i.l.bf16 %v7444_v2 }
 0x353   :  { %v2632_v7 = vsel %vm2631_vm4, %v2624_v56, %v5107_v6  ;;  %v2633_v8 = vsel %vm2631_vm4, %v5107_v6, %v5108_v5  ;;  %v33_v56 = vld [vmem:[%s9305_s5] sm:$0xf] }
 0x354   :  { %v7452_v9 = vpop.permute.xlu1 %5115  ;;  %v7454_v10 = vpop.permute.xlu0 %5110  ;;  %v2744_v11 = vpack.c.bf16 %v2633_v8, %v7396_v51  ;;  %v2743_v12 = vpack.c.bf16 %v2632_v7, %v7388_v47 }
 0x355   :  { %v5118_v14 = vunpack.i.h.bf16 %v7452_v9  ;;  %v5117_v15 = vunpack.i.l.bf16 %v7452_v9  ;;  %v5113_v16 = vunpack.i.h.bf16 %v7454_v10  ;;  %v5112_v17 = vunpack.i.l.bf16 %v7454_v10 }
 0x356   :  { %2776 = vmatprep.subr.bf16.mxu0 %v2744_v11 }
 0x357   :  { %v2662_v18 = vsel %vm2661_vm5, %v2654_v58, %v5117_v15  ;;  %v2647_v34 = vsel %vm2646_vm6, %v2639_v55, %v5112_v17  ;;  %2777 = vmatpush1.bf16.msra.mxu0 %v2743_v12  ;;  %v2648_v44 = vsel %vm2646_vm6, %v5112_v17, %v5113_v16  ;;  %v2663_v19 = vsel %vm2661_vm5, %v5117_v15, %v5118_v14 }
 0x358   :  { %v7470_v24 = vpop.permute.xlu1 %5125  ;;  %v7472_v20 = vpop.permute.xlu0 %5120  ;;  %v2747_v32 = vpack.c.bf16 %v2663_v19, %v2648_v44  ;;  %v2746_v13 = vpack.c.bf16 %v2662_v18, %v2647_v34  ;;  %v405_v18 = vlaneseq }
 0x359   :  { %v5128_v22 = vunpack.i.h.bf16 %v7470_v24  ;;  %v5127_v1 = vunpack.i.l.bf16 %v7470_v24  ;;  %v5123_v23 = vunpack.i.h.bf16 %v7472_v20  ;;  %v5122_v25 = vunpack.i.l.bf16 %v7472_v20 }
 0x35a   :  { %2778 = vmatprep.subr.bf16.mxu0 %v2747_v32  ;;  %v406_v34 = vand.u32 127, %v405_v18 }
 0x35b   :  { %v2692_v26 = vsel %vm2691_vm7, %v2684_v60, %v5127_v1  ;;  %v2677_v27 = vsel %vm2676_vm8, %v2669_v57, %v5122_v25  ;;  %2779 = vmatpush1.bf16.msra.mxu0 %v2746_v13  ;;  %v2678_v28 = vsel %vm2676_vm8, %v5122_v25, %v5123_v23  ;;  %v2693_v61 = vsel %vm2691_vm7, %v5127_v1, %v5128_v22 }
 0x35c   :  { %v5136_v29 = vpop.permute.xlu1 %5135  ;;  %v5131_v30 = vpop.permute.xlu0 %5130  ;;  %v2750_v31 = vpack.c.bf16 %v2693_v61, %v2678_v28  ;;  %v2749_v33 = vpack.c.bf16 %v2692_v26, %v2677_v27  ;;  %v407_v44 = vadd.s32 128, %v406_v34  ;;  %v408_v25 = vadd.s32 256, %v406_v34 }
 0x35d   :  { %v5138_v35 = vunpack.i.h.bf16 %v5136_v29  ;;  %v5137_v36 = vunpack.i.l.bf16 %v5136_v29  ;;  %v5133_v37 = vunpack.i.h.bf16 %v5131_v30  ;;  %v5132_v21 = vunpack.i.l.bf16 %v5131_v30 }
 0x35e   :  { %2780 = vmatprep.subr.bf16.mxu0 %v2750_v31  ;;  %v7519_v19 = vmul.u32.u64.low 3435973837, %v406_v34  ;;  %v7520_v24 = vmul.u32.u64.high 3435973837, %v406_v34, %v7519_v19  ;;  %v7522_v20 = vmul.u32.u64.low 3435973837, %v407_v44  ;;  %v7523_v32 = vmul.u32.u64.high 3435973837, %v407_v44, %v7522_v20 }
 0x35f   :  { %v2722_v38 = vsel %vm2721_vm9, %v2714_v0, %v5137_v36  ;;  %v2707_v39 = vsel %vm2706_vm10, %v2699_v59, %v5132_v21  ;;  %2781 = vmatpush1.bf16.msra.mxu0 %v2749_v33  ;;  %v2708_v40 = vsel %vm2706_vm10, %v5132_v21, %v5133_v37  ;;  %v2723_v41 = vsel %vm2721_vm9, %v5137_v36, %v5138_v35 }
 0x360   :  { %v2752_v42 = vpack.c.bf16 %v2722_v38, %v2707_v39  ;;  %v2733_v43 = vpop.permute.xlu1 %2732  ;;  %v5141_v45 = vpop.permute.xlu0 %5140  ;;  %v2753_v47 = vpack.c.bf16 %v2723_v41, %v2708_v40  ;;  %v415_v13 = vshrl.u32 %v7520_v24, 4 }
 0x361   :  { %v5143_v48 = vunpack.i.h.bf16 %v5141_v45  ;;  %v5142_v49 = vunpack.i.l.bf16 %v5141_v45  ;;  %v7527_v28 = vmul.u32.u64.low 3435973837, %v408_v25  ;;  %v7528_v61 = vmul.u32.u64.high 3435973837, %v408_v25, %v7527_v28 }
 0x362   :  { %2782 = vmatprep.subr.bf16.mxu0 %v2753_v47  ;;  %v416_v1 = vmul.u32 20, %v415_v13 }
 0x363   :  { %v2738_v50 = vsel %vm2736_vm11, %v5143_v48, %v2733_v43  ;;  %2783 = vmatpush1.bf16.msra.mxu0 %v2752_v42  ;;  %v2737_v51 = vsel %vm2736_vm11, %v5142_v49, %v5143_v48  ;;  %v437_v33 = vshrl.u32 %v7528_v61, 4 }
 0x364   :  { %v2756_v52 = vpack.c.bf16 %v2738_v50, %v2738_v50  ;;  %v2645_v62 = vpop.permute.xlu1 %2644  ;;  %v2630_v63 = vpop.permute.xlu0 %2629  ;;  %v2755_v4 = vpack.c.bf16 %v2737_v51, %v2737_v51  ;;  %v417_v26 = vsub.s32 %v406_v34, %v416_v1 }
 0x365   :  { %v2634_v54 = vsel %vm2631_vm4, %v5108_v5, %v2630_v63  ;;  %v2649_v0 = vsel %vm2646_vm6, %v5113_v16, %v2645_v62  ;;  %v438_v42 = vmul.u32 20, %v437_v33 }
 0x366   :  { %4874 = vmatprep.subr.msk.bf16.mxu0 %vm9315_vm2, %v2756_v52  ;;  %v2768_v55 = vsel %vm9315_vm2, %v2755_v4, 0  ;;  %v2745_v59 = vpack.c.bf16 %v2634_v54, %v7392_v46  ;;  %vm442_vm13 = vcmp.ne.s32.totalorder %v417_v26, 0  ;;  %vm445_vm14 = vcmp.lt.s32.totalorder %v417_v26, 0 }
 0x367   :  { %2785 = vmatpush1.bf16.msra.mxu0 %v2768_v55  ;;  %v451_v29 = vadd.s32 20, %v417_v26  ;;  %vm448_vm1 = vmand %vm445_vm14, %vm442_vm13  ;;  %v439_v51 = vsub.s32 %v408_v25, %v438_v42 }
 0x368   :  { %v2675_v57 = vpop.permute.xlu1 %2674  ;;  %v2660_v58 = vpop.permute.xlu0 %2659  ;;  %4973 = vmatprep.subr.bf16.mxu0 %v6254_v53 }
 0x369   :  { %v2664_v60 = vsel %vm2661_vm5, %v5118_v14, %v2660_v58  ;;  %v2679_v7 = vsel %vm2676_vm8, %v5123_v23, %v2675_v57  ;;  %v453_v62 = vadd.s32 20, %v439_v51 }
 0x36a   :  { %4875 = vmatmul.mubr.msk.bf16.vlgmr.msra.gmra.mrb[8].mxu0 %vm9314_vm12, %v33_v56  ;;  %v2748_v6 = vpack.c.bf16 %v2664_v60, %v2649_v0 }
 0x36b   :  { %4974 = vmatpush3.bf16.msra.mxu0 %v2745_v59  ;;  %4983 = vmatprep.mubr.msk.bf16.mxu0 %vm9310_vm3, %v6254_v53 }
 0x36c   :  { %v2705_v2 = vpop.permute.xlu1 %2704  ;;  %v2690_v5 = vpop.permute.xlu0 %2689  ;;  %4975 = vmatprep.subr.bf16.mxu0 %v6254_v53 }
 0x36d   :  { %v2694_v46 = vsel %vm2691_vm7, %v5128_v22, %v2690_v5  ;;  %v2709_v14 = vsel %vm2706_vm10, %v5133_v37, %v2705_v2  ;;  %v426_v22 = vshrl.u32 %v7523_v32, 4 }
 0x36e   :  { %v2751_v11 = vpack.c.bf16 %v2694_v46, %v2679_v7 }
 0x36f   :  { %4976 = vmatpush3.bf16.msra.mxu0 %v2748_v6  ;;  %v427_v23 = vmul.u32 20, %v426_v22 }
 0x370   :  { %v2735_v8 = vpop.permute.xlu1 %2734  ;;  %v2720_v9 = vpop.permute.xlu0 %2719  ;;  %4977 = vmatprep.subr.bf16.mxu0 %v6254_v53 }
 0x371   :  { %v2724_v12 = vsel %vm2721_vm9, %v5138_v35, %v2720_v9  ;;  %v2739_v10 = vsel %vm2736_vm11, %v2733_v43, %v2735_v8  ;;  %v428_v27 = vsub.s32 %v407_v44, %v427_v23  ;;  %v454_v35 = vsel %vm448_vm1, %v451_v29, %v417_v26 }
 0x372   :  { %v2754_v15 = vpack.c.bf16 %v2724_v12, %v2709_v14  ;;  %v2757_v16 = vpack.c.bf16 %v2739_v10, %v2739_v10  ;;  %vm447_vm1 = vcmp.lt.s32.totalorder %v439_v51, 0  ;;  %v7594_v10 = vld [vmem:[%s9300_s1 + $0x20] sm:$0xff] }
 0x373   :  { %4978 = vmatpush3.bf16.msra.mxu0 %v2751_v11  ;;  %vm443_vm15 = vcmp.ne.s32.totalorder %v428_v27, 0  ;;  %vm446_vm3 = vcmp.lt.s32.totalorder %v428_v27, 0  ;;  %v452_v30 = vadd.s32 20, %v428_v27  ;;  %v36_v14 = vld [vmem:[%s9306_s8] sm:$0xff] }
 0x374   :  { %4979 = vmatprep.subr.bf16.mxu0 %v6254_v53  ;;  %v2774_v17 = vsel %vm9315_vm2, %v2757_v16, 0  ;;  %vm449_vm0 = vmand %vm446_vm3, %vm443_vm15  ;;  %vm462_vm15 = vcmp.lt.s32.totalorder %v408_v25, 320  ;;  %v3453_v16 = vcombine.high %v7594_v10, %v7594_v10 }
 0x375   :  { %v455_v37 = vsel %vm449_vm0, %v452_v30, %v428_v27  ;;  %vm444_vm0 = vcmp.ne.s32.totalorder %v439_v51, 0 }
 0x376   :  { %vm7539_vm13 = vcmp.lt.s32.totalorder %v455_v37, 16  ;;  %vm450_vm3 = vmand %vm447_vm1, %vm444_vm0  ;;  %vm9316_vm0 = vcmask 343040  }
 0x377   :  { %4980 = vmatpush3.bf16.msra.mxu0 %v2754_v15  ;;  %v456_v63 = vsel %vm450_vm3, %v453_v62, %v439_v51  ;;  %v7605_v15 = vld [vmem:[%s9300_s1 + $0x28] sm:$0xff]  ;;  %vm4877_vm1 = vmneg %vm9316_vm0  ;;  %vm6258_vm3 = vmmov 1  }
 0x378   :  { %4981 = vmatprep.subr.bf16.mxu0 %v6254_v53  ;;  %vm459_vm14 = vcmp.lt.s32.totalorder %v456_v63, 16  ;;  %v3454_v18 = vcombine.high %v7605_v15, %v7605_v15 }
 0x379   :  { %vm7549_vm2 = vmand %vm459_vm14, %vm462_vm15  ;;  %vm9325_vm15 = vcmask 1043456  }
 0x37a   :  { %vm7640_vm14 = vmpackc.low %vm6258_vm3, %vm4877_vm1  ;;  %vm9327_vm3 = vcmask 588800  }
 0x37b   :  { %4982 = vmatpush3.bf16.msra.mxu0 %v2774_v17  ;;  %v7614_v17 = vld [vmem:[%s9300_s1 + $0x30] sm:$0xff]  ;;  %vm9326_vm1 = vmmov %vm9325_vm15 }
 0x37e   :  { %4984 = vmatmul.mubr.msk.bf16.vlgmr.msra.gmra.mrb[12].mxu0 %vm9314_vm12, %v33_v56  ;;  %vm7535_vm12 = vcmp.lt.s32.totalorder %v454_v35, 16 }
 0x37f   :  { %3065 = vmatprep.mubr.bf16.mxu0 %v6253_v3 }
 0x381   :  { %v7530_v31 = vpop.permute.xlu0 %2760 }
 0x43d   :  { %v2810_v36 = vpop.f32.mrb[8].mxu0 }
 0x43e   :  { %v2812_v21 = vpop.f32.mrb[9].mxu0  ;;  %v2811_v38 = vadd.f32 %v2810_v36, %v7530_v31 }
 0x43f   :  { %v2813_v39 = vadd.f32 %v2812_v21, %v7530_v31  ;;  %v2814_v40 = vpop.f32.mrb[10].mxu0 }
 0x440   :  { %v2815_v45 = vpop.f32.mrb[11].mxu0  ;;  %v2857_v47 = vmax.f32 %v2811_v38, 0.0 }
 0x441   :  { %v2858_v48 = vmax.f32 %v2813_v39, 0.0 }
 0x442   :  { %v2866_v49 = vsel %vm7535_vm12, %v2857_v47, 0.0 }
 0x443   :  { %v2867_v50 = vsel %vm7539_vm13, %v2858_v48, 0.0 }
 0x444   :  { %v5145_v52 = vpack.i.bf16 %v2867_v50, %v2866_v49 }
 0x446   :  { %5146 = vrot.lane.b32.xlu1 %v5145_v52, %s6257_s17 }
 0x451   :  { %v2851_v4 = vpop.f32.mrb[12].mxu0 }
 0x452   :  { %v2852_v54 = vadd.f32 %v2851_v4, %v7530_v31  ;;  %v4985_v55 = vpop.f32.mrb[13].mxu0 }
 0x453   :  { %v2854_v56 = vpop.f32.mrb[14].mxu0 }
 0x454   :  { %v2859_v58 = vmax.f32 %v2852_v54, 0.0  ;;  %v4986_v59 = vpop.f32.mrb[15].mxu0 }
 0x456   :  { %v2868_v60 = vsel %vm7549_vm2, %v2859_v58, 0.0 }
 0x457   :  { %2876 = vrot.lane.b32.xlu1 %v2868_v60, %s6257_s17 }
 0x4b8   :  { %v5147_v0 = vpop.permute.xlu1 %5146 }
 0x4b9   :  { %v7556_v2 = vunpack.i.l.bf16 %v5147_v0  ;;  %v5149_v6 = vunpack.i.h.bf16 %v5147_v0 }
 0x4bb   :  { %v2885_v5 = vsel %vm9316_vm0, 0.0, %v7556_v2  ;;  %v2879_v7 = vsel %vm9316_vm0, %v7556_v2, %v5149_v6 }
 0x4bc   :  { %2903 = vrot.lane.b32.xlu0 %v2885_v5, %s6246_s25  ;;  %2889 = vrot.lane.b32.xlu1 %v2885_v5, %s6247_s26  ;;  %v5180_v11 = vpack.i.bf16 %v2879_v7, %v2885_v5 }
 0x4c0   :  { %2931 = vrot.lane.b32.xlu0 %v2885_v5, %s6248_s27  ;;  %2917 = vrot.lane.b32.xlu1 %v2885_v5, %s6249_s28 }
 0x4c4   :  { %2959 = vrot.lane.b32.xlu0 %v2885_v5, %s6250_s29  ;;  %2945 = vrot.lane.b32.xlu1 %v2885_v5, %s6251_s30 }
 0x4c8   :  { %2973 = vrot.lane.b32.xlu1 %v2885_v5, %s6252_s10 }
 0x4c9   :  { %v2877_v46 = vpop.permute.xlu1 %2876 }
 0x4ca   :  { %v7570_v8 = vsel %vm9316_vm0, %v5149_v6, %v2877_v46  ;;  %v2886_v12 = vsel %vm9316_vm0, %v2877_v46, 0.0 }
 0x4cb   :  { %v5160_v9 = vpack.i.bf16 %v7570_v8, %v2879_v7 }
 0x4cd   :  { %5161 = vrot.lane.b32.xlu1 %v5160_v9, %s6249_s28  ;;  %5151 = vrot.lane.b32.xlu0 %v5160_v9, %s6247_s26 }
 0x4d1   :  { %5171 = vrot.lane.b32.xlu1 %v5160_v9, %s6251_s30  ;;  %5156 = vrot.lane.b32.xlu0 %v5160_v9, %s6246_s25 }
 0x4d5   :  { %5186 = vrot.lane.b32.xlu1 %v5160_v9, %s6252_s10  ;;  %5166 = vrot.lane.b32.xlu0 %v5160_v9, %s6248_s27 }
 0x4d9   :  { %2991 = vrot.lane.b32.xlu1 %v7570_v8, %s6255_s12  ;;  %5176 = vrot.lane.b32.xlu0 %v5160_v9, %s6250_s29 }
 0x4dd   :  { %2909 = vrot.lane.b32.xlu1 %v2886_v12, %s6246_s25  ;;  %5181 = vrot.lane.b32.xlu0 %v5180_v11, %s6255_s12 }
 0x4e1   :  { %2937 = vrot.lane.b32.xlu1 %v2886_v12, %s6248_s27  ;;  %2895 = vrot.lane.b32.xlu0 %v2886_v12, %s6247_s26 }
 0x4e5   :  { %2965 = vrot.lane.b32.xlu1 %v2886_v12, %s6250_s29  ;;  %2923 = vrot.lane.b32.xlu0 %v2886_v12, %s6249_s28 }
 0x4e9   :  { %2993 = vrot.lane.b32.xlu1 %v2886_v12, %s6255_s12  ;;  %2951 = vrot.lane.b32.xlu0 %v2886_v12, %s6251_s30 }
 0x4ed   :  { %2979 = vrot.lane.b32.xlu0 %v2886_v12, %s6252_s10  ;;  %3457 = vrot.lane.b32.xlu1 %v7594_v10, %s6244_s13 }
 0x4f1   :  { %3018 = vperm.xlu0 %5144, %v36_v14   ;;  %3461 = vrot.lane.b32.xlu1 %v7605_v15, %s6244_s13 }
 0x4f5   :  { %3459 = vrot.lane.b32.xlu0 %v3453_v16, %s6244_s13  ;;  %3465 = vrot.lane.b32.xlu1 %v7614_v17, %s6244_s13 }
 0x4f9   :  { %3463 = vrot.lane.b32.xlu0 %v3454_v18, %s6244_s13 }
 0x52e   :  { %v2890_v34 = vpop.permute.xlu1 %2889  ;;  %v2904_v44 = vpop.permute.xlu0 %2903 }
 0x532   :  { %v2918_v19 = vpop.permute.xlu1 %2917  ;;  %v2932_v24 = vpop.permute.xlu0 %2931 }
 0x536   :  { %v2946_v20 = vpop.permute.xlu1 %2945  ;;  %v2960_v13 = vpop.permute.xlu0 %2959 }
 0x53a   :  { %v2974_v32 = vpop.permute.xlu1 %2973 }
 0x53f   :  { %v7622_v22 = vpop.permute.xlu1 %5161  ;;  %v7624_v1 = vpop.permute.xlu0 %5151 }
 0x540   :  { %v5154_v23 = vunpack.i.h.bf16 %v7624_v1  ;;  %v5153_v25 = vunpack.i.l.bf16 %v7624_v1  ;;  %v5164_v26 = vunpack.i.h.bf16 %v7622_v22  ;;  %v5163_v27 = vunpack.i.l.bf16 %v7622_v22 }
 0x542   :  { %v2897_v28 = vsel %vm2631_vm4, %v2890_v34, %v5153_v25  ;;  %v2898_v61 = vsel %vm2631_vm4, %v5153_v25, %v5154_v23  ;;  %v2925_v40 = vsel %vm2661_vm5, %v2918_v19, %v5163_v27  ;;  %v2926_v47 = vsel %vm2661_vm5, %v5163_v27, %v5164_v26 }
 0x543   :  { %v4879_v29 = vpack.c.bf16 %v2897_v28, %v7556_v2  ;;  %v7636_v30 = vpop.permute.xlu1 %5171  ;;  %v7638_v33 = vpop.permute.xlu0 %5156  ;;  %v3002_v35 = vpack.c.bf16 %v2898_v61, %v2879_v7 }
 0x544   :  { %v5159_v37 = vunpack.i.h.bf16 %v7638_v33  ;;  %v5158_v21 = vunpack.i.l.bf16 %v7638_v33  ;;  %v5174_v38 = vunpack.i.h.bf16 %v7636_v30  ;;  %v5173_v39 = vunpack.i.l.bf16 %v7636_v30 }
 0x545   :  { %3033 = vmatprep.subr.bf16.mxu0 %v3002_v35 }
 0x546   :  { %v2911_v42 = vsel %vm2646_vm6, %v2904_v44, %v5158_v21  ;;  %4880 = vmatpush1.bf16.msk.msra.mxu0 %vm7640_vm14, %v4879_v29  ;;  %v2912_v45 = vsel %vm2646_vm6, %v5158_v21, %v5159_v37  ;;  %v2953_v63 = vsel %vm2691_vm7, %v2946_v20, %v5173_v39  ;;  %v2954_v4 = vsel %vm2691_vm7, %v5173_v39, %v5174_v38  ;;  %v34_v29 = vld [vmem:[%s9307_s6] sm:$0xf] }
 0x547   :  { %v3004_v48 = vpack.c.bf16 %v2925_v40, %v2911_v42  ;;  %v7656_v49 = vpop.permute.xlu1 %5186  ;;  %v5167_v50 = vpop.permute.xlu0 %5166  ;;  %v3005_v51 = vpack.c.bf16 %v2926_v47, %v2912_v45  ;;  %v7696_v45 = vld [vmem:[%s9302_s0 + $0x8] sm:$0xff] }
 0x548   :  { %v5169_v52 = vunpack.i.h.bf16 %v5167_v50  ;;  %v5168_v62 = vunpack.i.l.bf16 %v5167_v50  ;;  %v5189_v54 = vunpack.i.h.bf16 %v7656_v49  ;;  %v5188_v55 = vunpack.i.l.bf16 %v7656_v49 }
 0x549   :  { %3035 = vmatprep.subr.bf16.mxu0 %v3005_v51  ;;  %v3546_v49 = vcombine.high %v7696_v45, %v7696_v45 }
 0x54a   :  { %v2939_v56 = vsel %vm2676_vm8, %v2932_v24, %v5168_v62  ;;  %3036 = vmatpush1.bf16.msra.mxu0 %v3004_v48  ;;  %v2940_v58 = vsel %vm2676_vm8, %v5168_v62, %v5169_v52  ;;  %v2981_v46 = vsel %vm2721_vm9, %v2974_v32, %v5188_v55  ;;  %v2982_v11 = vsel %vm2721_vm9, %v5188_v55, %v5189_v54 }
 0x54b   :  { %v3007_v59 = vpack.c.bf16 %v2953_v63, %v2939_v56  ;;  %v2992_v60 = vpop.permute.xlu1 %2991  ;;  %v5177_v0 = vpop.permute.xlu0 %5176  ;;  %v3008_v2 = vpack.c.bf16 %v2954_v4, %v2940_v58  ;;  %v7705_v51 = vpack.c.bf16 %v3546_v49, %v3546_v49  ;;  %v5875_v63 = vld [vmem:[%s9301_s2] ss:$16 sps:$4 sm:$0xff]   ;;  %v5876_v4 = vld [vmem:[%s9301_s2 + $0x24] ss:$16 sps:$4 sm:$0xff]  }
 0x54c   :  { %v5179_v5 = vunpack.i.h.bf16 %v5177_v0  ;;  %v5178_v6 = vunpack.i.l.bf16 %v5177_v0  ;;  %v5878_v56 = vld [vmem:[%s9301_s2 + $0x44] ss:$16 sps:$4 sm:$0xff]   ;;  %v5893_v49 = vld [vmem:[%s9301_s2 + $0x120] ss:$16 sps:$4 sm:$0xff]  }
 0x54d   :  { %3037 = vmatprep.subr.bf16.mxu0 %v3008_v2  ;;  %v5880_v0 = vld [vmem:[%s9301_s2 + $0x64] ss:$16 sps:$4 sm:$0xff]  }
 0x54e   :  { %v2967_v7 = vsel %vm2706_vm10, %v2960_v13, %v5178_v6  ;;  %3038 = vmatpush1.bf16.msra.mxu0 %v3007_v59  ;;  %v2968_v9 = vsel %vm2706_vm10, %v5178_v6, %v5179_v5  ;;  %v5879_v59 = vld [vmem:[%s9301_s2 + $0x40] ss:$16 sps:$4 sm:$0xff]   ;;  %v5802_v2 = vld [vmem:[%s9308_s4 + $0x4] ss:$8 sps:$4 sm:$0xff]  }
 0x54f   :  { %v3010_v12 = vpack.c.bf16 %v2981_v46, %v2967_v7  ;;  %v2910_v14 = vpop.permute.xlu1 %2909  ;;  %v5182_v16 = vpop.permute.xlu0 %5181  ;;  %v3011_v18 = vpack.c.bf16 %v2982_v11, %v2968_v9  ;;  %v5800_v46 = vld [vmem:[%s9308_s4] ss:$8 sps:$4 sm:$0xff]  }
 0x550   :  { %v5184_v34 = vunpack.i.h.bf16 %v5182_v16  ;;  %v5183_v44 = vunpack.i.l.bf16 %v5182_v16  ;;  %v2913_v21 = vsel %vm2646_vm6, %v5159_v37, %v2910_v14  ;;  %v5881_v11 = vld [vmem:[%s9301_s2 + $0x60] ss:$16 sps:$4 sm:$0xff]   ;;  %v5805_v14 = vld [vmem:[%s9308_s4 + $0x14] ss:$8 sps:$4 sm:$0xff]  }
 0x551   :  { %3039 = vmatprep.subr.bf16.mxu0 %v3011_v18 }
 0x552   :  { %v2996_v19 = vsel %vm2736_vm11, %v5184_v34, %v2992_v60  ;;  %3040 = vmatpush1.bf16.msra.mxu0 %v3010_v12  ;;  %v2995_v24 = vsel %vm2736_vm11, %v5183_v44, %v5184_v34  ;;  %v5803_v12 = vld [vmem:[%s9308_s4 + $0x10] ss:$8 sps:$4 sm:$0xff]   ;;  %v5882_v34 = vld [vmem:[%s9301_s2 + $0x84] ss:$16 sps:$4 sm:$0xff]  }
 0x553   :  { %v3014_v20 = vpack.c.bf16 %v2996_v19, %v2996_v19  ;;  %v2938_v32 = vpop.permute.xlu1 %2937  ;;  %v2896_v13 = vpop.permute.xlu0 %2895  ;;  %v3013_v25 = vpack.c.bf16 %v2995_v24, %v2995_v24 }
 0x554   :  { %v2899_v27 = vsel %vm2631_vm4, %v5154_v23, %v2896_v13  ;;  %v2941_v39 = vsel %vm2676_vm8, %v5169_v52, %v2938_v32  ;;  %v5874_v52 = vld [vmem:[%s9301_s2 + $0x4] ss:$16 sps:$4 sm:$0xff]  }
 0x555   :  { %v3003_v28 = vpack.c.bf16 %v2899_v27, %v7570_v8  ;;  %4881 = vmatprep.subr.msk.bf16.mxu0 %vm9325_vm15, %v3014_v20  ;;  %v3025_v61 = vsel %vm9326_vm1, %v3013_v25, 0  ;;  %vm9328_vm15 = vmmov %vm9326_vm1  ;;  %v5884_v13 = vld [vmem:[%s9301_s2 + $0xa4] ss:$16 sps:$4 sm:$0xff]   ;;  %v3455_v25 = vcombine.high %v7614_v17, %v7614_v17  ;;  %v5806_v27 = vld [vmem:[%s9308_s4 + $0x20] ss:$8 sps:$4 sm:$0xff]  }
 0x556   :  { %3042 = vmatpush1.bf16.msra.mxu0 %v3025_v61  ;;  %vm9329_vm1 = vmmov %vm9327_vm3  ;;  %v5885_v61 = vld [vmem:[%s9301_s2 + $0xa0] ss:$16 sps:$4 sm:$0xff]  }
 0x557   :  { %v2966_v33 = vpop.permute.xlu1 %2965  ;;  %v2924_v35 = vpop.permute.xlu0 %2923  ;;  %4988 = vmatpush3.bf16.msra.mxu1 %v3003_v28  ;;  %3360 = vmatprep.subr.bf16.mxu0 %v5802_v2  ;;  %v5808_v28 = vld [vmem:[%s9308_s4 + $0x24] ss:$8 sps:$4 sm:$0xff]  }
 0x558   :  { %v2927_v1 = vsel %vm2661_vm5, %v5164_v26, %v2924_v35  ;;  %4989 = vmatprep.subr.bf16.mxu1 %v6254_v53  ;;  %v2969_v47 = vsel %vm2706_vm10, %v5179_v5, %v2966_v33  ;;  %v5809_v35 = vld [vmem:[%s9308_s4 + $0x30] ss:$8 sps:$4 sm:$0xff]   ;;  %v5898_v2 = vld [vmem:[%s9301_s2 + $0x184] ss:$16 sps:$4 sm:$0xff]  }
 0x559   :  { %v3006_v8 = vpack.c.bf16 %v2927_v1, %v2913_v21  ;;  %4882 = vmatmul.mubr.msk.bf16.vlgmr.msra.gmra.mrb[16].mxu0 %vm9327_vm3, %v34_v29  ;;  %vm9330_vm3 = vcmask 1039360   ;;  %v5811_v21 = vld [vmem:[%s9308_s4 + $0x34] ss:$8 sps:$4 sm:$0xff]   ;;  %v5887_v1 = vld [vmem:[%s9301_s2 + $0xc0] ss:$16 sps:$4 sm:$0xff]  }
 0x55a   :  { %3361 = vmatpush1.bf16.msra.mxu0 %v5800_v46  ;;  %v5832_v46 = vld [vmem:[%s9308_s4 + $0xa4] ss:$8 sps:$4 sm:$0xff]  }
 0x55b   :  { %v2952_v23 = vpop.permute.xlu0 %2951  ;;  %4990 = vmatpush3.bf16.msra.mxu1 %v3006_v8  ;;  %v2994_v40 = vpop.permute.xlu1 %2993  ;;  %3362 = vmatprep.subr.bf16.mxu0 %v5805_v14  ;;  %v5812_v8 = vld [vmem:[%s9308_s4 + $0x40] ss:$8 sps:$4 sm:$0xff]   ;;  %v5835_v14 = vld [vmem:[%s9308_s4 + $0xb4] ss:$8 sps:$4 sm:$0xff]  }
 0x55c   :  { %v2955_v42 = vsel %vm2691_vm7, %v5174_v38, %v2952_v23  ;;  %4991 = vmatprep.subr.bf16.mxu1 %v6254_v53  ;;  %v2997_v22 = vsel %vm2736_vm11, %v2992_v60, %v2994_v40  ;;  %v5814_v23 = vld [vmem:[%s9308_s4 + $0x44] ss:$8 sps:$4 sm:$0xff]  }
 0x55d   :  { %v3009_v37 = vpack.c.bf16 %v2955_v42, %v2941_v39  ;;  %v3015_v38 = vpack.c.bf16 %v2997_v22, %v2997_v22  ;;  %v5888_v39 = vld [vmem:[%s9301_s2 + $0xe4] ss:$16 sps:$4 sm:$0xff]   ;;  %v5889_v42 = vld [vmem:[%s9301_s2 + $0xe0] ss:$16 sps:$4 sm:$0xff]  }
 0x55e   :  { %3363 = vmatpush1.bf16.msra.mxu0 %v5803_v12  ;;  %v5817_v22 = vld [vmem:[%s9308_s4 + $0x54] ss:$8 sps:$4 sm:$0xff]   ;;  %v5833_v12 = vld [vmem:[%s9308_s4 + $0xb0] ss:$8 sps:$4 sm:$0xff]  }
 0x55f   :  { %v2980_v26 = vpop.permute.xlu0 %2979  ;;  %4992 = vmatpush3.bf16.msra.mxu1 %v3009_v37  ;;  %v3031_v50 = vsel %vm9328_vm15, %v3015_v38, 0  ;;  %v7711_v62 = vpop.permute.xlu1 %3457  ;;  %vm9331_vm15 = vmmov %vm9330_vm3  ;;  %3364 = vmatprep.subr.bf16.mxu0 %v5808_v28  ;;  %v5815_v37 = vld [vmem:[%s9308_s4 + $0x50] ss:$8 sps:$4 sm:$0xff]   ;;  %v5892_v38 = vld [vmem:[%s9301_s2 + $0x124] ss:$16 sps:$4 sm:$0xff]  }
 0x560   :  { %v2983_v48 = vsel %vm2721_vm9, %v5189_v54, %v2980_v26  ;;  %4993 = vmatprep.subr.bf16.mxu1 %v6254_v53  ;;  %v5877_v54 = vld [vmem:[%s9301_s2 + $0x20] ss:$16 sps:$4 sm:$0xff]   ;;  %v5890_v26 = vld [vmem:[%s9301_s2 + $0x104] ss:$16 sps:$4 sm:$0xff]   ;;  %v5908_v28 = vld [vmem:[%s9301_s2 + $0x2c] ss:$16 sps:$4 sm:$0xff]  }
 0x561   :  { %v3012_v30 = vpack.c.bf16 %v2983_v48, %v2969_v47  ;;  %v5891_v47 = vld [vmem:[%s9301_s2 + $0x100] ss:$16 sps:$4 sm:$0xff]  }
 0x562   :  { %3365 = vmatpush1.bf16.msra.mxu0 %v5806_v27  ;;  %v5818_v48 = vld [vmem:[%s9308_s4 + $0x60] ss:$8 sps:$4 sm:$0xff]  }
 0x563   :  { %4994 = vmatpush3.bf16.msra.mxu1 %v3012_v30  ;;  %v3462_v58 = vpop.permute.xlu1 %3461  ;;  %3366 = vmatprep.subr.bf16.mxu0 %v5811_v21  ;;  %v5820_v30 = vld [vmem:[%s9308_s4 + $0x64] ss:$8 sps:$4 sm:$0xff]   ;;  %v5907_v27 = vld [vmem:[%s9301_s2 + $0x8] ss:$16 sps:$4 sm:$0xff]  }
 0x564   :  { %4995 = vmatprep.subr.bf16.mxu1 %v6254_v53  ;;  %v5845_v21 = vld [vmem:[%s9308_s4 + $0xf0] ss:$8 sps:$4 sm:$0xff]  }
 0x566   :  { %3367 = vmatpush1.bf16.msra.mxu0 %v5809_v35  ;;  %v5847_v35 = vld [vmem:[%s9308_s4 + $0xf4] ss:$8 sps:$4 sm:$0xff]  }
 0x567   :  { %4996 = vmatpush3.bf16.msra.mxu1 %v3031_v50  ;;  %v7743_v9 = vpop.permute.xlu1 %3465  ;;  %3368 = vmatprep.subr.bf16.mxu0 %v5814_v23  ;;  %v5821_v50 = vld [vmem:[%s9308_s4 + $0x70] ss:$8 sps:$4 sm:$0xff]   ;;  %v5850_v23 = vld [vmem:[%s9308_s4 + $0x104] ss:$8 sps:$4 sm:$0xff]  }
 0x568   :  { %3550 = vmatprep.subr.bf16.mxu1 %v5874_v52  ;;  %v5823_v52 = vld [vmem:[%s9308_s4 + $0x74] ss:$8 sps:$4 sm:$0xff]  }
 0x56a   :  { %4998 = vmatmul.mubr.msk.bf16.vlgmr.msra.gmra.mrb[8].mxu1 %vm9329_vm1, %v34_v29  ;;  %vm9332_vm1 = vmmov %vm9330_vm3  ;;  %v5886_v29 = vld [vmem:[%s9301_s2 + $0xc4] ss:$16 sps:$4 sm:$0xff]   ;;  %3369 = vmatpush1.bf16.msra.mxu0 %v5812_v8  ;;  %v5912_v8 = vld [vmem:[%s9301_s2 + $0x6c] ss:$16 sps:$4 sm:$0xff]  }
 0x56b   :  { %3551 = vmatpush1.bf16.msra.mxu1 %v5875_v63  ;;  %3582 = vmatprep.mubr.bf16.mxu1 %v7705_v51  ;;  %v5894_v63 = vld [vmem:[%s9301_s2 + $0x144] ss:$16 sps:$4 sm:$0xff]  }
 0x56c   :  { %3552 = vmatprep.subr.bf16.mxu1 %v5876_v4  ;;  %3370 = vmatprep.subr.bf16.mxu0 %v5817_v22  ;;  %v5895_v4 = vld [vmem:[%s9301_s2 + $0x140] ss:$16 sps:$4 sm:$0xff]   ;;  %v5917_v22 = vld [vmem:[%s9301_s2 + $0xa8] ss:$16 sps:$4 sm:$0xff]  }
 0x56e   :  { %3371 = vmatpush1.bf16.msra.mxu0 %v5815_v37  ;;  %v5916_v37 = vld [vmem:[%s9301_s2 + $0xac] ss:$16 sps:$4 sm:$0xff]  }
 0x56f   :  { %3553 = vmatpush1.bf16.msra.mxu1 %v5877_v54  ;;  %3372 = vmatprep.subr.bf16.mxu0 %v5820_v30  ;;  %v5824_v54 = vld [vmem:[%s9308_s4 + $0x80] ss:$8 sps:$4 sm:$0xff]  }
 0x570   :  { %v7723_v55 = vpop.permute.xlu0 %3018  ;;  %3554 = vmatprep.subr.bf16.mxu1 %v5878_v56  ;;  %v5826_v56 = vld [vmem:[%s9308_s4 + $0x84] ss:$8 sps:$4 sm:$0xff]   ;;  %v5921_v30 = vld [vmem:[%s9301_s2 + $0xe8] ss:$16 sps:$4 sm:$0xff]  }
 0x572   :  { %3373 = vmatpush1.bf16.msra.mxu0 %v5818_v48  ;;  %v5920_v48 = vld [vmem:[%s9301_s2 + $0xec] ss:$16 sps:$4 sm:$0xff]  }
 0x573   :  { %3555 = vmatpush1.bf16.msra.mxu1 %v5879_v59  ;;  %3374 = vmatprep.subr.bf16.mxu0 %v5823_v52  ;;  %v5897_v59 = vld [vmem:[%s9301_s2 + $0x160] ss:$16 sps:$4 sm:$0xff]   ;;  %v5925_v52 = vld [vmem:[%s9301_s2 + $0x128] ss:$16 sps:$4 sm:$0xff]  }
 0x574   :  { %v3460_v60 = vpop.permute.xlu0 %3459  ;;  %3556 = vmatprep.subr.bf16.mxu1 %v5880_v0  ;;  %v5829_v0 = vld [vmem:[%s9308_s4 + $0x94] ss:$8 sps:$4 sm:$0xff]  }
 0x575   :  { %v3473_v5 = vsel %vm9330_vm3, %v7711_v62, %v3460_v60  ;;  %v3474_v6 = vsel %vm9331_vm15, %v3460_v60, %v3462_v58  ;;  %vm9333_vm3 = vmmov %vm9332_vm1  ;;  %v5827_v60 = vld [vmem:[%s9308_s4 + $0x90] ss:$8 sps:$4 sm:$0xff]   ;;  %vm9334_vm15 = vcmask 785408  }
 0x576   :  { %v3484_v7 = vcombine.low %v3473_v5, %v3474_v6  ;;  %3375 = vmatpush1.bf16.msra.mxu0 %v5821_v50  ;;  %v5899_v5 = vld [vmem:[%s9301_s2 + $0x180] ss:$16 sps:$4 sm:$0xff]   ;;  %v5924_v50 = vld [vmem:[%s9301_s2 + $0x12c] ss:$16 sps:$4 sm:$0xff]  }
 0x577   :  { %3557 = vmatpush1.bf16.msra.mxu1 %v5881_v11  ;;  %3376 = vmatprep.subr.bf16.mxu0 %v5826_v56  ;;  %v5830_v6 = vld [vmem:[%s9308_s4 + $0xa0] ss:$8 sps:$4 sm:$0xff]  }
 0x578   :  { %v3464_v16 = vpop.permute.xlu0 %3463  ;;  %v7755_v18 = vmax.f32 %v7594_v10, %v3484_v7  ;;  %3558 = vmatprep.subr.bf16.mxu1 %v5882_v34  ;;  %v5883_v10 = vld [vmem:[%s9301_s2 + $0x80] ss:$16 sps:$4 sm:$0xff]   ;;  %v5900_v7 = vld [vmem:[%s9301_s2 + $0x1a4] ss:$16 sps:$4 sm:$0xff]   ;;  %v5929_v56 = vld [vmem:[%s9301_s2 + $0x168] ss:$16 sps:$4 sm:$0xff]  }
 0x579   :  { %v3475_v44 = vsel %vm9332_vm1, %v3462_v58, %v3464_v16  ;;  %v3476_v19 = vsel %vm9333_vm3, %v3464_v16, %v7743_v9  ;;  %v5896_v58 = vld [vmem:[%s9301_s2 + $0x164] ss:$16 sps:$4 sm:$0xff]   ;;  %v5901_v11 = vld [vmem:[%s9301_s2 + $0x1a0] ss:$16 sps:$4 sm:$0xff]   ;;  %vm9335_vm1 = vmmov %vm9334_vm15 }
 0x57a   :  { %v3485_v24 = vcombine.low %v3475_v44, %v3476_v19  ;;  %3504 = vrot.lane.b32.xlu0 %v7755_v18, %s6245_s11  ;;  %v3500_v20 = vcombine.high %v7755_v18, %v7755_v18  ;;  %3377 = vmatpush1.bf16.msra.mxu0 %v5824_v54  ;;  %v5902_v16 = vld [vmem:[%s9301_s2 + $0x1c4] ss:$16 sps:$4 sm:$0xff]   ;;  %v5903_v34 = vld [vmem:[%s9301_s2 + $0x1c0] ss:$16 sps:$4 sm:$0xff]   ;;  %v5928_v54 = vld [vmem:[%s9301_s2 + $0x16c] ss:$16 sps:$4 sm:$0xff]  }
 0x57b   :  { %3559 = vmatpush1.bf16.msra.mxu1 %v5883_v10  ;;  %3378 = vmatprep.subr.bf16.mxu0 %v5829_v0  ;;  %v5836_v44 = vld [vmem:[%s9308_s4 + $0xc0] ss:$8 sps:$4 sm:$0xff]   ;;  %v5838_v19 = vld [vmem:[%s9308_s4 + $0xc4] ss:$8 sps:$4 sm:$0xff]  }
 0x57c   :  { %3506 = vrot.lane.b32.xlu1 %v3500_v20, %s6245_s11  ;;  %v7772_v32 = vmax.f32 %v7605_v15, %v3485_v24  ;;  %3560 = vmatprep.subr.bf16.mxu1 %v5884_v13  ;;  %v7788_v15 = vld [vmem:[%s9300_s1 + $0x38] sm:$0xff]  ;;  %v5904_v24 = vld [vmem:[%s9301_s2 + $0x1e4] ss:$16 sps:$4 sm:$0xff]   ;;  %v7923_v20 = vpack.c.bf16 %v7696_v45, %v7696_v45  ;;  %v5905_v10 = vld [vmem:[%s9301_s2 + $0x1e0] ss:$16 sps:$4 sm:$0xff]  }
 0x57d   :  { %v3456_v40 = vcombine.high %v7788_v15, %v7788_v15  ;;  %v5841_v13 = vld [vmem:[%s9308_s4 + $0xd4] ss:$8 sps:$4 sm:$0xff]   ;;  %v5839_v45 = vld [vmem:[%s9308_s4 + $0xd0] ss:$8 sps:$4 sm:$0xff]  }
 0x57e   :  { %3508 = vrot.lane.b32.xlu0 %v7772_v32, %s6245_s11  ;;  %v3501_v33 = vcombine.high %v7772_v32, %v7772_v32  ;;  %3379 = vmatpush1.bf16.msra.mxu0 %v5827_v60  ;;  %v5932_v60 = vld [vmem:[%s9301_s2 + $0x1ac] ss:$16 sps:$4 sm:$0xff]   ;;  %v5933_v0 = vld [vmem:[%s9301_s2 + $0x1a8] ss:$16 sps:$4 sm:$0xff]  }
 0x57f   :  { %3561 = vmatpush1.bf16.msra.mxu1 %v5885_v61  ;;  %3380 = vmatprep.subr.bf16.mxu0 %v5832_v46  ;;  %v5844_v61 = vld [vmem:[%s9308_s4 + $0xe4] ss:$8 sps:$4 sm:$0xff]   ;;  %v5937_v46 = vld [vmem:[%s9301_s2 + $0x1e8] ss:$16 sps:$4 sm:$0xff]  }
 0x580   :  { %3467 = vrot.lane.b32.xlu1 %v3455_v25, %s6244_s13  ;;  %3562 = vmatprep.subr.bf16.mxu1 %v5886_v29  ;;  %v5906_v25 = vld [vmem:[%s9301_s2 + $0xc] ss:$16 sps:$4 sm:$0xff]   ;;  %v5842_v29 = vld [vmem:[%s9308_s4 + $0xe0] ss:$8 sps:$4 sm:$0xff]  }
 0x582   :  { %3469 = vrot.lane.b32.xlu0 %v7788_v15, %s6244_s13  ;;  %3381 = vmatpush1.bf16.msra.mxu0 %v5830_v6  ;;  %v5936_v6 = vld [vmem:[%s9301_s2 + $0x1ec] ss:$16 sps:$4 sm:$0xff]  }
 0x583   :  { %3563 = vmatpush1.bf16.msra.mxu1 %v5887_v1  ;;  %3382 = vmatprep.subr.bf16.mxu0 %v5835_v14  ;;  %v5911_v1 = vld [vmem:[%s9301_s2 + $0x48] ss:$16 sps:$4 sm:$0xff]   ;;  %v5940_v14 = vld [vmem:[%s9303_s3 + $0x2c] ss:$16 sps:$4 sm:$0xff]  }
 0x584   :  { %3510 = vrot.lane.b32.xlu1 %v3501_v33, %s6245_s11  ;;  %3564 = vmatprep.subr.bf16.mxu1 %v5888_v39  ;;  %v5909_v33 = vld [vmem:[%s9301_s2 + $0x28] ss:$16 sps:$4 sm:$0xff]  }
 0x585   :  { %v5913_v39 = vld [vmem:[%s9301_s2 + $0x68] ss:$16 sps:$4 sm:$0xff]  }
 0x586   :  { %3383 = vmatpush1.bf16.msra.mxu0 %v5833_v12 }
 0x587   :  { %3565 = vmatpush1.bf16.msra.mxu1 %v5889_v42  ;;  %3384 = vmatprep.subr.bf16.mxu0 %v5838_v19  ;;  %v5915_v42 = vld [vmem:[%s9301_s2 + $0x88] ss:$16 sps:$4 sm:$0xff]  }
 0x588   :  { %3471 = vrot.lane.b32.xlu1 %v3456_v40, %s6244_s13  ;;  %3566 = vmatprep.subr.bf16.mxu1 %v5890_v26  ;;  %v5914_v40 = vld [vmem:[%s9301_s2 + $0x8c] ss:$16 sps:$4 sm:$0xff]  }
 0x589   :  { %v5918_v26 = vld [vmem:[%s9301_s2 + $0xcc] ss:$16 sps:$4 sm:$0xff]  }
 0x58a   :  { %3385 = vmatpush1.bf16.msra.mxu0 %v5836_v44  ;;  %v5941_v44 = vld [vmem:[%s9303_s3 + $0x28] ss:$16 sps:$4 sm:$0xff]  }
 0x58b   :  { %3567 = vmatpush1.bf16.msra.mxu1 %v5891_v47  ;;  %3386 = vmatprep.subr.bf16.mxu0 %v5841_v13  ;;  %v5919_v47 = vld [vmem:[%s9301_s2 + $0xc8] ss:$16 sps:$4 sm:$0xff]  }
 0x58c   :  { %3568 = vmatprep.subr.bf16.mxu1 %v5892_v38  ;;  %v5922_v38 = vld [vmem:[%s9301_s2 + $0x10c] ss:$16 sps:$4 sm:$0xff]  }
 0x58e   :  { %3387 = vmatpush1.bf16.msra.mxu0 %v5839_v45 }
 0x58f   :  { %3569 = vmatpush1.bf16.msra.mxu1 %v5893_v49  ;;  %3388 = vmatprep.subr.bf16.mxu0 %v5844_v61  ;;  %v5923_v49 = vld [vmem:[%s9301_s2 + $0x108] ss:$16 sps:$4 sm:$0xff]  }
 0x590   :  { %3570 = vmatprep.subr.bf16.mxu1 %v5894_v63  ;;  %v5926_v63 = vld [vmem:[%s9301_s2 + $0x14c] ss:$16 sps:$4 sm:$0xff]  }
 0x592   :  { %3389 = vmatpush1.bf16.msra.mxu0 %v5842_v29 }
 0x593   :  { %3571 = vmatpush1.bf16.msra.mxu1 %v5895_v4  ;;  %3390 = vmatprep.subr.bf16.mxu0 %v5847_v35  ;;  %v5927_v4 = vld [vmem:[%s9301_s2 + $0x148] ss:$16 sps:$4 sm:$0xff]  }
 0x594   :  { %3572 = vmatprep.subr.bf16.mxu1 %v5896_v58  ;;  %v5930_v58 = vld [vmem:[%s9301_s2 + $0x18c] ss:$16 sps:$4 sm:$0xff]  }
 0x596   :  { %3391 = vmatpush1.bf16.msra.mxu0 %v5845_v21 }
 0x597   :  { %3573 = vmatpush1.bf16.msra.mxu1 %v5897_v59  ;;  %3401 = vmatprep.subr.bf16.mxu0 %v5850_v23  ;;  %v5931_v59 = vld [vmem:[%s9301_s2 + $0x188] ss:$16 sps:$4 sm:$0xff]  }
 0x598   :  { %3574 = vmatprep.subr.bf16.mxu1 %v5898_v2  ;;  %v5934_v2 = vld [vmem:[%s9301_s2 + $0x1cc] ss:$16 sps:$4 sm:$0xff]  }
 0x59b   :  { %3575 = vmatpush1.bf16.msra.mxu1 %v5899_v5  ;;  %v5935_v5 = vld [vmem:[%s9301_s2 + $0x1c8] ss:$16 sps:$4 sm:$0xff]  }
 0x59c   :  { %3576 = vmatprep.subr.bf16.mxu1 %v5900_v7  ;;  %v5938_v7 = vld [vmem:[%s9303_s3 + $0xc] ss:$16 sps:$4 sm:$0xff]  }
 0x59f   :  { %3577 = vmatpush1.bf16.msra.mxu1 %v5901_v11  ;;  %v5939_v11 = vld [vmem:[%s9303_s3 + $0x8] ss:$16 sps:$4 sm:$0xff]  }
 0x5a0   :  { %3578 = vmatprep.subr.bf16.mxu1 %v5902_v16 }
 0x5a3   :  { %3579 = vmatpush1.bf16.msra.mxu1 %v5903_v34 }
 0x5a4   :  { %3580 = vmatprep.subr.bf16.mxu1 %v5904_v24  ;;  %v5942_v24 = vld [vmem:[%s9303_s3 + $0x4c] ss:$16 sps:$4 sm:$0xff]  }
 0x5a7   :  { %3581 = vmatpush1.bf16.msra.mxu1 %v5905_v10 }
 0x5a8   :  { %3591 = vmatprep.subr.bf16.mxu1 %v5906_v25  ;;  %v5943_v25 = vld [vmem:[%s9303_s3 + $0x48] ss:$16 sps:$4 sm:$0xff]  }
 0x5aa   :  { %3583 = vmatmul.mubr.bf16.vlgmr.msra.gmra.mrb[12].mxu1 %v7923_v20 }
 0x5ab   :  { %3592 = vmatpush1.bf16.msra.mxu1 %v5907_v27  ;;  %3623 = vmatprep.mubr.bf16.mxu1 %v7705_v51  ;;  %v5910_v51 = vld [vmem:[%s9301_s2 + $0x4c] ss:$16 sps:$4 sm:$0xff]  }
 0x5ac   :  { %3593 = vmatprep.subr.bf16.mxu1 %v5908_v28  ;;  %v5944_v28 = vld [vmem:[%s9303_s3 + $0x6c] ss:$16 sps:$4 sm:$0xff]  }
 0x5af   :  { %3594 = vmatpush1.bf16.msra.mxu1 %v5909_v33 }
 0x5b0   :  { %3595 = vmatprep.subr.bf16.mxu1 %v5910_v51 }
 0x5b3   :  { %3596 = vmatpush1.bf16.msra.mxu1 %v5911_v1 }
 0x5b4   :  { %3597 = vmatprep.subr.bf16.mxu1 %v5912_v8 }
 0x5b7   :  { %3598 = vmatpush1.bf16.msra.mxu1 %v5913_v39 }
 0x5b8   :  { %3599 = vmatprep.subr.bf16.mxu1 %v5914_v40 }
 0x5bb   :  { %3600 = vmatpush1.bf16.msra.mxu1 %v5915_v42 }
 0x5bc   :  { %3601 = vmatprep.subr.bf16.mxu1 %v5916_v37  ;;  %v5948_v37 = vld [vmem:[%s9303_s3 + $0xac] ss:$16 sps:$4 sm:$0xff]  }
 0x5bf   :  { %3602 = vmatpush1.bf16.msra.mxu1 %v5917_v22 }
 0x5c0   :  { %3603 = vmatprep.subr.bf16.mxu1 %v5918_v26 }
 0x5c3   :  { %3604 = vmatpush1.bf16.msra.mxu1 %v5919_v47  ;;  %v5950_v47 = vld [vmem:[%s9303_s3 + $0xcc] ss:$16 sps:$4 sm:$0xff]  }
 0x5c4   :  { %3605 = vmatprep.subr.bf16.mxu1 %v5920_v48  ;;  %v5952_v48 = vld [vmem:[%s9303_s3 + $0xec] ss:$16 sps:$4 sm:$0xff]  }
 0x5c7   :  { %3606 = vmatpush1.bf16.msra.mxu1 %v5921_v30  ;;  %v5953_v30 = vld [vmem:[%s9303_s3 + $0xe8] ss:$16 sps:$4 sm:$0xff]  }
 0x5c8   :  { %3607 = vmatprep.subr.bf16.mxu1 %v5922_v38  ;;  %v5954_v38 = vld [vmem:[%s9303_s3 + $0x10c] ss:$16 sps:$4 sm:$0xff]  }
 0x5cb   :  { %3608 = vmatpush1.bf16.msra.mxu1 %v5923_v49  ;;  %v5955_v49 = vld [vmem:[%s9303_s3 + $0x108] ss:$16 sps:$4 sm:$0xff]  }
 0x5cc   :  { %3609 = vmatprep.subr.bf16.mxu1 %v5924_v50  ;;  %v5956_v50 = vld [vmem:[%s9303_s3 + $0x12c] ss:$16 sps:$4 sm:$0xff]  }
 0x5cf   :  { %3610 = vmatpush1.bf16.msra.mxu1 %v5925_v52  ;;  %v5957_v52 = vld [vmem:[%s9303_s3 + $0x128] ss:$16 sps:$4 sm:$0xff]  }
 0x5d0   :  { %3611 = vmatprep.subr.bf16.mxu1 %v5926_v63  ;;  %v5958_v63 = vld [vmem:[%s9303_s3 + $0x14c] ss:$16 sps:$4 sm:$0xff]  }
 0x5d3   :  { %3612 = vmatpush1.bf16.msra.mxu1 %v5927_v4  ;;  %v5959_v4 = vld [vmem:[%s9303_s3 + $0x148] ss:$16 sps:$4 sm:$0xff]  }
 0x5d4   :  { %3613 = vmatprep.subr.bf16.mxu1 %v5928_v54  ;;  %v5960_v54 = vld [vmem:[%s9303_s3 + $0x16c] ss:$16 sps:$4 sm:$0xff]  }
 0x5d7   :  { %3614 = vmatpush1.bf16.msra.mxu1 %v5929_v56  ;;  %v5961_v56 = vld [vmem:[%s9303_s3 + $0x168] ss:$16 sps:$4 sm:$0xff]  }
 0x5d8   :  { %3615 = vmatprep.subr.bf16.mxu1 %v5930_v58  ;;  %v5962_v58 = vld [vmem:[%s9303_s3 + $0x18c] ss:$16 sps:$4 sm:$0xff]  }
 0x5db   :  { %3616 = vmatpush1.bf16.msra.mxu1 %v5931_v59  ;;  %v5963_v59 = vld [vmem:[%s9303_s3 + $0x188] ss:$16 sps:$4 sm:$0xff]  }
 0x5dc   :  { %3617 = vmatprep.subr.bf16.mxu1 %v5932_v60  ;;  %v5964_v60 = vld [vmem:[%s9303_s3 + $0x1ac] ss:$16 sps:$4 sm:$0xff]  }
 0x5df   :  { %3618 = vmatpush1.bf16.msra.mxu1 %v5933_v0  ;;  %v5965_v0 = vld [vmem:[%s9303_s3 + $0x1a8] ss:$16 sps:$4 sm:$0xff]  }
 0x5e0   :  { %3619 = vmatprep.subr.bf16.mxu1 %v5934_v2  ;;  %v5966_v2 = vld [vmem:[%s9303_s3 + $0x1cc] ss:$16 sps:$4 sm:$0xff]  }
 0x5e3   :  { %3620 = vmatpush1.bf16.msra.mxu1 %v5935_v5  ;;  %v5967_v5 = vld [vmem:[%s9303_s3 + $0x1c8] ss:$16 sps:$4 sm:$0xff]  }
 0x5e4   :  { %3621 = vmatprep.subr.bf16.mxu1 %v5936_v6  ;;  %v5968_v6 = vld [vmem:[%s9303_s3 + $0x1ec] ss:$16 sps:$4 sm:$0xff]  }
 0x5e7   :  { %3622 = vmatpush1.bf16.msra.mxu1 %v5937_v46  ;;  %v5969_v46 = vld [vmem:[%s9303_s3 + $0x1e8] ss:$16 sps:$4 sm:$0xff]  }
 0x5e8   :  { %3816 = vmatprep.subr.bf16.mxu1 %v5938_v7 }
 0x5ea   :  { %3624 = vmatmul.mubr.bf16.vlgmr.msra.gmra.mrb[16].mxu1 %v7923_v20 }
 0x5eb   :  { %3817 = vmatpush1.bf16.msra.mxu1 %v5939_v11  ;;  %v5970_v11 = vld [vmem:[%s9303_s3 + $0x20c] ss:$16 sps:$4 sm:$0xff]  }
 0x5ec   :  { %v8054_v12 = vpop.permute.xlu0 %3504  ;;  %3818 = vmatprep.subr.bf16.mxu1 %v5940_v14  ;;  %v5971_v14 = vld [vmem:[%s9303_s3 + $0x208] ss:$16 sps:$4 sm:$0xff]  }
 0x5ee   :  { %v3507_v16 = vpop.permute.xlu1 %3506 }
 0x5ef   :  { %v3520_v34 = vsel %vm9334_vm15, %v8054_v12, %v3507_v16  ;;  %3819 = vmatpush1.bf16.msra.mxu1 %v5941_v44  ;;  %vm9336_vm15 = vmmov %vm9333_vm3 }
 0x5f0   :  { %v8064_v19 = vpop.permute.xlu0 %3508  ;;  %3820 = vmatprep.subr.bf16.mxu1 %v5942_v24 }
 0x5f1   :  { %v3521_v20 = vsel %vm9335_vm1, %v3507_v16, %v8064_v19  ;;  %vm9337_vm1 = vmmov %vm9333_vm3 }
 0x5f2   :  { %v3531_v10 = vcombine.low %v3520_v34, %v3521_v20  ;;  %v3468_v13 = vpop.permute.xlu1 %3467  ;;  %v5972_v34 = vld [vmem:[%s9303_s3 + $0x22c] ss:$16 sps:$4 sm:$0xff]  }
 0x5f3   :  { %3821 = vmatpush1.bf16.msra.mxu1 %v5943_v25  ;;  %v3477_v61 = vsel %vm9333_vm3, %v7743_v9, %v3468_v13  ;;  %v5946_v9 = vld [vmem:[%s9303_s3 + $0x8c] ss:$16 sps:$4 sm:$0xff]   ;;  %vm9338_vm3 = vmmov %vm9337_vm1 }
 0x5f4   :  { %v8075_v45 = vmax.f32 %v7755_v18, %v3531_v10  ;;  %v3470_v27 = vpop.permute.xlu0 %3469  ;;  %3822 = vmatprep.subr.bf16.mxu1 %v5944_v28  ;;  %v5945_v18 = vld [vmem:[%s9303_s3 + $0x68] ss:$16 sps:$4 sm:$0xff]   ;;  %v5974_v28 = vld [vmem:[%s9303_s3 + $0x24c] ss:$16 sps:$4 sm:$0xff]  }
 0x5f5   :  { %v3478_v29 = vsel %vm9336_vm15, %v3468_v13, %v3470_v27  ;;  %vm9339_vm15 = vcmask 785408  }
 0x5f6   :  { %v3486_v33 = vcombine.low %v3477_v61, %v3478_v29  ;;  %v8083_v51 = vpop.permute.xlu1 %3510  ;;  %v3636_v35 = vcombine.high %v8075_v45, %v8075_v45  ;;  %v8186_v7 = vpack.c.bf16 %v8075_v45, %v8075_v45  ;;  %v5973_v45 = vld [vmem:[%s9303_s3 + $0x228] ss:$16 sps:$4 sm:$0xff]  }
 0x5f7   :  { %3823 = vmatpush1.bf16.msra.mxu1 %v5945_v18  ;;  %v5848_v29 = vld [vmem:[%s9308_s4 + $0x100] ss:$8 sps:$4 sm:$0xff]  }
 0x5f8   :  { %v8091_v21 = vmax.f32 %v7614_v17, %v3486_v33  ;;  %3824 = vmatprep.subr.bf16.mxu1 %v5946_v9  ;;  %v8096_v1 = vpack.c.bf16 %v3636_v35, %v3636_v35  ;;  %v5947_v17 = vld [vmem:[%s9303_s3 + $0x88] ss:$16 sps:$4 sm:$0xff]   ;;  %v5853_v35 = vld [vmem:[%s9308_s4 + $0x114] ss:$8 sps:$4 sm:$0xff]  }
 0x5f9   :  { %v5975_v18 = vld [vmem:[%s9303_s3 + $0x248] ss:$16 sps:$4 sm:$0xff]   ;;  %v5976_v9 = vld [vmem:[%s9303_s3 + $0x26c] ss:$16 sps:$4 sm:$0xff]  }
 0x5fa   :  { %v3472_v8 = vpop.permute.xlu1 %3471  ;;  %3512 = vrot.lane.b32.xlu0 %v8091_v21, %s6245_s11  ;;  %3848 = vmatprep.mubr.bf16.mxu1 %v8096_v1  ;;  %v3502_v42 = vcombine.high %v8091_v21, %v8091_v21 }
 0x5fb   :  { %v3479_v23 = vsel %vm9337_vm1, %v3470_v27, %v3472_v8  ;;  %v3482_v39 = vsel %vm9338_vm3, %v3472_v8, %v7711_v62  ;;  %3825 = vmatpush1.bf16.msra.mxu1 %v5947_v17  ;;  %v5949_v62 = vld [vmem:[%s9303_s3 + $0xa8] ss:$16 sps:$4 sm:$0xff]   ;;  %v5978_v17 = vld [vmem:[%s9303_s3 + $0x28c] ss:$16 sps:$4 sm:$0xff]   ;;  %vm9340_vm1 = vmmov %vm9339_vm15 }
 0x5fc   :  { %v3487_v40 = vcombine.low %v3479_v23, %v3482_v39  ;;  %3826 = vmatprep.subr.bf16.mxu1 %v5948_v37  ;;  %v5851_v8 = vld [vmem:[%s9308_s4 + $0x110] ss:$8 sps:$4 sm:$0xff]   ;;  %v5856_v23 = vld [vmem:[%s9308_s4 + $0x124] ss:$8 sps:$4 sm:$0xff]   ;;  %vm9341_vm3 = vmmov %vm9340_vm1 }
 0x5fd   :  { %v5977_v39 = vld [vmem:[%s9303_s3 + $0x268] ss:$16 sps:$4 sm:$0xff]  }
 0x5fe   :  { %3514 = vrot.lane.b32.xlu0 %v3502_v42, %s6245_s11  ;;  %v8114_v22 = vmax.f32 %v7788_v15, %v3487_v40  ;;  %v5951_v15 = vld [vmem:[%s9303_s3 + $0xc8] ss:$16 sps:$4 sm:$0xff]   ;;  %v5859_v42 = vld [vmem:[%s9308_s4 + $0x134] ss:$8 sps:$4 sm:$0xff]  }
 0x5ff   :  { %3827 = vmatpush1.bf16.msra.mxu1 %v5949_v62  ;;  %v5854_v40 = vld [vmem:[%s9308_s4 + $0x120] ss:$8 sps:$4 sm:$0xff]   ;;  %v5980_v62 = vld [vmem:[%s9303_s3 + $0x2ac] ss:$16 sps:$4 sm:$0xff]  }
 0x600   :  { %3516 = vrot.lane.b32.xlu1 %v8114_v22, %s6245_s11  ;;  %v3503_v26 = vcombine.high %v8114_v22, %v8114_v22  ;;  %3828 = vmatprep.subr.bf16.mxu1 %v5950_v47  ;;  %v5979_v37 = vld [vmem:[%s9303_s3 + $0x288] ss:$16 sps:$4 sm:$0xff]  }
 0x601   :  { %v5857_v47 = vld [vmem:[%s9308_s4 + $0x130] ss:$8 sps:$4 sm:$0xff]  }
 0x602   :  { %3518 = vrot.lane.b32.xlu0 %v3503_v26, %s6245_s11 }
 0x603   :  { %3829 = vmatpush1.bf16.msra.mxu1 %v5951_v15 }
 0x604   :  { %3830 = vmatprep.subr.bf16.mxu1 %v5952_v48  ;;  %v5862_v48 = vld [vmem:[%s9308_s4 + $0x144] ss:$8 sps:$4 sm:$0xff]  }
 0x607   :  { %3831 = vmatpush1.bf16.msra.mxu1 %v5953_v30  ;;  %v5981_v30 = vld [vmem:[%s9303_s3 + $0x2a8] ss:$16 sps:$4 sm:$0xff]  }
 0x608   :  { %3832 = vmatprep.subr.bf16.mxu1 %v5954_v38 }
 0x60b   :  { %3833 = vmatpush1.bf16.msra.mxu1 %v5955_v49 }
 0x60c   :  { %3834 = vmatprep.subr.bf16.mxu1 %v5956_v50  ;;  %v5982_v50 = vld [vmem:[%s9303_s3 + $0x2cc] ss:$16 sps:$4 sm:$0xff]  }
 0x60f   :  { %3835 = vmatpush1.bf16.msra.mxu1 %v5957_v52  ;;  %v5860_v52 = vld [vmem:[%s9308_s4 + $0x140] ss:$8 sps:$4 sm:$0xff]  }
 0x610   :  { %3836 = vmatprep.subr.bf16.mxu1 %v5958_v63  ;;  %v5865_v63 = vld [vmem:[%s9308_s4 + $0x154] ss:$8 sps:$4 sm:$0xff]  }
 0x613   :  { %3837 = vmatpush1.bf16.msra.mxu1 %v5959_v4  ;;  %v5983_v4 = vld [vmem:[%s9303_s3 + $0x2c8] ss:$16 sps:$4 sm:$0xff]  }
 0x614   :  { %3838 = vmatprep.subr.bf16.mxu1 %v5960_v54  ;;  %v5984_v54 = vld [vmem:[%s9303_s3 + $0x2ec] ss:$16 sps:$4 sm:$0xff]  }
 0x617   :  { %3839 = vmatpush1.bf16.msra.mxu1 %v5961_v56  ;;  %v5863_v56 = vld [vmem:[%s9308_s4 + $0x150] ss:$8 sps:$4 sm:$0xff]  }
 0x618   :  { %3840 = vmatprep.subr.bf16.mxu1 %v5962_v58  ;;  %v5868_v58 = vld [vmem:[%s9308_s4 + $0x164] ss:$8 sps:$4 sm:$0xff]  }
 0x61b   :  { %3841 = vmatpush1.bf16.msra.mxu1 %v5963_v59  ;;  %v5985_v59 = vld [vmem:[%s9303_s3 + $0x2e8] ss:$16 sps:$4 sm:$0xff]  }
 0x61c   :  { %3842 = vmatprep.subr.bf16.mxu1 %v5964_v60  ;;  %v5986_v60 = vld [vmem:[%s9303_s3 + $0x30c] ss:$16 sps:$4 sm:$0xff]  }
 0x61f   :  { %3843 = vmatpush1.bf16.msra.mxu1 %v5965_v0  ;;  %v5866_v0 = vld [vmem:[%s9308_s4 + $0x160] ss:$8 sps:$4 sm:$0xff]  }
 0x620   :  { %3844 = vmatprep.subr.bf16.mxu1 %v5966_v2 }
 0x623   :  { %3845 = vmatpush1.bf16.msra.mxu1 %v5967_v5  ;;  %v5871_v5 = vld [vmem:[%s9308_s4 + $0x174] ss:$8 sps:$4 sm:$0xff]  }
 0x624   :  { %3846 = vmatprep.subr.bf16.mxu1 %v5968_v6  ;;  %v5987_v6 = vld [vmem:[%s9303_s3 + $0x308] ss:$16 sps:$4 sm:$0xff]  }
 0x627   :  { %3847 = vmatpush1.bf16.msra.mxu1 %v5969_v46  ;;  %v5988_v46 = vld [vmem:[%s9303_s3 + $0x32c] ss:$16 sps:$4 sm:$0xff]  }
 0x628   :  { %3857 = vmatprep.subr.bf16.mxu1 %v5970_v11  ;;  %v5869_v11 = vld [vmem:[%s9308_s4 + $0x170] ss:$8 sps:$4 sm:$0xff]  }
 0x62a   :  { %3849 = vmatmul.mubr.bf16.vlgmr.msra.gmra.mrb[20].mxu1 %v8186_v7 }
 0x62b   :  { %3858 = vmatpush1.bf16.msra.mxu1 %v5971_v14 }
 0x62c   :  { %v3067_v16 = vpop.f32.mrb[16].mxu0  ;;  %3859 = vmatprep.subr.bf16.mxu1 %v5972_v34  ;;  %v5990_v34 = vld [vmem:[%s9303_s3 + $0x34c] ss:$16 sps:$4 sm:$0xff]  }
 0x62d   :  { %v3068_v44 = vadd.f32 %v3067_v16, %v7723_v55  ;;  %v3069_v24 = vpop.f32.mrb[17].mxu0  ;;  %v5989_v16 = vld [vmem:[%s9303_s3 + $0x328] ss:$16 sps:$4 sm:$0xff]  }
 0x62e   :  { %v3070_v20 = vadd.f32 %v3069_v24, %v7723_v55  ;;  %v3071_v10 = vpop.f32.mrb[18].mxu0  ;;  %v5991_v24 = vld [vmem:[%s9303_s3 + $0x4] ss:$16 sps:$4 sm:$0xff]  }
 0x62f   :  { %v3114_v13 = vmax.f32 %v3068_v44, 0.0  ;;  %v3072_v25 = vpop.f32.mrb[19].mxu0  ;;  %3860 = vmatpush1.bf16.msra.mxu1 %v5973_v45  ;;  %v5993_v10 = vld [vmem:[%s9303_s3 + $0x36c] ss:$16 sps:$4 sm:$0xff]   ;;  %v5996_v45 = vld [vmem:[%s9303_s3 + $0x368] ss:$16 sps:$4 sm:$0xff]  }
 0x630   :  { %v3115_v27 = vmax.f32 %v3070_v20, 0.0  ;;  %3861 = vmatprep.subr.bf16.mxu1 %v5974_v28  ;;  %v5992_v20 = vld [vmem:[%s9303_s3 + $0x348] ss:$16 sps:$4 sm:$0xff]   ;;  %v5995_v25 = vld [vmem:[%s9303_s3 + $0x24] ss:$16 sps:$4 sm:$0xff]  }
 0x631   :  { %v3117_v33 = vpack.c.bf16 %v3114_v13, %v3114_v13  ;;  %v5994_v13 = vld [vmem:[%s9303_s3] ss:$16 sps:$4 sm:$0xff]  }
 0x632   :  { %v3118_v61 = vpack.c.bf16 %v3115_v27, %v3115_v27  ;;  %v5997_v27 = vld [vmem:[%s9303_s3 + $0x38c] ss:$16 sps:$4 sm:$0xff]   ;;  %v5998_v28 = vld [vmem:[%s9303_s3 + $0x20] ss:$16 sps:$4 sm:$0xff]  }
 0x633   :  { %3862 = vmatpush1.bf16.msra.mxu1 %v5975_v18  ;;  %v6004_v18 = vld [vmem:[%s9303_s3 + $0x3a8] ss:$16 sps:$4 sm:$0xff]  }
 0x634   :  { %3392 = vmatprep.mubr.bf16.mxu0 %v3118_v61  ;;  %3863 = vmatprep.subr.bf16.mxu1 %v5976_v9  ;;  %v6000_v61 = vld [vmem:[%s9303_s3 + $0x388] ss:$16 sps:$4 sm:$0xff]   ;;  %v6005_v9 = vld [vmem:[%s9303_s3 + $0x3cc] ss:$16 sps:$4 sm:$0xff]  }
 0x635   :  { %3393 = vmatmul.mubr.bf16.vlgmr.msra.gmra.mrb[20].mxu0 %v3117_v33  ;;  %v6002_v33 = vld [vmem:[%s9303_s3 + $0x40] ss:$16 sps:$4 sm:$0xff]  }
 0x636   :  { %3402 = vmatpush1.bf16.msra.mxu0 %v5848_v29  ;;  %3433 = vmatprep.mubr.bf16.mxu0 %v6253_v3  ;;  %v6001_v29 = vld [vmem:[%s9303_s3 + $0x3ac] ss:$16 sps:$4 sm:$0xff]  }
 0x637   :  { %3403 = vmatprep.subr.bf16.mxu0 %v5853_v35  ;;  %3864 = vmatpush1.bf16.msra.mxu1 %v5977_v39  ;;  %v6003_v35 = vld [vmem:[%s9303_s3 + $0x64] ss:$16 sps:$4 sm:$0xff]   ;;  %v6008_v39 = vld [vmem:[%s9303_s3 + $0x3c8] ss:$16 sps:$4 sm:$0xff]  }
 0x638   :  { %3865 = vmatprep.subr.bf16.mxu1 %v5978_v17  ;;  %v6009_v17 = vld [vmem:[%s9303_s3 + $0x3ec] ss:$16 sps:$4 sm:$0xff]  }
 0x63a   :  { %3404 = vmatpush1.bf16.msra.mxu0 %v5851_v8  ;;  %v6006_v8 = vld [vmem:[%s9303_s3 + $0x60] ss:$16 sps:$4 sm:$0xff]  }
 0x63b   :  { %3405 = vmatprep.subr.bf16.mxu0 %v5856_v23  ;;  %3866 = vmatpush1.bf16.msra.mxu1 %v5979_v37  ;;  %v6007_v23 = vld [vmem:[%s9303_s3 + $0x84] ss:$16 sps:$4 sm:$0xff]   ;;  %v6012_v37 = vld [vmem:[%s9303_s3 + $0x3e8] ss:$16 sps:$4 sm:$0xff]  }
 0x63c   :  { %3867 = vmatprep.subr.bf16.mxu1 %v5980_v62  ;;  %v6013_v62 = vld [vmem:[%s9303_s3 + $0x40c] ss:$16 sps:$4 sm:$0xff]  }
 0x63d   :  { %v3108_v26 = vpop.f32.mrb[8].mxu1 }
 0x63e   :  { %3406 = vmatpush1.bf16.msra.mxu0 %v5854_v40  ;;  %v4999_v15 = vpop.f32.mrb[9].mxu1  ;;  %v3109_v2 = vadd.f32 %v3108_v26, %v7723_v55  ;;  %v6010_v40 = vld [vmem:[%s9303_s3 + $0x80] ss:$16 sps:$4 sm:$0xff]  }
 0x63f   :  { %3407 = vmatprep.subr.bf16.mxu0 %v5859_v42  ;;  %3868 = vmatpush1.bf16.msra.mxu1 %v5981_v30  ;;  %v3111_v38 = vpop.f32.mrb[10].mxu1  ;;  %v6011_v42 = vld [vmem:[%s9303_s3 + $0xa4] ss:$16 sps:$4 sm:$0xff]   ;;  %v6014_v26 = vld [vmem:[%s9303_s3 + $0xa0] ss:$16 sps:$4 sm:$0xff]  }
 0x640   :  { %v5000_v49 = vpop.f32.mrb[11].mxu1  ;;  %3869 = vmatprep.subr.bf16.mxu1 %v5982_v50  ;;  %v3116_v14 = vmax.f32 %v3109_v2, 0.0  ;;  %v6017_v50 = vld [vmem:[%s9303_s3 + $0xe4] ss:$16 sps:$4 sm:$0xff]   ;;  %v6020_v2 = vld [vmem:[%s9303_s3 + $0x100] ss:$16 sps:$4 sm:$0xff]  }
 0x641   :  { %v6016_v49 = vld [vmem:[%s9303_s3 + $0xc0] ss:$16 sps:$4 sm:$0xff]  }
 0x642   :  { %3408 = vmatpush1.bf16.msra.mxu0 %v5857_v47  ;;  %v3119_v44 = vpack.c.bf16 %v3116_v14, %v3116_v14  ;;  %v6015_v47 = vld [vmem:[%s9303_s3 + $0xc4] ss:$16 sps:$4 sm:$0xff]  }
 0x643   :  { %3409 = vmatprep.subr.bf16.mxu0 %v5862_v48  ;;  %3870 = vmatpush1.bf16.msra.mxu1 %v5983_v4  ;;  %v3522_v48 = vsel %vm9339_vm15, %v8064_v19, %v8083_v51  ;;  %v6018_v19 = vld [vmem:[%s9303_s3 + $0xe0] ss:$16 sps:$4 sm:$0xff]   ;;  %vm9342_vm15 = vmmov %vm9340_vm1 }
 0x644   :  { %3871 = vmatprep.subr.bf16.mxu1 %v5984_v54 }
 0x646   :  { %3410 = vmatpush1.bf16.msra.mxu0 %v5860_v52 }
 0x647   :  { %3411 = vmatprep.subr.bf16.mxu0 %v5865_v63  ;;  %3872 = vmatpush1.bf16.msra.mxu1 %v5985_v59 }
 0x648   :  { %3873 = vmatprep.subr.bf16.mxu1 %v5986_v60 }
 0x64a   :  { %3412 = vmatpush1.bf16.msra.mxu0 %v5863_v56 }
 0x64b   :  { %3413 = vmatprep.subr.bf16.mxu0 %v5868_v58  ;;  %3874 = vmatpush1.bf16.msra.mxu1 %v5987_v6  ;;  %v6019_v58 = vld [vmem:[%s9303_s3 + $0x104] ss:$16 sps:$4 sm:$0xff]   ;;  %v6022_v6 = vld [vmem:[%s9303_s3 + $0x408] ss:$16 sps:$4 sm:$0xff]  }
 0x64c   :  { %3875 = vmatprep.subr.bf16.mxu1 %v5988_v46  ;;  %v6023_v46 = vld [vmem:[%s9303_s3 + $0x42c] ss:$16 sps:$4 sm:$0xff]  }
 0x64e   :  { %3414 = vmatpush1.bf16.msra.mxu0 %v5866_v0 }
 0x64f   :  { %3415 = vmatprep.subr.bf16.mxu0 %v5871_v5  ;;  %3876 = vmatpush1.bf16.msra.mxu1 %v5989_v16  ;;  %v6021_v5 = vld [vmem:[%s9303_s3 + $0x124] ss:$16 sps:$4 sm:$0xff]  }
 0x650   :  { %3877 = vmatprep.subr.bf16.mxu1 %v5990_v34  ;;  %v6025_v16 = vld [vmem:[%s9303_s3 + $0x144] ss:$16 sps:$4 sm:$0xff]   ;;  %v6026_v34 = vld [vmem:[%s9303_s3 + $0x428] ss:$16 sps:$4 sm:$0xff]  }
 0x652   :  { %3416 = vmatpush1.bf16.msra.mxu0 %v5869_v11  ;;  %v6024_v11 = vld [vmem:[%s9303_s3 + $0x120] ss:$16 sps:$4 sm:$0xff]  }
 0x653   :  { %3652 = vmatprep.subr.bf16.mxu0 %v5991_v24  ;;  %3878 = vmatpush1.bf16.msra.mxu1 %v5992_v20  ;;  %v6028_v20 = vld [vmem:[%s9303_s3 + $0x140] ss:$16 sps:$4 sm:$0xff]  }
 0x654   :  { %3879 = vmatprep.subr.bf16.mxu1 %v5993_v10 }
 0x655   :  { %3434 = vmatmul.mubr.bf16.vlgmr.msra.gmra.mrb[20].mxu0 %v3119_v44  ;;  %v6027_v44 = vld [vmem:[%s9303_s3 + $0x44c] ss:$16 sps:$4 sm:$0xff]  }
 0x656   :  { %3653 = vmatpush1.bf16.msra.mxu0 %v5994_v13  ;;  %3684 = vmatprep.mubr.bf16.mxu0 %v8096_v1  ;;  %v5999_v1 = vld [vmem:[%s9303_s3 + $0x44] ss:$16 sps:$4 sm:$0xff]  }
 0x657   :  { %3654 = vmatprep.subr.bf16.mxu0 %v5995_v25  ;;  %3880 = vmatpush1.bf16.msra.mxu1 %v5996_v45  ;;  %v6029_v13 = vld [vmem:[%s9303_s3 + $0x164] ss:$16 sps:$4 sm:$0xff]   ;;  %v6030_v45 = vld [vmem:[%s9303_s3 + $0x448] ss:$16 sps:$4 sm:$0xff]  }
 0x658   :  { %3881 = vmatprep.subr.bf16.mxu1 %v5997_v27 }
 0x65a   :  { %3655 = vmatpush1.bf16.msra.mxu0 %v5998_v28  ;;  %v6031_v28 = vld [vmem:[%s9303_s3 + $0x46c] ss:$16 sps:$4 sm:$0xff]  }
 0x65b   :  { %3656 = vmatprep.subr.bf16.mxu0 %v5999_v1  ;;  %3882 = vmatpush1.bf16.msra.mxu1 %v6000_v61  ;;  %v6032_v1 = vld [vmem:[%s9303_s3 + $0x160] ss:$16 sps:$4 sm:$0xff]   ;;  %v6033_v61 = vld [vmem:[%s9303_s3 + $0x184] ss:$16 sps:$4 sm:$0xff]  }
 0x65c   :  { %3883 = vmatprep.subr.bf16.mxu1 %v6001_v29  ;;  %v6034_v29 = vld [vmem:[%s9303_s3 + $0x468] ss:$16 sps:$4 sm:$0xff]  }
 0x65e   :  { %3657 = vmatpush1.bf16.msra.mxu0 %v6002_v33  ;;  %v6035_v33 = vld [vmem:[%s9303_s3 + $0x48c] ss:$16 sps:$4 sm:$0xff]  }
 0x65f   :  { %3658 = vmatprep.subr.bf16.mxu0 %v6003_v35  ;;  %3884 = vmatpush1.bf16.msra.mxu1 %v6004_v18  ;;  %v6036_v35 = vld [vmem:[%s9303_s3 + $0x180] ss:$16 sps:$4 sm:$0xff]   ;;  %v6037_v18 = vld [vmem:[%s9303_s3 + $0x1a4] ss:$16 sps:$4 sm:$0xff]  }
 0x660   :  { %3885 = vmatprep.subr.bf16.mxu1 %v6005_v9  ;;  %v6038_v9 = vld [vmem:[%s9303_s3 + $0x488] ss:$16 sps:$4 sm:$0xff]  }
 0x662   :  { %3659 = vmatpush1.bf16.msra.mxu0 %v6006_v8  ;;  %v6039_v8 = vld [vmem:[%s9303_s3 + $0x4ac] ss:$16 sps:$4 sm:$0xff]  }
 0x663   :  { %3660 = vmatprep.subr.bf16.mxu0 %v6007_v23  ;;  %3886 = vmatpush1.bf16.msra.mxu1 %v6008_v39  ;;  %v6040_v23 = vld [vmem:[%s9303_s3 + $0x1a0] ss:$16 sps:$4 sm:$0xff]   ;;  %v6041_v39 = vld [vmem:[%s9303_s3 + $0x1c4] ss:$16 sps:$4 sm:$0xff]  }
 0x664   :  { %3887 = vmatprep.subr.bf16.mxu1 %v6009_v17  ;;  %v6042_v17 = vld [vmem:[%s9303_s3 + $0x4a8] ss:$16 sps:$4 sm:$0xff]  }
 0x666   :  { %3661 = vmatpush1.bf16.msra.mxu0 %v6010_v40  ;;  %v6043_v40 = vld [vmem:[%s9303_s3 + $0x4cc] ss:$16 sps:$4 sm:$0xff]  }
 0x667   :  { %3662 = vmatprep.subr.bf16.mxu0 %v6011_v42  ;;  %3888 = vmatpush1.bf16.msra.mxu1 %v6012_v37  ;;  %v6044_v42 = vld [vmem:[%s9303_s3 + $0x1c0] ss:$16 sps:$4 sm:$0xff]   ;;  %v6045_v37 = vld [vmem:[%s9303_s3 + $0x1e4] ss:$16 sps:$4 sm:$0xff]  }
 0x668   :  { %3898 = vmatprep.subr.bf16.mxu1 %v6013_v62  ;;  %v6046_v62 = vld [vmem:[%s9303_s3 + $0x4c8] ss:$16 sps:$4 sm:$0xff]  }
 0x66a   :  { %3663 = vmatpush1.bf16.msra.mxu0 %v6014_v26  ;;  %v6047_v26 = vld [vmem:[%s9303_s3 + $0x4ec] ss:$16 sps:$4 sm:$0xff]  }
 0x66b   :  { %3664 = vmatprep.subr.bf16.mxu0 %v6015_v47  ;;  %v6048_v47 = vld [vmem:[%s9303_s3 + $0x1e0] ss:$16 sps:$4 sm:$0xff]  }
 0x66c   :  { %v3513_v15 = vpop.permute.xlu0 %3512 }
 0x66d   :  { %v3523_v30 = vsel %vm9340_vm1, %v8083_v51, %v3513_v15 }
 0x66e   :  { %v3532_v38 = vcombine.low %v3522_v48, %v3523_v30  ;;  %3665 = vmatpush1.bf16.msra.mxu0 %v6016_v49  ;;  %v6050_v48 = vld [vmem:[%s9303_s3 + $0x4e8] ss:$16 sps:$4 sm:$0xff]   ;;  %v6051_v30 = vld [vmem:[%s9303_s3 + $0x50c] ss:$16 sps:$4 sm:$0xff]   ;;  %v6053_v49 = vld [vmem:[%s9303_s3 + $0x224] ss:$16 sps:$4 sm:$0xff]  }
 0x66f   :  { %3666 = vmatprep.subr.bf16.mxu0 %v6017_v50  ;;  %v6055_v50 = vld [vmem:[%s9303_s3 + $0x52c] ss:$16 sps:$4 sm:$0xff]  }
 0x670   :  { %v3540_v52 = vmax.f32 %v7772_v32, %v3532_v38  ;;  %v3515_v63 = vpop.permute.xlu0 %3514  ;;  %v6052_v38 = vld [vmem:[%s9303_s3 + $0x200] ss:$16 sps:$4 sm:$0xff]  }
 0x671   :  { %v3524_v54 = vsel %vm9341_vm3, %v3513_v15, %v3515_v63  ;;  %v6049_v15 = vld [vmem:[%s9303_s3 + $0x204] ss:$16 sps:$4 sm:$0xff]   ;;  %vm9343_vm3 = vmmov %vm9340_vm1 }
 0x672   :  { %3667 = vmatpush1.bf16.msra.mxu0 %v6018_v19  ;;  %v8392_v51 = vpop.permute.xlu1 %3516  ;;  %v3637_v4 = vcombine.high %v3540_v52, %v3540_v52  ;;  %v8402_v60 = vpack.c.bf16 %v3540_v52, %v3540_v52  ;;  %v6056_v52 = vld [vmem:[%s9303_s3 + $0x220] ss:$16 sps:$4 sm:$0xff]   ;;  %v6058_v19 = vld [vmem:[%s9303_s3 + $0x528] ss:$16 sps:$4 sm:$0xff]  }
 0x673   :  { %v3525_v56 = vsel %vm9342_vm15, %v3515_v63, %v8392_v51  ;;  %3668 = vmatprep.subr.bf16.mxu0 %v6019_v58  ;;  %v6057_v63 = vld [vmem:[%s9303_s3 + $0x244] ss:$16 sps:$4 sm:$0xff]   ;;  %v6062_v58 = vld [vmem:[%s9303_s3 + $0x548] ss:$16 sps:$4 sm:$0xff]   ;;  %vm9344_vm15 = vcmask 1043456  }
 0x674   :  { %v3533_v32 = vcombine.low %v3524_v54, %v3525_v56  ;;  %v8400_v59 = vpack.c.bf16 %v3637_v4, %v3637_v4  ;;  %v6059_v4 = vld [vmem:[%s9303_s3 + $0x54c] ss:$16 sps:$4 sm:$0xff]   ;;  %v6060_v54 = vld [vmem:[%s9303_s3 + $0x240] ss:$16 sps:$4 sm:$0xff]   ;;  %v6061_v56 = vld [vmem:[%s9303_s3 + $0x264] ss:$16 sps:$4 sm:$0xff]  }
 0x676   :  { %v8405_v0 = vmax.f32 %v8091_v21, %v3533_v32  ;;  %3669 = vmatpush1.bf16.msra.mxu0 %v6020_v2  ;;  %3889 = vmatprep.mubr.bf16.mxu1 %v8400_v59  ;;  %v6063_v32 = vld [vmem:[%s9303_s3 + $0x56c] ss:$16 sps:$4 sm:$0xff]   ;;  %v6065_v2 = vld [vmem:[%s9303_s3 + $0x284] ss:$16 sps:$4 sm:$0xff]  }
 0x677   :  { %3890 = vmatmul.mubr.bf16.vlgmr.msra.gmra.mrb[20].mxu1 %v8402_v60  ;;  %3670 = vmatprep.subr.bf16.mxu0 %v6021_v5  ;;  %v3519_v5 = vpop.permute.xlu0 %3518 }
 0x678   :  { %3899 = vmatpush1.bf16.msra.mxu1 %v6022_v6  ;;  %v3638_v21 = vcombine.high %v8405_v0, %v8405_v0  ;;  %v6066_v6 = vld [vmem:[%s9303_s3 + $0x568] ss:$16 sps:$4 sm:$0xff]  }
 0x679   :  { %3900 = vmatprep.subr.bf16.mxu1 %v6023_v46  ;;  %v6068_v46 = vld [vmem:[%s9303_s3 + $0x280] ss:$16 sps:$4 sm:$0xff]  }
 0x67a   :  { %3671 = vmatpush1.bf16.msra.mxu0 %v6024_v11  ;;  %v8426_v14 = vpack.c.bf16 %v3638_v21, %v3638_v21  ;;  %v6067_v21 = vld [vmem:[%s9303_s3 + $0x58c] ss:$16 sps:$4 sm:$0xff]   ;;  %v3526_v11 = vsel %vm9340_vm1, %v8392_v51, %v3519_v5  ;;  %v6073_v51 = vld [vmem:[%s9303_s3 + $0x2c4] ss:$16 sps:$4 sm:$0xff]   ;;  %vm9345_vm1 = vmmov %vm9344_vm15 }
 0x67b   :  { %3672 = vmatprep.subr.bf16.mxu0 %v6025_v16  ;;  %v3529_v16 = vsel %vm9343_vm3, %v3519_v5, %v8054_v12  ;;  %v6072_v12 = vld [vmem:[%s9303_s3 + $0x2a0] ss:$16 sps:$4 sm:$0xff]   ;;  %v6106_v5 = vld [vmem:[%s9303_s3 + $0x6a8] ss:$16 sps:$4 sm:$0xff]   ;;  %vm9346_vm3 = vmmov %vm9345_vm1 }
 0x67c   :  { %3901 = vmatpush1.bf16.msra.mxu1 %v6026_v34  ;;  %3930 = vmatprep.mubr.bf16.mxu1 %v8426_v14  ;;  %v6069_v34 = vld [vmem:[%s9303_s3 + $0x2a4] ss:$16 sps:$4 sm:$0xff]   ;;  %vm9347_vm0 = vmmov %vm9345_vm1 }
 0x67d   :  { %3902 = vmatprep.subr.bf16.mxu1 %v6027_v44  ;;  %v8438_v24 = vpop.f32.mrb[12].mxu1  ;;  %v6070_v44 = vld [vmem:[%s9303_s3 + $0x588] ss:$16 sps:$4 sm:$0xff]  }
 0x67e   :  { %3673 = vmatpush1.bf16.msra.mxu0 %v6028_v20  ;;  %v8443_v10 = vpop.f32.mrb[13].mxu1  ;;  %v6071_v20 = vld [vmem:[%s9303_s3 + $0x5ac] ss:$16 sps:$4 sm:$0xff]  }
 0x67f   :  { %3674 = vmatprep.subr.bf16.mxu0 %v6029_v13  ;;  %v3588_v25 = vpop.f32.mrb[14].mxu1  ;;  %v3534_v13 = vcombine.low %v3526_v11, %v3529_v16  ;;  %v6110_v11 = vld [vmem:[%s9303_s3 + $0x6c8] ss:$16 sps:$4 sm:$0xff]   ;;  %v6111_v16 = vld [vmem:[%s9303_s3 + $0x6ec] ss:$16 sps:$4 sm:$0xff]  }
 0x680   :  { %3903 = vmatpush1.bf16.msra.mxu1 %v6030_v45  ;;  %v3589_v27 = vpop.f32.mrb[15].mxu1  ;;  %v6074_v25 = vld [vmem:[%s9303_s3 + $0x5a8] ss:$16 sps:$4 sm:$0xff]   ;;  %v6075_v45 = vld [vmem:[%s9303_s3 + $0x5cc] ss:$16 sps:$4 sm:$0xff]  }
 0x681   :  { %3904 = vmatprep.subr.bf16.mxu1 %v6031_v28  ;;  %v8593_v27 = vmax.f32 %v8114_v22, %v3534_v13  ;;  %v6076_v28 = vld [vmem:[%s9303_s3 + $0x2c0] ss:$16 sps:$4 sm:$0xff]   ;;  %v6079_v22 = vld [vmem:[%s9303_s3 + $0x5ec] ss:$16 sps:$4 sm:$0xff]  }
 0x682   :  { %3675 = vmatpush1.bf16.msra.mxu0 %v6032_v1  ;;  %v6077_v1 = vld [vmem:[%s9303_s3 + $0x2e4] ss:$16 sps:$4 sm:$0xff]   ;;  %v6115_v13 = vld [vmem:[%s9303_s3 + $0x70c] ss:$16 sps:$4 sm:$0xff]  }
 0x683   :  { %3676 = vmatprep.subr.bf16.mxu0 %v6033_v61  ;;  %v6078_v61 = vld [vmem:[%s9303_s3 + $0x5c8] ss:$16 sps:$4 sm:$0xff]  }
 0x684   :  { %3905 = vmatpush1.bf16.msra.mxu1 %v6034_v29  ;;  %v6080_v29 = vld [vmem:[%s9303_s3 + $0x2e0] ss:$16 sps:$4 sm:$0xff]  }
 0x685   :  { %3906 = vmatprep.subr.bf16.mxu1 %v6035_v33  ;;  %v3639_v33 = vcombine.high %v8593_v27, %v8593_v27 }
 0x686   :  { %3677 = vmatpush1.bf16.msra.mxu0 %v6036_v35  ;;  %v6081_v35 = vld [vmem:[%s9303_s3 + $0x304] ss:$16 sps:$4 sm:$0xff]  }
 0x687   :  { %3678 = vmatprep.subr.bf16.mxu0 %v6037_v18  ;;  %v6082_v18 = vld [vmem:[%s9303_s3 + $0x5e8] ss:$16 sps:$4 sm:$0xff]  }
 0x688   :  { %3907 = vmatpush1.bf16.msra.mxu1 %v6038_v9  ;;  %v8620_v9 = vpack.c.bf16 %v8405_v0, %v8405_v0  ;;  %v6086_v0 = vld [vmem:[%s9303_s3 + $0x608] ss:$16 sps:$4 sm:$0xff]  }
 0x689   :  { %3908 = vmatprep.subr.bf16.mxu1 %v6039_v8  ;;  %v6083_v8 = vld [vmem:[%s9303_s3 + $0x60c] ss:$16 sps:$4 sm:$0xff]  }
 0x68a   :  { %3679 = vmatpush1.bf16.msra.mxu0 %v6040_v23  ;;  %v6084_v23 = vld [vmem:[%s9303_s3 + $0x300] ss:$16 sps:$4 sm:$0xff]  }
 0x68b   :  { %3680 = vmatprep.subr.bf16.mxu0 %v6041_v39  ;;  %v8628_v39 = vpack.c.bf16 %v3639_v33, %v3639_v33  ;;  %v6127_v33 = vld [vmem:[%s9303_s3 + $0x76c] ss:$16 sps:$4 sm:$0xff]  }
 0x68c   :  { %3909 = vmatpush1.bf16.msra.mxu1 %v6042_v17  ;;  %v6085_v17 = vld [vmem:[%s9303_s3 + $0x324] ss:$16 sps:$4 sm:$0xff]  }
 0x68d   :  { %3910 = vmatprep.subr.bf16.mxu1 %v6043_v40  ;;  %v6087_v40 = vld [vmem:[%s9303_s3 + $0x62c] ss:$16 sps:$4 sm:$0xff]  }
 0x68e   :  { %3681 = vmatpush1.bf16.msra.mxu0 %v6044_v42  ;;  %v6088_v42 = vld [vmem:[%s9303_s3 + $0x320] ss:$16 sps:$4 sm:$0xff]  }
 0x68f   :  { %3682 = vmatprep.subr.bf16.mxu0 %v6045_v37  ;;  %v6089_v37 = vld [vmem:[%s9303_s3 + $0x344] ss:$16 sps:$4 sm:$0xff]  }
 0x690   :  { %3911 = vmatpush1.bf16.msra.mxu1 %v6046_v62  ;;  %v6090_v62 = vld [vmem:[%s9303_s3 + $0x628] ss:$16 sps:$4 sm:$0xff]  }
 0x691   :  { %3912 = vmatprep.subr.bf16.mxu1 %v6047_v26  ;;  %v6091_v26 = vld [vmem:[%s9303_s3 + $0x64c] ss:$16 sps:$4 sm:$0xff]  }
 0x692   :  { %3683 = vmatpush1.bf16.msra.mxu0 %v6048_v47 }
 0x693   :  { %3693 = vmatprep.subr.bf16.mxu0 %v6049_v15  ;;  %v6092_v15 = vld [vmem:[%s9303_s3 + $0x340] ss:$16 sps:$4 sm:$0xff]  }
 0x694   :  { %3913 = vmatpush1.bf16.msra.mxu1 %v6050_v48 }
 0x695   :  { %3685 = vmatmul.mubr.bf16.vlgmr.msra.gmra.mrb[24].mxu0 %v8186_v7  ;;  %3914 = vmatprep.subr.bf16.mxu1 %v6051_v30  ;;  %v6054_v7 = vld [vmem:[%s9303_s3 + $0x508] ss:$16 sps:$4 sm:$0xff]   ;;  %v6093_v30 = vld [vmem:[%s9303_s3 + $0x364] ss:$16 sps:$4 sm:$0xff]  }
 0x696   :  { %3694 = vmatpush1.bf16.msra.mxu0 %v6052_v38  ;;  %3725 = vmatprep.mubr.bf16.mxu0 %v8400_v59  ;;  %v6064_v59 = vld [vmem:[%s9303_s3 + $0x260] ss:$16 sps:$4 sm:$0xff]  }
 0x697   :  { %3695 = vmatprep.subr.bf16.mxu0 %v6053_v49  ;;  %v6094_v49 = vld [vmem:[%s9303_s3 + $0x648] ss:$16 sps:$4 sm:$0xff]  }
 0x698   :  { %3915 = vmatpush1.bf16.msra.mxu1 %v6054_v7 }
 0x699   :  { %3916 = vmatprep.subr.bf16.mxu1 %v6055_v50  ;;  %v6095_v50 = vld [vmem:[%s9303_s3 + $0x66c] ss:$16 sps:$4 sm:$0xff]  }
 0x69a   :  { %3696 = vmatpush1.bf16.msra.mxu0 %v6056_v52  ;;  %v6096_v52 = vld [vmem:[%s9303_s3 + $0x360] ss:$16 sps:$4 sm:$0xff]  }
 0x69b   :  { %3697 = vmatprep.subr.bf16.mxu0 %v6057_v63  ;;  %v6097_v63 = vld [vmem:[%s9303_s3 + $0x384] ss:$16 sps:$4 sm:$0xff]  }
 0x69c   :  { %3917 = vmatpush1.bf16.msra.mxu1 %v6058_v19  ;;  %v6098_v19 = vld [vmem:[%s9303_s3 + $0x668] ss:$16 sps:$4 sm:$0xff]  }
 0x69d   :  { %3918 = vmatprep.subr.bf16.mxu1 %v6059_v4  ;;  %v6099_v4 = vld [vmem:[%s9303_s3 + $0x68c] ss:$16 sps:$4 sm:$0xff]  }
 0x69e   :  { %3698 = vmatpush1.bf16.msra.mxu0 %v6060_v54  ;;  %v6100_v54 = vld [vmem:[%s9303_s3 + $0x380] ss:$16 sps:$4 sm:$0xff]  }
 0x69f   :  { %3699 = vmatprep.subr.bf16.mxu0 %v6061_v56  ;;  %v6101_v56 = vld [vmem:[%s9303_s3 + $0x3a4] ss:$16 sps:$4 sm:$0xff]  }
 0x6a0   :  { %3919 = vmatpush1.bf16.msra.mxu1 %v6062_v58  ;;  %v6102_v58 = vld [vmem:[%s9303_s3 + $0x688] ss:$16 sps:$4 sm:$0xff]  }
 0x6a1   :  { %3920 = vmatprep.subr.bf16.mxu1 %v6063_v32  ;;  %v6103_v32 = vld [vmem:[%s9303_s3 + $0x6ac] ss:$16 sps:$4 sm:$0xff]  }
 0x6a2   :  { %3700 = vmatpush1.bf16.msra.mxu0 %v6064_v59  ;;  %v6104_v59 = vld [vmem:[%s9303_s3 + $0x3a0] ss:$16 sps:$4 sm:$0xff]  }
 0x6a3   :  { %3701 = vmatprep.subr.bf16.mxu0 %v6065_v2  ;;  %v6105_v2 = vld [vmem:[%s9303_s3 + $0x3c4] ss:$16 sps:$4 sm:$0xff]  }
 0x6a4   :  { %3921 = vmatpush1.bf16.msra.mxu1 %v6066_v6  ;;  %v6107_v6 = vld [vmem:[%s9303_s3 + $0x6cc] ss:$16 sps:$4 sm:$0xff]  }
 0x6a5   :  { %3922 = vmatprep.subr.bf16.mxu1 %v6067_v21  ;;  %v6108_v21 = vld [vmem:[%s9303_s3 + $0x3c0] ss:$16 sps:$4 sm:$0xff]  }
 0x6a6   :  { %3702 = vmatpush1.bf16.msra.mxu0 %v6068_v46  ;;  %v6109_v46 = vld [vmem:[%s9303_s3 + $0x3e4] ss:$16 sps:$4 sm:$0xff]  }
 0x6a7   :  { %3703 = vmatprep.subr.bf16.mxu0 %v6069_v34  ;;  %v6112_v34 = vld [vmem:[%s9303_s3 + $0x3e0] ss:$16 sps:$4 sm:$0xff]  }
 0x6a8   :  { %3923 = vmatpush1.bf16.msra.mxu1 %v6070_v44  ;;  %v6113_v44 = vld [vmem:[%s9303_s3 + $0x404] ss:$16 sps:$4 sm:$0xff]  }
 0x6a9   :  { %3924 = vmatprep.subr.bf16.mxu1 %v6071_v20  ;;  %v6114_v20 = vld [vmem:[%s9303_s3 + $0x6e8] ss:$16 sps:$4 sm:$0xff]  }
 0x6aa   :  { %3704 = vmatpush1.bf16.msra.mxu0 %v6072_v12  ;;  %v6116_v12 = vld [vmem:[%s9303_s3 + $0x400] ss:$16 sps:$4 sm:$0xff]  }
 0x6ab   :  { %3705 = vmatprep.subr.bf16.mxu0 %v6073_v51  ;;  %v6117_v51 = vld [vmem:[%s9303_s3 + $0x424] ss:$16 sps:$4 sm:$0xff]  }
 0x6ac   :  { %3925 = vmatpush1.bf16.msra.mxu1 %v6074_v25  ;;  %v6119_v25 = vld [vmem:[%s9303_s3 + $0x72c] ss:$16 sps:$4 sm:$0xff]  }
 0x6ad   :  { %3926 = vmatprep.subr.bf16.mxu1 %v6075_v45  ;;  %v6120_v45 = vld [vmem:[%s9303_s3 + $0x420] ss:$16 sps:$4 sm:$0xff]  }
 0x6ae   :  { %3706 = vmatpush1.bf16.msra.mxu0 %v6076_v28  ;;  %v6122_v28 = vld [vmem:[%s9303_s3 + $0x728] ss:$16 sps:$4 sm:$0xff]  }
 0x6af   :  { %3707 = vmatprep.subr.bf16.mxu0 %v6077_v1  ;;  %v6123_v1 = vld [vmem:[%s9303_s3 + $0x74c] ss:$16 sps:$4 sm:$0xff]  }
 0x6b0   :  { %3927 = vmatpush1.bf16.msra.mxu1 %v6078_v61  ;;  %v6124_v61 = vld [vmem:[%s9303_s3 + $0x440] ss:$16 sps:$4 sm:$0xff]  }
 0x6b1   :  { %3928 = vmatprep.subr.bf16.mxu1 %v6079_v22  ;;  %v6125_v22 = vld [vmem:[%s9303_s3 + $0x464] ss:$16 sps:$4 sm:$0xff]  }
 0x6b2   :  { %3708 = vmatpush1.bf16.msra.mxu0 %v6080_v29  ;;  %v6126_v29 = vld [vmem:[%s9303_s3 + $0x748] ss:$16 sps:$4 sm:$0xff]  }
 0x6b3   :  { %3709 = vmatprep.subr.bf16.mxu0 %v6081_v35  ;;  %v6128_v35 = vld [vmem:[%s9303_s3 + $0x460] ss:$16 sps:$4 sm:$0xff]  }
 0x6b4   :  { %3929 = vmatpush1.bf16.msra.mxu1 %v6082_v18  ;;  %v6129_v18 = vld [vmem:[%s9303_s3 + $0x484] ss:$16 sps:$4 sm:$0xff]  }
 0x6b5   :  { %3939 = vmatprep.subr.bf16.mxu1 %v6083_v8  ;;  %v6130_v8 = vld [vmem:[%s9303_s3 + $0x768] ss:$16 sps:$4 sm:$0xff]  }
 0x6b6   :  { %3710 = vmatpush1.bf16.msra.mxu0 %v6084_v23  ;;  %v6131_v23 = vld [vmem:[%s9303_s3 + $0x78c] ss:$16 sps:$4 sm:$0xff]  }
 0x6b7   :  { %3931 = vmatmul.mubr.bf16.vlgmr.msra.gmra.mrb[20].mxu1 %v8620_v9  ;;  %3711 = vmatprep.subr.bf16.mxu0 %v6085_v17  ;;  %v6132_v17 = vld [vmem:[%s9303_s3 + $0x480] ss:$16 sps:$4 sm:$0xff]  }
 0x6b8   :  { %3940 = vmatpush1.bf16.msra.mxu1 %v6086_v0  ;;  %3971 = vmatprep.mubr.bf16.mxu1 %v8628_v39  ;;  %v6133_v0 = vld [vmem:[%s9303_s3 + $0x4a4] ss:$16 sps:$4 sm:$0xff]  }
 0x6b9   :  { %3941 = vmatprep.subr.bf16.mxu1 %v6087_v40  ;;  %v6134_v40 = vld [vmem:[%s9303_s3 + $0x788] ss:$16 sps:$4 sm:$0xff]  }
 0x6ba   :  { %3712 = vmatpush1.bf16.msra.mxu0 %v6088_v42  ;;  %v6135_v42 = vld [vmem:[%s9303_s3 + $0x7ac] ss:$16 sps:$4 sm:$0xff]  }
 0x6bb   :  { %3713 = vmatprep.subr.bf16.mxu0 %v6089_v37  ;;  %v6136_v37 = vld [vmem:[%s9303_s3 + $0x4a0] ss:$16 sps:$4 sm:$0xff]  }
 0x6bc   :  { %3942 = vmatpush1.bf16.msra.mxu1 %v6090_v62  ;;  %v6137_v62 = vld [vmem:[%s9303_s3 + $0x4c4] ss:$16 sps:$4 sm:$0xff]  }
 0x6bd   :  { %3943 = vmatprep.subr.bf16.mxu1 %v6091_v26  ;;  %v8653_v47 = vpop.f32.mrb[16].mxu1  ;;  %v6138_v26 = vld [vmem:[%s9303_s3 + $0x7a8] ss:$16 sps:$4 sm:$0xff]  }
 0x6be   :  { %3714 = vmatpush1.bf16.msra.mxu0 %v6092_v15  ;;  %v8658_v48 = vpop.f32.mrb[17].mxu1  ;;  %v6139_v15 = vld [vmem:[%s9303_s3 + $0x7cc] ss:$16 sps:$4 sm:$0xff]  }
 0x6bf   :  { %3715 = vmatprep.subr.bf16.mxu0 %v6093_v30  ;;  %v3629_v38 = vpop.f32.mrb[18].mxu1  ;;  %v6140_v30 = vld [vmem:[%s9303_s3 + $0x4c0] ss:$16 sps:$4 sm:$0xff]  }
 0x6c0   :  { %3944 = vmatpush1.bf16.msra.mxu1 %v6094_v49  ;;  %v3630_v7 = vpop.f32.mrb[19].mxu1  ;;  %v6141_v38 = vld [vmem:[%s9303_s3 + $0x4e4] ss:$16 sps:$4 sm:$0xff]   ;;  %v6142_v49 = vld [vmem:[%s9303_s3 + $0x7c8] ss:$16 sps:$4 sm:$0xff]  }
 0x6c1   :  { %3945 = vmatprep.subr.bf16.mxu1 %v6095_v50  ;;  %v6143_v7 = vld [vmem:[%s9303_s3 + $0x7ec] ss:$16 sps:$4 sm:$0xff]   ;;  %v6144_v50 = vld [vmem:[%s9303_s3 + $0x4e0] ss:$16 sps:$4 sm:$0xff]  }
 0x6c2   :  { %3716 = vmatpush1.bf16.msra.mxu0 %v6096_v52  ;;  %v6145_v52 = vld [vmem:[%s9303_s3 + $0x504] ss:$16 sps:$4 sm:$0xff]  }
 0x6c3   :  { %3717 = vmatprep.subr.bf16.mxu0 %v6097_v63  ;;  %v6146_v63 = vld [vmem:[%s9303_s3 + $0x7e8] ss:$16 sps:$4 sm:$0xff]  }
 0x6c4   :  { %3946 = vmatpush1.bf16.msra.mxu1 %v6098_v19  ;;  %v8826_v19 = vpack.c.bf16 %v8593_v27, %v8593_v27  ;;  %v6150_v27 = vld [vmem:[%s9303_s3 + $0x544] ss:$16 sps:$4 sm:$0xff]  }
 0x6c5   :  { %3947 = vmatprep.subr.bf16.mxu1 %v6099_v4  ;;  %v6147_v4 = vld [vmem:[%s9303_s3 + $0x500] ss:$16 sps:$4 sm:$0xff]  }
 0x6c6   :  { %3718 = vmatpush1.bf16.msra.mxu0 %v6100_v54  ;;  %v6148_v54 = vld [vmem:[%s9303_s3 + $0x524] ss:$16 sps:$4 sm:$0xff]  }
 0x6c7   :  { %3719 = vmatprep.subr.bf16.mxu0 %v6101_v56  ;;  %v6149_v56 = vld [vmem:[%s9303_s3 + $0x520] ss:$16 sps:$4 sm:$0xff]  }
 0x6c8   :  { %3948 = vmatpush1.bf16.msra.mxu1 %v6102_v58  ;;  %v6151_v58 = vld [vmem:[%s9303_s3 + $0x540] ss:$16 sps:$4 sm:$0xff]  }
 0x6c9   :  { %3949 = vmatprep.subr.bf16.mxu1 %v6103_v32  ;;  %v6152_v32 = vld [vmem:[%s9303_s3 + $0x564] ss:$16 sps:$4 sm:$0xff]  }
 0x6ca   :  { %3720 = vmatpush1.bf16.msra.mxu0 %v6104_v59  ;;  %v6153_v59 = vld [vmem:[%s9303_s3 + $0x560] ss:$16 sps:$4 sm:$0xff]  }
 0x6cb   :  { %3721 = vmatprep.subr.bf16.mxu0 %v6105_v2  ;;  %v6154_v2 = vld [vmem:[%s9303_s3 + $0x584] ss:$16 sps:$4 sm:$0xff]  }
 0x6cc   :  { %3950 = vmatpush1.bf16.msra.mxu1 %v6106_v5  ;;  %v6155_v5 = vld [vmem:[%s9303_s3 + $0x580] ss:$16 sps:$4 sm:$0xff]  }
 0x6cd   :  { %3951 = vmatprep.subr.bf16.mxu1 %v6107_v6  ;;  %v6156_v6 = vld [vmem:[%s9303_s3 + $0x5a4] ss:$16 sps:$4 sm:$0xff]  }
 0x6ce   :  { %3722 = vmatpush1.bf16.msra.mxu0 %v6108_v21  ;;  %v6157_v21 = vld [vmem:[%s9303_s3 + $0x5a0] ss:$16 sps:$4 sm:$0xff]  }
 0x6cf   :  { %3723 = vmatprep.subr.bf16.mxu0 %v6109_v46  ;;  %v6158_v46 = vld [vmem:[%s9303_s3 + $0x5c4] ss:$16 sps:$4 sm:$0xff]  }
 0x6d0   :  { %3952 = vmatpush1.bf16.msra.mxu1 %v6110_v11  ;;  %v6159_v11 = vld [vmem:[%s9303_s3 + $0x5c0] ss:$16 sps:$4 sm:$0xff]  }
 0x6d1   :  { %3953 = vmatprep.subr.bf16.mxu1 %v6111_v16  ;;  %v6160_v16 = vld [vmem:[%s9303_s3 + $0x5e4] ss:$16 sps:$4 sm:$0xff]  }
 0x6d2   :  { %3724 = vmatpush1.bf16.msra.mxu0 %v6112_v34  ;;  %v6161_v34 = vld [vmem:[%s9303_s3 + $0x5e0] ss:$16 sps:$4 sm:$0xff]  }
 0x6d3   :  { %3734 = vmatprep.subr.bf16.mxu0 %v6113_v44  ;;  %v6162_v44 = vld [vmem:[%s9303_s3 + $0x604] ss:$16 sps:$4 sm:$0xff]  }
 0x6d4   :  { %3954 = vmatpush1.bf16.msra.mxu1 %v6114_v20  ;;  %v6163_v20 = vld [vmem:[%s9303_s3 + $0x600] ss:$16 sps:$4 sm:$0xff]  }
 0x6d5   :  { %3726 = vmatmul.mubr.bf16.vlgmr.msra.gmra.mrb[24].mxu0 %v8402_v60  ;;  %3955 = vmatprep.subr.bf16.mxu1 %v6115_v13  ;;  %v6118_v60 = vld [vmem:[%s9303_s3 + $0x708] ss:$16 sps:$4 sm:$0xff]   ;;  %v6164_v13 = vld [vmem:[%s9303_s3 + $0x624] ss:$16 sps:$4 sm:$0xff]  }
 0x6d6   :  { %3735 = vmatpush1.bf16.msra.mxu0 %v6116_v12  ;;  %3766 = vmatprep.mubr.bf16.mxu0 %v8426_v14  ;;  %v6121_v14 = vld [vmem:[%s9303_s3 + $0x444] ss:$16 sps:$4 sm:$0xff]   ;;  %v6165_v12 = vld [vmem:[%s9303_s3 + $0x620] ss:$16 sps:$4 sm:$0xff]  }
 0x6d7   :  { %3736 = vmatprep.subr.bf16.mxu0 %v6117_v51  ;;  %v6167_v51 = vld [vmem:[%s9303_s3 + $0x640] ss:$16 sps:$4 sm:$0xff]  }
 0x6d8   :  { %3956 = vmatpush1.bf16.msra.mxu1 %v6118_v60  ;;  %v6169_v60 = vld [vmem:[%s9303_s3 + $0x660] ss:$16 sps:$4 sm:$0xff]  }
 0x6d9   :  { %3957 = vmatprep.subr.bf16.mxu1 %v6119_v25  ;;  %v6170_v25 = vld [vmem:[%s9303_s3 + $0x684] ss:$16 sps:$4 sm:$0xff]  }
 0x6da   :  { %3737 = vmatpush1.bf16.msra.mxu0 %v6120_v45  ;;  %v6171_v45 = vld [vmem:[%s9303_s3 + $0x680] ss:$16 sps:$4 sm:$0xff]  }
 0x6db   :  { %3738 = vmatprep.subr.bf16.mxu0 %v6121_v14  ;;  %v6172_v14 = vld [vmem:[%s9303_s3 + $0x6a4] ss:$16 sps:$4 sm:$0xff]  }
 0x6dc   :  { %3958 = vmatpush1.bf16.msra.mxu1 %v6122_v28 }
 0x6dd   :  { %3959 = vmatprep.subr.bf16.mxu1 %v6123_v1 }
 0x6de   :  { %3739 = vmatpush1.bf16.msra.mxu0 %v6124_v61 }
 0x6df   :  { %3740 = vmatprep.subr.bf16.mxu0 %v6125_v22  ;;  %v6173_v22 = vld [vmem:[%s9303_s3 + $0x6a0] ss:$16 sps:$4 sm:$0xff]  }
 0x6e0   :  { %3960 = vmatpush1.bf16.msra.mxu1 %v6126_v29 }
 0x6e1   :  { %3961 = vmatprep.subr.bf16.mxu1 %v6127_v33  ;;  %v6174_v33 = vld [vmem:[%s9303_s3 + $0x6c4] ss:$16 sps:$4 sm:$0xff]  }
 0x6e2   :  { %3741 = vmatpush1.bf16.msra.mxu0 %v6128_v35  ;;  %v6175_v35 = vld [vmem:[%s9303_s3 + $0x6c0] ss:$16 sps:$4 sm:$0xff]  }
 0x6e3   :  { %3742 = vmatprep.subr.bf16.mxu0 %v6129_v18  ;;  %v6176_v18 = vld [vmem:[%s9303_s3 + $0x6e4] ss:$16 sps:$4 sm:$0xff]  }
 0x6e4   :  { %3962 = vmatpush1.bf16.msra.mxu1 %v6130_v8  ;;  %v6177_v8 = vld [vmem:[%s9303_s3 + $0x6e0] ss:$16 sps:$4 sm:$0xff]  }
 0x6e5   :  { %3963 = vmatprep.subr.bf16.mxu1 %v6131_v23  ;;  %v6178_v23 = vld [vmem:[%s9303_s3 + $0x704] ss:$16 sps:$4 sm:$0xff]  }
 0x6e6   :  { %3743 = vmatpush1.bf16.msra.mxu0 %v6132_v17  ;;  %v6179_v17 = vld [vmem:[%s9303_s3 + $0x700] ss:$16 sps:$4 sm:$0xff]  }
 0x6e7   :  { %3744 = vmatprep.subr.bf16.mxu0 %v6133_v0  ;;  %v6180_v0 = vld [vmem:[%s9303_s3 + $0x724] ss:$16 sps:$4 sm:$0xff]  }
 0x6e8   :  { %3964 = vmatpush1.bf16.msra.mxu1 %v6134_v40  ;;  %v6181_v40 = vld [vmem:[%s9303_s3 + $0x720] ss:$16 sps:$4 sm:$0xff]  }
 0x6e9   :  { %3965 = vmatprep.subr.bf16.mxu1 %v6135_v42  ;;  %v6182_v42 = vld [vmem:[%s9303_s3 + $0x744] ss:$16 sps:$4 sm:$0xff]  }
 0x6ea   :  { %3745 = vmatpush1.bf16.msra.mxu0 %v6136_v37  ;;  %v6183_v37 = vld [vmem:[%s9303_s3 + $0x740] ss:$16 sps:$4 sm:$0xff]  }
 0x6eb   :  { %3746 = vmatprep.subr.bf16.mxu0 %v6137_v62  ;;  %v6184_v62 = vld [vmem:[%s9303_s3 + $0x764] ss:$16 sps:$4 sm:$0xff]  }
 0x6ec   :  { %3966 = vmatpush1.bf16.msra.mxu1 %v6138_v26  ;;  %v6185_v26 = vld [vmem:[%s9303_s3 + $0x760] ss:$16 sps:$4 sm:$0xff]  }
 0x6ed   :  { %3967 = vmatprep.subr.bf16.mxu1 %v6139_v15  ;;  %v6186_v15 = vld [vmem:[%s9303_s3 + $0x784] ss:$16 sps:$4 sm:$0xff]  }
 0x6ee   :  { %3747 = vmatpush1.bf16.msra.mxu0 %v6140_v30  ;;  %v6187_v30 = vld [vmem:[%s9303_s3 + $0x780] ss:$16 sps:$4 sm:$0xff]  }
 0x6ef   :  { %3748 = vmatprep.subr.bf16.mxu0 %v6141_v38  ;;  %v6188_v38 = vld [vmem:[%s9303_s3 + $0x7a4] ss:$16 sps:$4 sm:$0xff]  }
 0x6f0   :  { %3968 = vmatpush1.bf16.msra.mxu1 %v6142_v49  ;;  %v6189_v49 = vld [vmem:[%s9303_s3 + $0x7a0] ss:$16 sps:$4 sm:$0xff]  }
 0x6f1   :  { %3969 = vmatprep.subr.bf16.mxu1 %v6143_v7  ;;  %v6190_v7 = vld [vmem:[%s9303_s3 + $0x7c4] ss:$16 sps:$4 sm:$0xff]  }
 0x6f2   :  { %3749 = vmatpush1.bf16.msra.mxu0 %v6144_v50  ;;  %v6191_v50 = vld [vmem:[%s9303_s3 + $0x7c0] ss:$16 sps:$4 sm:$0xff]  }
 0x6f3   :  { %3750 = vmatprep.subr.bf16.mxu0 %v6145_v52  ;;  %v6192_v52 = vld [vmem:[%s9303_s3 + $0x7e4] ss:$16 sps:$4 sm:$0xff]  }
 0x6f4   :  { %3970 = vmatpush1.bf16.msra.mxu1 %v6146_v63  ;;  %v6193_v63 = vld [vmem:[%s9303_s3 + $0x7e0] ss:$16 sps:$4 sm:$0xff]  }
 0x6f6   :  { %3751 = vmatpush1.bf16.msra.mxu0 %v6147_v4 }
 0x6f7   :  { %3972 = vmatmul.mubr.bf16.vlgmr.msra.gmra.mrb[20].mxu1 %v8826_v19  ;;  %3752 = vmatprep.subr.bf16.mxu0 %v6148_v54 }
 0x6f8   :  { %4410 = vmatprep.mubr.bf16.mxu1 %v6253_v3 }
 0x6fa   :  { %3753 = vmatpush1.bf16.msra.mxu0 %v6149_v56 }
 0x6fb   :  { %3754 = vmatprep.subr.bf16.mxu0 %v6150_v27 }
 0x6fe   :  { %3755 = vmatpush1.bf16.msra.mxu0 %v6151_v58 }
 0x6ff   :  { %3756 = vmatprep.subr.bf16.mxu0 %v6152_v32 }
 0x702   :  { %3757 = vmatpush1.bf16.msra.mxu0 %v6153_v59 }
 0x703   :  { %3758 = vmatprep.subr.bf16.mxu0 %v6154_v2 }
 0x706   :  { %3759 = vmatpush1.bf16.msra.mxu0 %v6155_v5 }
 0x707   :  { %3760 = vmatprep.subr.bf16.mxu0 %v6156_v6 }
 0x70a   :  { %3761 = vmatpush1.bf16.msra.mxu0 %v6157_v21 }
 0x70b   :  { %3762 = vmatprep.subr.bf16.mxu0 %v6158_v46 }
 0x70e   :  { %3763 = vmatpush1.bf16.msra.mxu0 %v6159_v11 }
 0x70f   :  { %3764 = vmatprep.subr.bf16.mxu0 %v6160_v16 }
 0x712   :  { %3765 = vmatpush1.bf16.msra.mxu0 %v6161_v34 }
 0x713   :  { %3775 = vmatprep.subr.bf16.mxu0 %v6162_v44 }
 0x715   :  { %3767 = vmatmul.mubr.bf16.vlgmr.msra.gmra.mrb[24].mxu0 %v8620_v9  ;;  %v6166_v9 = vld [vmem:[%s9303_s3 + $0x644] ss:$16 sps:$4 sm:$0xff]  }
 0x716   :  { %3776 = vmatpush1.bf16.msra.mxu0 %v6163_v20  ;;  %3807 = vmatprep.mubr.bf16.mxu0 %v8628_v39  ;;  %v6168_v39 = vld [vmem:[%s9303_s3 + $0x664] ss:$16 sps:$4 sm:$0xff]  }
 0x717   :  { %3777 = vmatprep.subr.bf16.mxu0 %v6164_v13 }
 0x71a   :  { %3778 = vmatpush1.bf16.msra.mxu0 %v6165_v12 }
 0x71b   :  { %3779 = vmatprep.subr.bf16.mxu0 %v6166_v9 }
 0x71e   :  { %3780 = vmatpush1.bf16.msra.mxu0 %v6167_v51 }
 0x71f   :  { %3781 = vmatprep.subr.bf16.mxu0 %v6168_v39 }
 0x722   :  { %3782 = vmatpush1.bf16.msra.mxu0 %v6169_v60 }
 0x723   :  { %3783 = vmatprep.subr.bf16.mxu0 %v6170_v25 }
 0x726   :  { %3784 = vmatpush1.bf16.msra.mxu0 %v6171_v45 }
 0x727   :  { %3785 = vmatprep.subr.bf16.mxu0 %v6172_v14 }
 0x728   :  { %v3435_v28 = vpop.f32.mrb[20].mxu0 }
 0x729   :  { %3442 = vst [vmem:[%s9309_s9] sm:$0xff] %v3435_v28  ;;  %v3437_v1 = vpop.f32.mrb[21].mxu0 }
 0x72a   :  { %3443 = vst [vmem:[%s9309_s9 + $0x8] sm:$0xff] %v3437_v1  ;;  %v3439_v61 = vpop.f32.mrb[22].mxu0  ;;  %3786 = vmatpush1.bf16.msra.mxu0 %v6173_v22 }
 0x72b   :  { %v3440_v29 = vpop.f32.mrb[23].mxu0  ;;  %3787 = vmatprep.subr.bf16.mxu0 %v6174_v33 }
 0x72e   :  { %3788 = vmatpush1.bf16.msra.mxu0 %v6175_v35 }
 0x72f   :  { %3789 = vmatprep.subr.bf16.mxu0 %v6176_v18 }
 0x732   :  { %3790 = vmatpush1.bf16.msra.mxu0 %v6177_v8 }
 0x733   :  { %3791 = vmatprep.subr.bf16.mxu0 %v6178_v23 }
 0x736   :  { %3792 = vmatpush1.bf16.msra.mxu0 %v6179_v17 }
 0x737   :  { %3793 = vmatprep.subr.bf16.mxu0 %v6180_v0 }
 0x73a   :  { %3794 = vmatpush1.bf16.msra.mxu0 %v6181_v40 }
 0x73b   :  { %3795 = vmatprep.subr.bf16.mxu0 %v6182_v42 }
 0x73e   :  { %3796 = vmatpush1.bf16.msra.mxu0 %v6183_v37 }
 0x73f   :  { %3797 = vmatprep.subr.bf16.mxu0 %v6184_v62 }
 0x742   :  { %3798 = vmatpush1.bf16.msra.mxu0 %v6185_v26 }
 0x743   :  { %3799 = vmatprep.subr.bf16.mxu0 %v6186_v15 }
 0x746   :  { %3800 = vmatpush1.bf16.msra.mxu0 %v6187_v30 }
 0x747   :  { %3801 = vmatprep.subr.bf16.mxu0 %v6188_v38 }
 0x74a   :  { %3802 = vmatpush1.bf16.msra.mxu0 %v6189_v49 }
 0x74b   :  { %3803 = vmatprep.subr.bf16.mxu0 %v6190_v7 }
 0x74e   :  { %3804 = vmatpush1.bf16.msra.mxu0 %v6191_v50 }
 0x74f   :  { %3805 = vmatprep.subr.bf16.mxu0 %v6192_v52 }
 0x752   :  { %3806 = vmatpush1.bf16.msra.mxu0 %v6193_v63 }
 0x755   :  { %3808 = vmatmul.mubr.bf16.vlgmr.msra.gmra.mrb[24].mxu0 %v8826_v19 }
 0x756   :  { %4168 = vmatprep.mubr.bf16.mxu0 %v6253_v3 }
 0x7ca   :  { %v3973_v4 = vpop.f32.mrb[20].mxu1 }
 0x7cb   :  { %v3986_v54 = vrot.slane %v3973_v4, 4  ;;  %v3975_v56 = vpop.f32.mrb[21].mxu1 }
 0x7cc   :  { %v3987_v27 = vrot.slane %v3975_v56, 4  ;;  %v3977_v58 = vpop.f32.mrb[22].mxu1 }
 0x7cd   :  { %v8983_v32 = vsel %vm9344_vm15, %v8653_v47, %v3986_v54  ;;  %v3978_v59 = vpop.f32.mrb[23].mxu1  ;;  %vm9348_vm15 = vmmov %vm9347_vm0 }
 0x7ce   :  { %v3995_v2 = vsel %vm9345_vm1, %v8658_v48, %v3987_v27  ;;  %vm9349_vm1 = vcmask 588800  }
 0x828   :  { %v3809_v5 = vpop.f32.mrb[24].mxu0 }
 0x829   :  { %v3984_v6 = vrot.slane %v3809_v5, 4  ;;  %v3811_v21 = vpop.f32.mrb[25].mxu0 }
 0x82a   :  { %v3985_v46 = vrot.slane %v3811_v21, 4  ;;  %v3813_v19 = vpop.f32.mrb[26].mxu0 }
 0x82b   :  { %v3992_v11 = vsel %vm9346_vm3, %v8438_v24, %v3984_v6  ;;  %v3814_v16 = vpop.f32.mrb[27].mxu0  ;;  %vm9350_vm3 = vmmov 0  }
 0x82c   :  { %v3993_v34 = vsel %vm9347_vm0, %v8443_v10, %v3985_v46  ;;  %4014 = vrot.lane.b32.xlu1 %v3992_v11, %s6246_s25  ;;  %4000 = vrot.lane.b32.xlu0 %v3992_v11, %s6247_s26 }
 0x82d   :  { %v5190_v47 = vpack.i.bf16 %v8983_v32, %v3993_v34  ;;  %v5225_v24 = vpack.i.bf16 %v3993_v34, %v3992_v11 }
 0x830   :  { %4042 = vrot.lane.b32.xlu1 %v3992_v11, %s6248_s27  ;;  %4028 = vrot.lane.b32.xlu0 %v3992_v11, %s6249_s28 }
 0x834   :  { %4070 = vrot.lane.b32.xlu1 %v3992_v11, %s6250_s29  ;;  %4056 = vrot.lane.b32.xlu0 %v3992_v11, %s6251_s30 }
 0x838   :  { %4084 = vrot.lane.b32.xlu0 %v3992_v11, %s6252_s10  ;;  %5191 = vrot.lane.b32.xlu1 %v5190_v47, %s6247_s26 }
 0x83c   :  { %5201 = vrot.lane.b32.xlu0 %v5190_v47, %s6249_s28  ;;  %5196 = vrot.lane.b32.xlu1 %v5190_v47, %s6246_s25 }
 0x840   :  { %5211 = vrot.lane.b32.xlu0 %v5190_v47, %s6251_s30  ;;  %5206 = vrot.lane.b32.xlu1 %v5190_v47, %s6248_s27 }
 0x844   :  { %5221 = vrot.lane.b32.xlu0 %v5190_v47, %s6252_s10  ;;  %5216 = vrot.lane.b32.xlu1 %v5190_v47, %s6250_s29 }
 0x848   :  { %4102 = vrot.lane.b32.xlu0 %v8983_v32, %s6255_s12  ;;  %5226 = vrot.lane.b32.xlu1 %v5225_v24, %s6255_s12 }
 0x84c   :  { %4020 = vrot.lane.b32.xlu0 %v3995_v2, %s6246_s25  ;;  %4006 = vrot.lane.b32.xlu1 %v3995_v2, %s6247_s26 }
 0x850   :  { %4048 = vrot.lane.b32.xlu0 %v3995_v2, %s6248_s27  ;;  %4034 = vrot.lane.b32.xlu1 %v3995_v2, %s6249_s28 }
 0x854   :  { %4076 = vrot.lane.b32.xlu0 %v3995_v2, %s6250_s29  ;;  %4062 = vrot.lane.b32.xlu1 %v3995_v2, %s6251_s30 }
 0x858   :  { %4104 = vrot.lane.b32.xlu0 %v3995_v2, %s6255_s12  ;;  %4090 = vrot.lane.b32.xlu1 %v3995_v2, %s6252_s10 }
 0x89e   :  { %v4015_v10 = vpop.permute.xlu1 %4014  ;;  %v4001_v48 = vpop.permute.xlu0 %4000 }
 0x8a2   :  { %v4043_v44 = vpop.permute.xlu1 %4042  ;;  %v4029_v20 = vpop.permute.xlu0 %4028 }
 0x8a6   :  { %v4071_v13 = vpop.permute.xlu1 %4070  ;;  %v4057_v12 = vpop.permute.xlu0 %4056 }
 0x8aa   :  { %v4085_v9 = vpop.permute.xlu0 %4084  ;;  %v9017_v51 = vpop.permute.xlu1 %5191 }
 0x8ab   :  { %v5194_v39 = vunpack.i.h.bf16 %v9017_v51  ;;  %v5193_v60 = vunpack.i.l.bf16 %v9017_v51 }
 0x8ad   :  { %v4008_v25 = vsel %vm2631_vm4, %v4001_v48, %v5193_v60  ;;  %v4009_v45 = vsel %vm2631_vm4, %v5193_v60, %v5194_v39 }
 0x8ae   :  { %v4112_v14 = vpack.c.bf16 %v4008_v25, %v3992_v11  ;;  %v9023_v28 = vpop.permute.xlu0 %5201  ;;  %v9025_v1 = vpop.permute.xlu1 %5196  ;;  %v4113_v61 = vpack.c.bf16 %v4009_v45, %v3993_v34 }
 0x8af   :  { %v5204_v22 = vunpack.i.h.bf16 %v9023_v28  ;;  %v5203_v29 = vunpack.i.l.bf16 %v9023_v28  ;;  %v5199_v33 = vunpack.i.h.bf16 %v9025_v1  ;;  %v5198_v35 = vunpack.i.l.bf16 %v9025_v1 }
 0x8b0   :  { %4136 = vmatprep.subr.bf16.mxu0 %v4113_v61 }
 0x8b1   :  { %v4036_v18 = vsel %vm2661_vm5, %v4029_v20, %v5203_v29  ;;  %v4022_v8 = vsel %vm2646_vm6, %v4015_v10, %v5198_v35  ;;  %4137 = vmatpush1.bf16.msra.mxu0 %v4112_v14  ;;  %v4023_v23 = vsel %vm2646_vm6, %v5198_v35, %v5199_v33  ;;  %v4037_v17 = vsel %vm2661_vm5, %v5203_v29, %v5204_v22  ;;  %v6194_v14 = vld [vmem:[%s9305_s5] sm:$0xf] }
 0x8b2   :  { %v4115_v0 = vpack.c.bf16 %v4036_v18, %v4022_v8  ;;  %v5212_v40 = vpop.permute.xlu0 %5211  ;;  %v5207_v42 = vpop.permute.xlu1 %5206  ;;  %v4116_v37 = vpack.c.bf16 %v4037_v17, %v4023_v23 }
 0x8b3   :  { %v5214_v62 = vunpack.i.h.bf16 %v5212_v40  ;;  %v5213_v26 = vunpack.i.l.bf16 %v5212_v40  ;;  %v5209_v15 = vunpack.i.h.bf16 %v5207_v42  ;;  %v5208_v30 = vunpack.i.l.bf16 %v5207_v42 }
 0x8b4   :  { %4138 = vmatprep.subr.bf16.mxu0 %v4116_v37 }
 0x8b5   :  { %v4064_v38 = vsel %vm2691_vm7, %v4057_v12, %v5213_v26  ;;  %v4050_v49 = vsel %vm2676_vm8, %v4043_v44, %v5208_v30  ;;  %4139 = vmatpush1.bf16.msra.mxu0 %v4115_v0  ;;  %v4051_v7 = vsel %vm2676_vm8, %v5208_v30, %v5209_v15  ;;  %v4065_v50 = vsel %vm2691_vm7, %v5213_v26, %v5214_v62 }
 0x8b6   :  { %v4118_v52 = vpack.c.bf16 %v4064_v38, %v4050_v49  ;;  %v5222_v63 = vpop.permute.xlu0 %5221  ;;  %v5217_v4 = vpop.permute.xlu1 %5216  ;;  %v4119_v54 = vpack.c.bf16 %v4065_v50, %v4051_v7 }
 0x8b7   :  { %v5224_v56 = vunpack.i.h.bf16 %v5222_v63  ;;  %v5223_v27 = vunpack.i.l.bf16 %v5222_v63  ;;  %v5219_v58 = vunpack.i.h.bf16 %v5217_v4  ;;  %v5218_v59 = vunpack.i.l.bf16 %v5217_v4 }
 0x8b8   :  { %4140 = vmatprep.subr.bf16.mxu0 %v4119_v54 }
 0x8b9   :  { %v4092_v2 = vsel %vm2721_vm9, %v4085_v9, %v5223_v27  ;;  %v4078_v5 = vsel %vm2706_vm10, %v4071_v13, %v5218_v59  ;;  %4141 = vmatpush1.bf16.msra.mxu0 %v4118_v52  ;;  %v4079_v6 = vsel %vm2706_vm10, %v5218_v59, %v5219_v58  ;;  %v4093_v21 = vsel %vm2721_vm9, %v5223_v27, %v5224_v56 }
 0x8ba   :  { %v4121_v46 = vpack.c.bf16 %v4092_v2, %v4078_v5  ;;  %v4103_v19 = vpop.permute.xlu0 %4102  ;;  %v5227_v11 = vpop.permute.xlu1 %5226  ;;  %v4122_v16 = vpack.c.bf16 %v4093_v21, %v4079_v6 }
 0x8bb   :  { %v5229_v34 = vunpack.i.h.bf16 %v5227_v11  ;;  %v5228_v47 = vunpack.i.l.bf16 %v5227_v11 }
 0x8bc   :  { %4142 = vmatprep.subr.bf16.mxu0 %v4122_v16 }
 0x8bd   :  { %v4107_v24 = vsel %vm2736_vm11, %v5229_v34, %v4103_v19  ;;  %4143 = vmatpush1.bf16.msra.mxu0 %v4121_v46  ;;  %v4106_v10 = vsel %vm2736_vm11, %v5228_v47, %v5229_v34 }
 0x8be   :  { %v4125_v48 = vpack.c.bf16 %v4107_v24, %v4107_v24  ;;  %v4021_v44 = vpop.permute.xlu0 %4020  ;;  %v4007_v20 = vpop.permute.xlu1 %4006  ;;  %v4124_v13 = vpack.c.bf16 %v4106_v10, %v4106_v10 }
 0x8bf   :  { %v4010_v12 = vsel %vm2631_vm4, %v5194_v39, %v4007_v20  ;;  %v4024_v39 = vsel %vm2646_vm6, %v5199_v33, %v4021_v44 }
 0x8c0   :  { %4937 = vmatprep.subr.msk.bf16.mxu0 %vm9347_vm0, %v4125_v48  ;;  %v4128_v9 = vsel %vm9348_vm15, %v4124_v13, 0  ;;  %v4114_v25 = vpack.c.bf16 %v4010_v12, %v8983_v32  ;;  %vm9351_vm15 = vmmov %vm9349_vm1 }
 0x8c1   :  { %4145 = vmatpush1.bf16.msra.mxu0 %v4128_v9 }
 0x8c2   :  { %v4049_v51 = vpop.permute.xlu0 %4048  ;;  %v4035_v60 = vpop.permute.xlu1 %4034  ;;  %5001 = vmatprep.subr.bf16.mxu0 %v6254_v53 }
 0x8c3   :  { %v4038_v45 = vsel %vm2661_vm5, %v5204_v22, %v4035_v60  ;;  %v4052_v29 = vsel %vm2676_vm8, %v5209_v15, %v4049_v51 }
 0x8c4   :  { %4938 = vmatmul.mubr.msk.bf16.vlgmr.msra.gmra.mrb[28].mxu0 %vm9349_vm1, %v6194_v14  ;;  %v4117_v32 = vpack.c.bf16 %v4038_v45, %v4024_v39 }
 0x8c5   :  { %5002 = vmatpush3.bf16.msra.mxu0 %v4114_v25  ;;  %5011 = vmatprep.mubr.msk.bf16.mxu0 %vm9350_vm3, %v6254_v53 }
 0x8c6   :  { %v4077_v28 = vpop.permute.xlu0 %4076  ;;  %v4063_v61 = vpop.permute.xlu1 %4062  ;;  %5003 = vmatprep.subr.bf16.mxu0 %v6254_v53 }
 0x8c7   :  { %v4066_v22 = vsel %vm2691_vm7, %v5214_v62, %v4063_v61  ;;  %v4080_v33 = vsel %vm2706_vm10, %v5219_v58, %v4077_v28 }
 0x8c8   :  { %v4120_v8 = vpack.c.bf16 %v4066_v22, %v4052_v29 }
 0x8c9   :  { %5004 = vmatpush3.bf16.msra.mxu0 %v4117_v32 }
 0x8ca   :  { %v4105_v35 = vpop.permute.xlu0 %4104  ;;  %v4091_v18 = vpop.permute.xlu1 %4090  ;;  %5005 = vmatprep.subr.bf16.mxu0 %v6254_v53 }
 0x8cb   :  { %v4094_v23 = vsel %vm2721_vm9, %v5224_v56, %v4091_v18  ;;  %v4108_v1 = vsel %vm2736_vm11, %v4103_v19, %v4105_v35 }
 0x8cc   :  { %v4123_v17 = vpack.c.bf16 %v4094_v23, %v4080_v33  ;;  %v4126_v0 = vpack.c.bf16 %v4108_v1, %v4108_v1 }
 0x8cd   :  { %5006 = vmatpush3.bf16.msra.mxu0 %v4120_v8 }
 0x8ce   :  { %5007 = vmatprep.subr.bf16.mxu0 %v6254_v53  ;;  %v4134_v40 = vsel %vm9347_vm0, %v4126_v0, 0 }
 0x8d1   :  { %5008 = vmatpush3.bf16.msra.mxu0 %v4123_v17 }
 0x8d2   :  { %5009 = vmatprep.subr.bf16.mxu0 %v6254_v53 }
 0x8d5   :  { %5010 = vmatpush3.bf16.msra.mxu0 %v4134_v40 }
 0x8d6   :  { %5015 = vmatprep.subr.bf16.mxu0 %v6254_v53 }
 0x8d8   :  { %5012 = vmatmul.mubr.msk.bf16.vlgmr.msra.gmra.mrb[32].mxu0 %vm9351_vm15, %v6194_v14 }
 0x8d9   :  { %5025 = vmatprep.mubr.msk.bf16.mxu0 %vm9350_vm3, %v6254_v53 }
 0x997   :  { %v4170_v42 = vpop.f32.mrb[28].mxu0 }
 0x998   :  { %v4171_v37 = vadd.f32 %v4170_v42, %v7530_v31  ;;  %v4172_v62 = vpop.f32.mrb[29].mxu0 }
 0x999   :  { %v4173_v26 = vadd.f32 %v4172_v62, %v7530_v31  ;;  %v4174_v15 = vpop.f32.mrb[30].mxu0 }
 0x99a   :  { %v4217_v30 = vmax.f32 %v4171_v37, 0.0  ;;  %v4175_v38 = vpop.f32.mrb[31].mxu0 }
 0x99b   :  { %v4218_v49 = vmax.f32 %v4173_v26, 0.0 }
 0x99c   :  { %v4220_v7 = vsel %vm7535_vm12, %v4217_v30, 0.0  ;;  %vm9352_vm12 = vcmask 343040  }
 0x99d   :  { %v4221_v50 = vsel %vm7539_vm13, %v4218_v49, 0.0  ;;  %vm9353_vm13 = vmmov %vm9352_vm12 }
 0x99e   :  { %v5230_v52 = vpack.i.bf16 %v4221_v50, %v4220_v7  ;;  %vm9354_vm1 = vmmov %vm9352_vm12 }
 0x99f   :  { %vm9355_vm3 = vmmov %vm9354_vm1 }
 0x9a0   :  { %5231 = vrot.lane.b32.xlu1 %v5230_v52, %s6257_s17 }
 0x9ab   :  { %v4211_v63 = vpop.f32.mrb[32].mxu0 }
 0x9ac   :  { %v4212_v4 = vadd.f32 %v4211_v63, %v7530_v31  ;;  %v5013_v54 = vpop.f32.mrb[33].mxu0 }
 0x9ad   :  { %v4214_v56 = vpop.f32.mrb[34].mxu0 }
 0x9ae   :  { %v4219_v27 = vmax.f32 %v4212_v4, 0.0  ;;  %v5014_v58 = vpop.f32.mrb[35].mxu0 }
 0x9b0   :  { %v4222_v59 = vsel %vm7549_vm2, %v4219_v27, 0.0  ;;  %vm9356_vm2 = vmmov %vm9347_vm0 }
 0x9b1   :  { %4230 = vrot.lane.b32.xlu0 %v4222_v59, %s6257_s17 }
 0xa12   :  { %v5232_v41 = vpop.permute.xlu1 %5231 }
 0xa13   :  { %v5234_v2 = vunpack.i.h.bf16 %v5232_v41  ;;  %v5233_v5 = vunpack.i.l.bf16 %v5232_v41 }
 0xa15   :  { %v4232_v6 = vsel %vm9352_vm12, %v5233_v5, %v5234_v2  ;;  %v4238_v21 = vsel %vm9353_vm13, 0.0, %v5233_v5 }
 0xa16   :  { %v5300_v57 = vpack.i.bf16 %v4232_v6, %v4238_v21 }
 0xa23   :  { %v4231_v43 = vpop.permute.xlu0 %4230 }
 0xa24   :  { %v4233_v46 = vsel %vm9354_vm1, %v5234_v2, %v4231_v43  ;;  %v4239_v31 = vsel %vm9355_vm3, %v4231_v43, 0.0 }
 0xa25   :  { %v5240_v19 = vpack.i.bf16 %v4239_v31, %v4238_v21  ;;  %v5235_v11 = vpack.i.bf16 %v4233_v46, %v4232_v6 }
 0xa27   :  { %5241 = vrot.lane.b32.xlu0 %v5240_v19, %s6247_s26  ;;  %5236 = vrot.lane.b32.xlu1 %v5235_v11, %s6247_s26 }
 0xa2b   :  { %5251 = vrot.lane.b32.xlu0 %v5235_v11, %s6249_s28  ;;  %5246 = vrot.lane.b32.xlu1 %v5235_v11, %s6246_s25 }
 0xa2f   :  { %5261 = vrot.lane.b32.xlu0 %v5240_v19, %s6249_s28  ;;  %5256 = vrot.lane.b32.xlu1 %v5240_v19, %s6246_s25 }
 0xa33   :  { %5271 = vrot.lane.b32.xlu0 %v5235_v11, %s6251_s30  ;;  %5266 = vrot.lane.b32.xlu1 %v5235_v11, %s6248_s27 }
 0xa37   :  { %5281 = vrot.lane.b32.xlu0 %v5240_v19, %s6251_s30  ;;  %5276 = vrot.lane.b32.xlu1 %v5240_v19, %s6248_s27 }
 0xa3b   :  { %5291 = vrot.lane.b32.xlu0 %v5235_v11, %s6252_s10  ;;  %5286 = vrot.lane.b32.xlu1 %v5235_v11, %s6250_s29 }
 0xa3f   :  { %5306 = vrot.lane.b32.xlu0 %v5240_v19, %s6252_s10  ;;  %5296 = vrot.lane.b32.xlu1 %v5240_v19, %s6250_s29 }
 0xa43   :  { %4344 = vrot.lane.b32.xlu0 %v4233_v46, %s6255_s12  ;;  %5301 = vrot.lane.b32.xlu1 %v5300_v57, %s6255_s12 }
 0xa47   :  { %4346 = vrot.lane.b32.xlu1 %v4239_v31, %s6255_s12 }
 0xa99   :  { %v5242_v16 = vpop.permute.xlu0 %5241  ;;  %v5237_v34 = vpop.permute.xlu1 %5236 }
 0xa9a   :  { %v5244_v47 = vunpack.i.h.bf16 %v5242_v16  ;;  %v5243_v24 = vunpack.i.l.bf16 %v5242_v16  ;;  %v5239_v10 = vunpack.i.h.bf16 %v5237_v34  ;;  %v5238_v48 = vunpack.i.l.bf16 %v5237_v34 }
 0xa9c   :  { %v4252_v44 = vsel %vm2631_vm4, %v5239_v10, %v5244_v47  ;;  %v4250_v20 = vsel %vm2631_vm4, %v5243_v24, %v5238_v48  ;;  %v4251_v13 = vsel %vm2631_vm4, %v5238_v48, %v5239_v10  ;;  %vm9357_vm4 = vmmov %vm9347_vm0 }
 0xa9d   :  { %v4356_v12 = vpack.c.bf16 %v4252_v44, %v4233_v46  ;;  %v4942_v9 = vpack.c.bf16 %v4250_v20, %v5233_v5  ;;  %v5252_v51 = vpop.permute.xlu0 %5251  ;;  %v5247_v60 = vpop.permute.xlu1 %5246  ;;  %v4355_v25 = vpack.c.bf16 %v4251_v13, %v4232_v6 }
 0xa9e   :  { %v5254_v45 = vunpack.i.h.bf16 %v5252_v51  ;;  %v5253_v14 = vunpack.i.l.bf16 %v5252_v51  ;;  %v5249_v39 = vunpack.i.h.bf16 %v5247_v60  ;;  %v5248_v28 = vunpack.i.l.bf16 %v5247_v60 }
 0xa9f   :  { %4378 = vmatprep.subr.bf16.mxu1 %v4355_v25  ;;  %5016 = vmatpush3.bf16.msra.mxu0 %v4356_v12 }
 0xaa0   :  { %4943 = vmatpush1.bf16.msk.msra.mxu1 %vm7640_vm14, %v4942_v9  ;;  %v4265_v61 = vsel %vm2646_vm6, %v5248_v28, %v5249_v39  ;;  %v4279_v32 = vsel %vm2661_vm5, %v5253_v14, %v5254_v45  ;;  %5017 = vmatprep.subr.bf16.mxu0 %v6254_v53 }
 0xaa1   :  { %v5262_v22 = vpop.permute.xlu0 %5261  ;;  %v5257_v29 = vpop.permute.xlu1 %5256  ;;  %v4358_v35 = vpack.c.bf16 %v4279_v32, %v4265_v61 }
 0xaa2   :  { %v5264_v18 = vunpack.i.h.bf16 %v5262_v22  ;;  %v5263_v8 = vunpack.i.l.bf16 %v5262_v22  ;;  %v5259_v23 = vunpack.i.h.bf16 %v5257_v29  ;;  %v5258_v1 = vunpack.i.l.bf16 %v5257_v29 }
 0xaa3   :  { %4380 = vmatprep.subr.bf16.mxu1 %v4358_v35 }
 0xaa4   :  { %v4278_v33 = vsel %vm2661_vm5, %v5263_v8, %v5253_v14  ;;  %v4280_v17 = vsel %vm2661_vm5, %v5254_v45, %v5264_v18  ;;  %v4264_v36 = vsel %vm2646_vm6, %v5258_v1, %v5248_v28  ;;  %v4266_v0 = vsel %vm2646_vm6, %v5249_v39, %v5259_v23  ;;  %vm9358_vm5 = vmmov %vm9347_vm0 }
 0xaa5   :  { %v4357_v40 = vpack.c.bf16 %v4278_v33, %v4264_v36  ;;  %v4359_v42 = vpack.c.bf16 %v4280_v17, %v4266_v0  ;;  %v5272_v37 = vpop.permute.xlu0 %5271  ;;  %v5267_v62 = vpop.permute.xlu1 %5266  ;;  %v6195_v33 = vld [vmem:[%s9308_s4 + $0x4] ss:$8 sps:$4 sm:$0xff]   ;;  %vm9359_vm6 = vmmov %vm9351_vm15  ;;  %v6198_v36 = vld [vmem:[%s9308_s4] ss:$8 sps:$4 sm:$0xff]  }
 0xaa6   :  { %v5274_v26 = vunpack.i.h.bf16 %v5272_v37  ;;  %v5273_v15 = vunpack.i.l.bf16 %v5272_v37  ;;  %v5269_v30 = vunpack.i.h.bf16 %v5267_v62  ;;  %v5268_v38 = vunpack.i.l.bf16 %v5267_v62  ;;  %v6197_v17 = vld [vmem:[%s9308_s4 + $0x104] ss:$8 sps:$4 sm:$0xff]   ;;  %v6199_v0 = vld [vmem:[%s9308_s4 + $0x14] ss:$8 sps:$4 sm:$0xff]   ;;  %v6202_v37 = vld [vmem:[%s9308_s4 + $0x10] ss:$8 sps:$4 sm:$0xff]  }
 0xaa7   :  { %4381 = vmatpush1.bf16.msra.mxu1 %v4357_v40  ;;  %5018 = vmatpush3.bf16.msra.mxu0 %v4359_v42  ;;  %v6200_v40 = vld [vmem:[%s9308_s4 + $0x100] ss:$8 sps:$4 sm:$0xff]   ;;  %v6201_v42 = vld [vmem:[%s9308_s4 + $0x114] ss:$8 sps:$4 sm:$0xff]   ;;  %v6203_v62 = vld [vmem:[%s9308_s4 + $0x24] ss:$8 sps:$4 sm:$0xff]  }
 0xaa8   :  { %v4293_v49 = vsel %vm2676_vm8, %v5268_v38, %v5269_v30  ;;  %v4307_v7 = vsel %vm2691_vm7, %v5273_v15, %v5274_v26  ;;  %5019 = vmatprep.subr.bf16.mxu0 %v6254_v53 }
 0xaa9   :  { %v5282_v50 = vpop.permute.xlu0 %5281  ;;  %v5277_v52 = vpop.permute.xlu1 %5276  ;;  %v4361_v63 = vpack.c.bf16 %v4307_v7, %v4293_v49  ;;  %v6209_v49 = vld [vmem:[%s9308_s4 + $0x134] ss:$8 sps:$4 sm:$0xff]   ;;  %v6210_v7 = vld [vmem:[%s9308_s4 + $0x30] ss:$8 sps:$4 sm:$0xff]  }
 0xaaa   :  { %v5284_v4 = vunpack.i.h.bf16 %v5282_v50  ;;  %v5283_v54 = vunpack.i.l.bf16 %v5282_v50  ;;  %v5279_v56 = vunpack.i.h.bf16 %v5277_v52  ;;  %v5278_v27 = vunpack.i.l.bf16 %v5277_v52  ;;  %v6211_v50 = vld [vmem:[%s9308_s4 + $0x44] ss:$8 sps:$4 sm:$0xff]   ;;  %v6212_v52 = vld [vmem:[%s9308_s4 + $0x130] ss:$8 sps:$4 sm:$0xff]  }
 0xaab   :  { %4382 = vmatprep.subr.bf16.mxu1 %v4361_v63  ;;  %v6213_v63 = vld [vmem:[%s9308_s4 + $0x144] ss:$8 sps:$4 sm:$0xff]  }
 0xaac   :  { %v4306_v58 = vsel %vm2691_vm7, %v5283_v54, %v5273_v15  ;;  %v4308_v59 = vsel %vm2691_vm7, %v5274_v26, %v5284_v4  ;;  %v4292_v41 = vsel %vm2676_vm8, %v5278_v27, %v5268_v38  ;;  %v4294_v2 = vsel %vm2676_vm8, %v5269_v30, %v5279_v56  ;;  %vm9360_vm7 = vmmov %vm9359_vm6  ;;  %v6204_v26 = vld [vmem:[%s9308_s4 + $0x110] ss:$8 sps:$4 sm:$0xff]   ;;  %v6206_v15 = vld [vmem:[%s9308_s4 + $0x20] ss:$8 sps:$4 sm:$0xff]  }
 0xaad   :  { %v4360_v5 = vpack.c.bf16 %v4306_v58, %v4292_v41  ;;  %v4362_v43 = vpack.c.bf16 %v4308_v59, %v4294_v2  ;;  %v5292_v6 = vpop.permute.xlu0 %5291  ;;  %v5287_v21 = vpop.permute.xlu1 %5286  ;;  %v6207_v30 = vld [vmem:[%s9308_s4 + $0x34] ss:$8 sps:$4 sm:$0xff]   ;;  %v6208_v38 = vld [vmem:[%s9308_s4 + $0x120] ss:$8 sps:$4 sm:$0xff]   ;;  %v6218_v58 = vld [vmem:[%s9308_s4 + $0x50] ss:$8 sps:$4 sm:$0xff]  }
 0xaae   :  { %v5294_v46 = vunpack.i.h.bf16 %v5292_v6  ;;  %v5293_v31 = vunpack.i.l.bf16 %v5292_v6  ;;  %v5289_v19 = vunpack.i.h.bf16 %v5287_v21  ;;  %v5288_v11 = vunpack.i.l.bf16 %v5287_v21  ;;  %v6214_v4 = vld [vmem:[%s9308_s4 + $0x40] ss:$8 sps:$4 sm:$0xff]   ;;  %v6215_v54 = vld [vmem:[%s9308_s4 + $0x54] ss:$8 sps:$4 sm:$0xff]   ;;  %v6219_v59 = vld [vmem:[%s9308_s4 + $0x64] ss:$8 sps:$4 sm:$0xff]  }
 0xaaf   :  { %4383 = vmatpush1.bf16.msra.mxu1 %v4360_v5  ;;  %5020 = vmatpush3.bf16.msra.mxu0 %v4362_v43  ;;  %v6216_v56 = vld [vmem:[%s9308_s4 + $0x140] ss:$8 sps:$4 sm:$0xff]   ;;  %v6217_v27 = vld [vmem:[%s9308_s4 + $0x154] ss:$8 sps:$4 sm:$0xff]   ;;  %v6220_v41 = vld [vmem:[%s9308_s4 + $0x150] ss:$8 sps:$4 sm:$0xff]  }
 0xab0   :  { %v4321_v57 = vsel %vm2706_vm10, %v5288_v11, %v5289_v19  ;;  %v4335_v16 = vsel %vm2721_vm9, %v5293_v31, %v5294_v46  ;;  %5021 = vmatprep.subr.bf16.mxu0 %v6254_v53  ;;  %v6221_v2 = vld [vmem:[%s9308_s4 + $0x164] ss:$8 sps:$4 sm:$0xff]   ;;  %v6222_v5 = vld [vmem:[%s9308_s4 + $0x60] ss:$8 sps:$4 sm:$0xff]   ;;  %v6223_v43 = vld [vmem:[%s9308_s4 + $0x74] ss:$8 sps:$4 sm:$0xff]  }
 0xab1   :  { %v5307_v34 = vpop.permute.xlu0 %5306  ;;  %v5297_v47 = vpop.permute.xlu1 %5296  ;;  %v4364_v24 = vpack.c.bf16 %v4335_v16, %v4321_v57  ;;  %v6224_v6 = vld [vmem:[%s9308_s4 + $0x160] ss:$8 sps:$4 sm:$0xff]   ;;  %v6225_v21 = vld [vmem:[%s9308_s4 + $0x174] ss:$8 sps:$4 sm:$0xff]   ;;  %v6231_v16 = vld [vmem:[%s9308_s4 + $0x90] ss:$8 sps:$4 sm:$0xff]  }
 0xab2   :  { %v5309_v10 = vunpack.i.h.bf16 %v5307_v34  ;;  %v5308_v48 = vunpack.i.l.bf16 %v5307_v34  ;;  %v5299_v44 = vunpack.i.h.bf16 %v5297_v47  ;;  %v5298_v20 = vunpack.i.l.bf16 %v5297_v47  ;;  %v6230_v57 = vld [vmem:[%s9308_s4 + $0x94] ss:$8 sps:$4 sm:$0xff]   ;;  %v6232_v34 = vld [vmem:[%s9308_s4 + $0xa4] ss:$8 sps:$4 sm:$0xff]   ;;  %v6233_v47 = vld [vmem:[%s9308_s4 + $0xa0] ss:$8 sps:$4 sm:$0xff]  }
 0xab3   :  { %4384 = vmatprep.subr.bf16.mxu1 %v4364_v24  ;;  %v6234_v24 = vld [vmem:[%s9308_s4 + $0xb4] ss:$8 sps:$4 sm:$0xff]  }
 0xab4   :  { %v4334_v13 = vsel %vm2721_vm9, %v5308_v48, %v5293_v31  ;;  %v4336_v12 = vsel %vm2721_vm9, %v5294_v46, %v5309_v10  ;;  %v4320_v9 = vsel %vm2706_vm10, %v5298_v20, %v5288_v11  ;;  %v4322_v51 = vsel %vm2706_vm10, %v5289_v19, %v5299_v44  ;;  %v6226_v46 = vld [vmem:[%s9308_s4 + $0x70] ss:$8 sps:$4 sm:$0xff]   ;;  %v6227_v31 = vld [vmem:[%s9308_s4 + $0x84] ss:$8 sps:$4 sm:$0xff]   ;;  %v6229_v11 = vld [vmem:[%s9308_s4 + $0x80] ss:$8 sps:$4 sm:$0xff]  }
 0xab5   :  { %v4363_v60 = vpack.c.bf16 %v4334_v13, %v4320_v9  ;;  %v4365_v25 = vpack.c.bf16 %v4336_v12, %v4322_v51  ;;  %v5302_v45 = vpop.permute.xlu1 %5301  ;;  %v4345_v28 = vpop.permute.xlu0 %4344  ;;  %v6228_v19 = vld [vmem:[%s9308_s4 + $0x170] ss:$8 sps:$4 sm:$0xff]   ;;  %v6236_v48 = vld [vmem:[%s9308_s4 + $0xc4] ss:$8 sps:$4 sm:$0xff]   ;;  %v6237_v44 = vld [vmem:[%s9308_s4 + $0xc0] ss:$8 sps:$4 sm:$0xff]  }
 0xab6   :  { %v5304_v14 = vunpack.i.h.bf16 %v5302_v45  ;;  %v5303_v39 = vunpack.i.l.bf16 %v5302_v45  ;;  %v6235_v10 = vld [vmem:[%s9308_s4 + $0xb0] ss:$8 sps:$4 sm:$0xff]   ;;  %v6238_v20 = vld [vmem:[%s9308_s4 + $0xd4] ss:$8 sps:$4 sm:$0xff]   ;;  %v6240_v12 = vld [vmem:[%s9308_s4 + $0xe4] ss:$8 sps:$4 sm:$0xff]  }
 0xab7   :  { %4385 = vmatpush1.bf16.msra.mxu1 %v4363_v60  ;;  %5022 = vmatpush3.bf16.msra.mxu0 %v4365_v25  ;;  %v6239_v13 = vld [vmem:[%s9308_s4 + $0xd0] ss:$8 sps:$4 sm:$0xff]   ;;  %v6241_v9 = vld [vmem:[%s9308_s4 + $0xe0] ss:$8 sps:$4 sm:$0xff]   ;;  %v6242_v51 = vld [vmem:[%s9308_s4 + $0xf4] ss:$8 sps:$4 sm:$0xff]  }
 0xab8   :  { %v4349_v61 = vsel %vm2736_vm11, %v5304_v14, %v4345_v28  ;;  %v4348_v32 = vsel %vm2736_vm11, %v5303_v39, %v5304_v14  ;;  %5023 = vmatprep.subr.bf16.mxu0 %v6254_v53  ;;  %v6196_v53 = vld [vmem:[%s9307_s6] sm:$0xf]  ;;  %v6243_v60 = vld [vmem:[%s9308_s4 + $0xf0] ss:$8 sps:$4 sm:$0xff]  }
 0xab9   :  { %v4367_v22 = vpack.c.bf16 %v4349_v61, %v4349_v61  ;;  %v4347_v29 = vpop.permute.xlu1 %4346  ;;  %v4366_v35 = vpack.c.bf16 %v4348_v32, %v4348_v32 }
 0xaba   :  { %v4350_v18 = vsel %vm2736_vm11, %v4345_v28, %v4347_v29 }
 0xabb   :  { %v4368_v8 = vpack.c.bf16 %v4350_v18, %v4350_v18  ;;  %4944 = vmatprep.subr.msk.bf16.mxu1 %vm9356_vm2, %v4367_v22  ;;  %v4370_v23 = vsel %vm9357_vm4, %v4366_v35, 0 }
 0xabc   :  { %4387 = vmatpush1.bf16.msra.mxu1 %v4370_v23 }
 0xabd   :  { %v4376_v1 = vsel %vm9358_vm5, %v4368_v8, 0  ;;  %4465 = vmatprep.subr.bf16.mxu1 %v6195_v33 }
 0xabe   :  { %5024 = vmatpush3.bf16.msra.mxu0 %v4376_v1 }
 0xabf   :  { %4945 = vmatmul.mubr.msk.bf16.vlgmr.msra.gmra.mrb[24].mxu1 %vm9359_vm6, %v6196_v53  ;;  %4506 = vmatprep.subr.bf16.mxu0 %v6197_v17 }
 0xac0   :  { %4466 = vmatpush1.bf16.msra.mxu1 %v6198_v36 }
 0xac1   :  { %5026 = vmatmul.mubr.msk.bf16.vlgmr.msra.gmra.mrb[36].mxu0 %vm9360_vm7, %v6196_v53  ;;  %4467 = vmatprep.subr.bf16.mxu1 %v6199_v0 }
 0xac2   :  { %4507 = vmatpush1.bf16.msra.mxu0 %v6200_v40  ;;  %4538 = vmatprep.mubr.bf16.mxu0 %v6253_v3  ;;  %v6205_v3 = vld [vmem:[%s9308_s4 + $0x124] ss:$8 sps:$4 sm:$0xff]  }
 0xac3   :  { %4508 = vmatprep.subr.bf16.mxu0 %v6201_v42 }
 0xac4   :  { %4468 = vmatpush1.bf16.msra.mxu1 %v6202_v37 }
 0xac5   :  { %4469 = vmatprep.subr.bf16.mxu1 %v6203_v62 }
 0xac6   :  { %4509 = vmatpush1.bf16.msra.mxu0 %v6204_v26 }
 0xac7   :  { %4510 = vmatprep.subr.bf16.mxu0 %v6205_v3 }
 0xac8   :  { %4470 = vmatpush1.bf16.msra.mxu1 %v6206_v15 }
 0xac9   :  { %4471 = vmatprep.subr.bf16.mxu1 %v6207_v30 }
 0xaca   :  { %4511 = vmatpush1.bf16.msra.mxu0 %v6208_v38 }
 0xacb   :  { %4512 = vmatprep.subr.bf16.mxu0 %v6209_v49 }
 0xacc   :  { %4472 = vmatpush1.bf16.msra.mxu1 %v6210_v7 }
 0xacd   :  { %4473 = vmatprep.subr.bf16.mxu1 %v6211_v50 }
 0xace   :  { %4513 = vmatpush1.bf16.msra.mxu0 %v6212_v52 }
 0xacf   :  { %4514 = vmatprep.subr.bf16.mxu0 %v6213_v63 }
 0xad0   :  { %4474 = vmatpush1.bf16.msra.mxu1 %v6214_v4 }
 0xad1   :  { %4475 = vmatprep.subr.bf16.mxu1 %v6215_v54 }
 0xad2   :  { %4515 = vmatpush1.bf16.msra.mxu0 %v6216_v56 }
 0xad3   :  { %4516 = vmatprep.subr.bf16.mxu0 %v6217_v27 }
 0xad4   :  { %4476 = vmatpush1.bf16.msra.mxu1 %v6218_v58 }
 0xad5   :  { %4477 = vmatprep.subr.bf16.mxu1 %v6219_v59 }
 0xad6   :  { %4517 = vmatpush1.bf16.msra.mxu0 %v6220_v41 }
 0xad7   :  { %4518 = vmatprep.subr.bf16.mxu0 %v6221_v2 }
 0xad8   :  { %4478 = vmatpush1.bf16.msra.mxu1 %v6222_v5 }
 0xad9   :  { %4479 = vmatprep.subr.bf16.mxu1 %v6223_v43 }
 0xada   :  { %4519 = vmatpush1.bf16.msra.mxu0 %v6224_v6 }
 0xadb   :  { %4520 = vmatprep.subr.bf16.mxu0 %v6225_v21 }
 0xadc   :  { %4480 = vmatpush1.bf16.msra.mxu1 %v6226_v46 }
 0xadd   :  { %4481 = vmatprep.subr.bf16.mxu1 %v6227_v31 }
 0xade   :  { %4521 = vmatpush1.bf16.msra.mxu0 %v6228_v19 }
 0xae0   :  { %4482 = vmatpush1.bf16.msra.mxu1 %v6229_v11 }
 0xae1   :  { %4483 = vmatprep.subr.bf16.mxu1 %v6230_v57 }
 0xae4   :  { %4484 = vmatpush1.bf16.msra.mxu1 %v6231_v16 }
 0xae5   :  { %4485 = vmatprep.subr.bf16.mxu1 %v6232_v34 }
 0xae8   :  { %4486 = vmatpush1.bf16.msra.mxu1 %v6233_v47 }
 0xae9   :  { %4487 = vmatprep.subr.bf16.mxu1 %v6234_v24 }
 0xaec   :  { %4488 = vmatpush1.bf16.msra.mxu1 %v6235_v10 }
 0xaed   :  { %4489 = vmatprep.subr.bf16.mxu1 %v6236_v48 }
 0xaf0   :  { %4490 = vmatpush1.bf16.msra.mxu1 %v6237_v44 }
 0xaf1   :  { %4491 = vmatprep.subr.bf16.mxu1 %v6238_v20 }
 0xaf4   :  { %4492 = vmatpush1.bf16.msra.mxu1 %v6239_v13 }
 0xaf5   :  { %4493 = vmatprep.subr.bf16.mxu1 %v6240_v12 }
 0xaf8   :  { %4494 = vmatpush1.bf16.msra.mxu1 %v6241_v9 }
 0xaf9   :  { %4495 = vmatprep.subr.bf16.mxu1 %v6242_v51 }
 0xafc   :  { %4496 = vmatpush1.bf16.msra.mxu1 %v6243_v60 }
 0xb92   :  { %v4412_v25 = vpop.f32.mrb[24].mxu1 }
 0xb93   :  { %v4413_v45 = vadd.f32 %v4412_v25, %v7723_v55  ;;  %v4414_v14 = vpop.f32.mrb[25].mxu1 }
 0xb94   :  { %v4415_v39 = vadd.f32 %v4414_v14, %v7723_v55  ;;  %v4416_v28 = vpop.f32.mrb[26].mxu1  ;;  %v4453_v61 = vpop.f32.mrb[36].mxu0 }
 0xb95   :  { %v4459_v32 = vmax.f32 %v4413_v45, 0.0  ;;  %v4454_v22 = vadd.f32 %v4453_v61, %v7723_v55  ;;  %v4417_v29 = vpop.f32.mrb[27].mxu1  ;;  %v5027_v35 = vpop.f32.mrb[37].mxu0 }
 0xb96   :  { %v4460_v18 = vmax.f32 %v4415_v39, 0.0  ;;  %v4456_v8 = vpop.f32.mrb[38].mxu0 }
 0xb97   :  { %v4461_v23 = vmax.f32 %v4454_v22, 0.0  ;;  %v5028_v1 = vpop.f32.mrb[39].mxu0  ;;  %v4462_v53 = vpack.c.bf16 %v4459_v32, %v4459_v32 }
 0xb98   :  { %v4463_v33 = vpack.c.bf16 %v4460_v18, %v4460_v18 }
 0xb99   :  { %v4464_v17 = vpack.c.bf16 %v4461_v23, %v4461_v23 }
 0xb9a   :  { %4497 = vmatprep.mubr.bf16.mxu1 %v4463_v33 }
 0xb9b   :  { %4498 = vmatmul.mubr.bf16.vlgmr.msra.gmra.mrb[28].mxu1 %v4462_v53  ;;  %4539 = vmatmul.mubr.bf16.vlgmr.msra.gmra.mrb[40].mxu0 %v4464_v17 }
 0xc6e   :  { %v4499_v36 = vpop.f32.mrb[28].mxu1  ;;  %v4540_v0 = vpop.f32.mrb[40].mxu0 }
 0xc6f   :  { %v4541_v40 = vadd.f32 %v4540_v0, %v4499_v36  ;;  %v4501_v42 = vpop.f32.mrb[29].mxu1  ;;  %v4542_v37 = vpop.f32.mrb[41].mxu0 }
 0xc70   :  { %v4543_v62 = vadd.f32 %v4542_v37, %v4501_v42  ;;  %v4503_v26 = vpop.f32.mrb[30].mxu1  ;;  %v4544_v55 = vpop.f32.mrb[42].mxu0 }
 0xc71   :  { %4947 = vst [vmem:[%s9309_s9 + $0x10] sm:$0xff] %v4541_v40  ;;  %v4504_v3 = vpop.f32.mrb[31].mxu1  ;;  %v4545_v15 = vpop.f32.mrb[43].mxu0 }
 0xc72   :  { %4948 = vst [vmem:[%s9309_s9 + $0x18] sm:$0xff] %v4543_v62 }

</bundles_post_ra>
